<compile_context>
chip_gen: v6e
topology: v6e:2x2x1
jax: 0.10.0
libtpu: 0.0.40
codegen_flags: <defaults>
</compile_context>

<pallas_src>
import functools

import numpy as np
import jax
import jax.numpy as jnp
from jax.experimental import pallas as pl
from jax.experimental.pallas import tpu as pltpu


# ----------------------------- Pallas kernels -----------------------------

def _fused_attention_kernel(x_ref, wr_ref, br_ref, pmat_ref, dww_ref, dwb_ref,
                            g_ref, beta_ref, wqk_ref, wv_ref, o_ref, xr_ref,
                            *, n_mats, n_tok, eps, chunk):
    f32 = jnp.float32
    x = x_ref[0]                                                     # (dim, HW)
    HW = x.shape[1]
    C1, N1p = dwb_ref.shape

    # 1x1 proj_reduce_dim conv (identity matrix when stage == 1).
    xr = jnp.dot(wr_ref[...], x, preferred_element_type=f32) + br_ref[...]   # (C1, HW)

    # MPSM pyramid: one streaming matmul against the concatenated
    # pool / pool+shift matrices, then a VPU per-tap weighted sum over
    # lane-tile-aligned slices (N1p is a multiple of 128).
    tok_all = jnp.dot(xr, pmat_ref[...], preferred_element_type=f32)  # (C1, n_mats*N1p)
    tok = dwb_ref[...]
    for m in range(n_mats):
        tok = tok + dww_ref[m] * tok_all[:, m * N1p:(m + 1) * N1p]    # (C1, N1p)

    # LayerNorm over the channel axis (sublane reduction over C1 rows).
    mu = jnp.mean(tok, axis=0, keepdims=True)
    var = jnp.mean(jnp.square(tok - mu), axis=0, keepdims=True)
    tokn = (tok - mu) * jax.lax.rsqrt(var + eps) * g_ref[...] + beta_ref[...]  # (C1, N1p)

    # Folded q/k projection (scale already inside wqk) and v projection.
    kq = jnp.dot(wqk_ref[...], tokn, preferred_element_type=f32)      # (C1, N1p)
    v = jnp.dot(wv_ref[...], tokn, preferred_element_type=f32)        # (C1, N1p)
    kqT = kq.T                                                        # (N1p, C1), hoisted once

    # Additive mask hiding the zero-padded token columns from the softmax.
    if n_tok < N1p:
        row = jax.lax.broadcasted_iota(jnp.int32, (N1p, 1), 0)
        smask = jnp.where(row < n_tok, 0.0, -1e30).astype(f32)        # (N1p, 1)
    else:
        smask = None

    def attend(xq):
        # token-major scores: st[n, hw] = sum_c kq[c, n] * xq[c, hw]
        st = jnp.dot(kqT, xq, preferred_element_type=f32)             # (N1p, chunk)
        if smask is not None:
            st = st + smask
        st = st - jnp.max(st, axis=0, keepdims=True)
        p = jnp.exp(st)
        denom = jnp.sum(p, axis=0, keepdims=True)                     # (1, chunk)
        r = pl.reciprocal(denom, approx=True)        # EUP slot
        r = r * (2.0 - denom * r)                    # one Newton step -> ~f32 accuracy
        p = p * r
        # y[c, hw] = sum_n v[c, n] * p[n, hw]
        return jnp.dot(v, p, preferred_element_type=f32)              # (C1, chunk)

    n_chunks = HW // chunk
    if n_chunks == 1:
        o_ref[0] = attend(xr)
    else:
        xr_ref[...] = xr             # scratch copy -> lane-sliceable per chunk

        @pl.loop(0, n_chunks)
        def _(i):
            c0 = pl.multiple_of(i * chunk, chunk)
            o_ref[0, :, pl.ds(c0, chunk)] = attend(xr_ref[:, pl.ds(c0, chunk)])


def _proj_kernel(x_ref, w_ref, b_ref, o_ref):
    # Channel-major 1x1 conv: (Cout, Cin) @ (Cin, HW) + bias, lane-dense in/out.
    o_ref[0] = jnp.dot(w_ref[...], x_ref[0],
                       preferred_element_type=jnp.float32) + b_ref[...]


# ------------------------------ call wrappers -------------------------------

def _pick_chunk(hw):
    """Largest lane-aligned query chunk giving >= 2 chunks (bounds vreg spill)."""
    for c in (512, 256, 128):
        if hw % c == 0 and hw // c >= 2:
            return c
    return hw


def _vmem_capacity_bytes():
    try:
        return int(pltpu.get_tpu_info().vmem_capacity_bytes)
    except Exception:
        return 64 * 1024 * 1024      # v7x-safe fallback


def _fused_attention_call(x, wr, br, pmat, dww, dwb, g, beta, wqk, wv, *, n_tok):
    B, dim, HW = x.shape
    C1 = wr.shape[0]
    n_mats, _, N1p = dww.shape
    chunk = _pick_chunk(HW)

    def const(shape):
        return pl.BlockSpec(shape, lambda i: (0,) * len(shape))

    kernel = functools.partial(_fused_attention_kernel, n_mats=n_mats,
                               n_tok=n_tok, eps=1e-5, chunk=chunk)

    # VMEM budget from the actual operand footprint (pipeline blocks are
    # double-buffered; constants are fetched once but still occupy 2 buffers).
    itemsize = 4
    weight_bytes = sum(int(np.prod(a.shape)) * itemsize
                       for a in (wr, br, pmat, dww, dwb, g, beta, wqk, wv))
    block_bytes = (dim * HW + C1 * HW) * itemsize
    interm_bytes = (C1 * n_mats * N1p + 2 * chunk * N1p
                    + 2 * C1 * N1p + C1 * HW) * itemsize
    footprint = 2 * block_bytes + 2 * weight_bytes + interm_bytes
    vmem_limit = int(min(_vmem_capacity_bytes() - (2 << 20),
                         max(32 << 20, int(1.5 * footprint))))

    flops = 2 * B * (C1 * dim * HW             # reduce conv
                     + C1 * HW * n_mats * N1p  # MPSM matmul
                     + 2 * C1 * C1 * N1p       # kq / v
                     + HW * N1p * C1           # scores
                     + C1 * HW * N1p)          # attn @ v
    transcendentals = B * (HW * N1p + HW + N1p)
    bytes_accessed = int(sum(int(np.prod(a.shape)) * itemsize
                             for a in (x, wr, br, pmat, dww, dwb, g, beta, wqk, wv))
                         + B * C1 * HW * itemsize)

    return pl.pallas_call(
        kernel,
        out_shape=jax.ShapeDtypeStruct((B, C1, HW), jnp.float32),
        grid=(B,),
        in_specs=[
            pl.BlockSpec((1, dim, HW), lambda i: (i, 0, 0)),    # x (one batch / step)
            const((C1, dim)), const((C1, 1)),                   # reduce conv w, b
            const((HW, n_mats * N1p)),                          # concatenated pool/shift mats
            const((n_mats, C1, N1p)), const((C1, N1p)),         # depthwise tap weights / bias
            const((C1, 1)), const((C1, 1)),                     # LayerNorm gamma / beta
            const((C1, C1)), const((C1, C1)),                   # Wqk (folded), Wv
        ],
        out_specs=pl.BlockSpec((1, C1, HW), lambda i: (i, 0, 0)),
        scratch_shapes=[pltpu.VMEM((C1, HW), jnp.float32)],     # xr copy for lane slicing
        compiler_params=pltpu.CompilerParams(
            dimension_semantics=("parallel",),
            vmem_limit_bytes=vmem_limit),
        cost_estimate=pl.CostEstimate(flops=flops,
                                      transcendentals=transcendentals,
                                      bytes_accessed=bytes_accessed),
    )(x, wr, br, pmat, dww, dwb, g, beta, wqk, wv)


def _proj_call(x, w, b):
    B, Cin, HW = x.shape
    Cout = w.shape[0]
    flops = 2 * B * Cout * Cin * HW
    bytes_accessed = 4 * (B * Cin * HW + Cout * Cin + Cout + B * Cout * HW)
    return pl.pallas_call(
        _proj_kernel,
        out_shape=jax.ShapeDtypeStruct((B, Cout, HW), jnp.float32),
        grid=(B,),
        in_specs=[pl.BlockSpec((1, Cin, HW), lambda i: (i, 0, 0)),
                  pl.BlockSpec((Cout, Cin), lambda i: (0, 0)),
                  pl.BlockSpec((Cout, 1), lambda i: (0, 0))],
        out_specs=pl.BlockSpec((1, Cout, HW), lambda i: (i, 0, 0)),
        compiler_params=pltpu.CompilerParams(dimension_semantics=("parallel",)),
        cost_estimate=pl.CostEstimate(flops=flops, transcendentals=0,
                                      bytes_accessed=bytes_accessed),
    )(x, w, b)


# --------------------- host-side MPSM operand folding ----------------------

def _adaptive_pool_matrix(H, W, o):
    """(H*W, o*o) matrix so that pooled_flat = x_flat @ M (AdaptiveAvgPool2d)."""
    M = np.zeros((H * W, o * o), dtype=np.float32)
    for oi in range(o):
        h0, h1 = (oi * H) // o, -(-((oi + 1) * H) // o)
        for oj in range(o):
            w0, w1 = (oj * W) // o, -(-((oj + 1) * W) // o)
            inv = 1.0 / float((h1 - h0) * (w1 - w0))
            for ii in range(h0, h1):
                for jj in range(w0, w1):
                    M[ii * W + jj, oi * o + oj] = inv
    return M


def _shift_matrix(o, di, dj):
    """(o*o, o*o): (x @ S)[:, (i,j)] = x[:, (i+di-1, j+dj-1)] with zero padding."""
    S = np.zeros((o * o, o * o), dtype=np.float32)
    for i in range(o):
        si = i + di - 1
        if not 0 <= si < o:
            continue
        for j in range(o):
            sj = j + dj - 1
            if not 0 <= sj < o:
                continue
            S[si * o + sj, i * o + j] = 1.0
    return S


def build_mpsm_operands(H, W, outs, dw_ws, dw_bs, n1_pad):
    """Fold MPSM (adaptive pools + depthwise 3x3 convs) into matmul operands.

    Returns
      pmat: (H*W, 10*n1_pad) concatenated pool / pool+shift matrices, each tap
            zero-padded on the token axis to a lane multiple (static numpy).
      dww : (10, C1, n1_pad) per-token tap weights (tap 0 = 1: pool passthrough).
      dwb : (C1, n1_pad)     per-token depthwise bias (zero on padded columns).
      N1  : true token count.
    """
    N1 = sum(o * o for o in outs)
    n_mats = 10

    # -- static pooling / pool+shift matrices (independent of parameters) --
    P_lvls = [_adaptive_pool_matrix(H, W, o) for o in outs]
    taps = [np.concatenate(P_lvls, axis=1)]
    for t in range(9):
        di, dj = t // 3, t % 3
        taps.append(np.concatenate(
            [P_lvls[l] @ _shift_matrix(o, di, dj) for l, o in enumerate(outs)],
            axis=1))
    pmat_cat = np.zeros((H * W, n_mats * n1_pad), np.float32)
    for m, T in enumerate(taps):
        pmat_cat[:, m * n1_pad: m * n1_pad + N1] = T

    # -- traced per-channel depthwise weights / biases broadcast per token --
    C1 = dw_ws[0].shape[0]
    w_cols, b_cols = [], []
    for lvl, o in enumerate(outs):
        wl = dw_ws[lvl].reshape(C1, 9)                                  # (C1, 9)
        w_cols.append(jnp.repeat(wl[:, :, None], o * o, axis=2))        # (C1, 9, o*o)
        b_cols.append(jnp.repeat(dw_bs[lvl][:, None], o * o, axis=1))   # (C1, o*o)
    w_real = jnp.transpose(jnp.concatenate(w_cols, axis=2), (1, 0, 2))  # (9, C1, N1)
    dww = jnp.concatenate([jnp.ones((1, C1, N1), jnp.float32), w_real], axis=0)
    dww = jnp.pad(dww, ((0, 0), (0, 0), (0, n1_pad - N1))).astype(jnp.float32)
    dwb = jnp.pad(jnp.concatenate(b_cols, axis=1),
                  ((0, 0), (0, n1_pad - N1))).astype(jnp.float32)
    return jnp.asarray(pmat_cat, dtype=jnp.float32), dww, dwb, N1


# ------------------------------- forward -----------------------------------

def attention_forward(x, params, *, stage, qk_scale):
    """Pallas forward of the PyTorch Attention module (channel-major layout)."""
    scale = float(qk_scale) ** -0.5          # matches self.scale = qk_scale ** (-0.5)
    B, dim, H, W = x.shape
    HW = H * W

    if stage != 1:
        w_reduce = params["w_reduce"].astype(jnp.float32)
        b_reduce = params["b_reduce"].astype(jnp.float32)
    else:
        w_reduce = jnp.eye(dim, dtype=jnp.float32)   # no proj_reduce_dim at stage 1
        b_reduce = jnp.zeros((dim,), jnp.float32)
    C1 = w_reduce.shape[0]

    outs = [16, 8, 4, 2, 1] if stage != 4 else [4, 3, 2, 1]
    N1 = sum(o * o for o in outs)
    N1p = ((N1 + 127) // 128) * 128          # lane-aligned padded token count
    dw_ws = [params[f"dw_w{i + 1}"] for i in range(len(outs))]
    dw_bs = [params[f"dw_b{i + 1}"] for i in range(len(outs))]
    pmat, dww, dwb, _ = build_mpsm_operands(H, W, outs, dw_ws, dw_bs, N1p)

    # Host-folded q/k:  scores = (x_q Wq.T)(tokn.T Wk.T).T * scale
    #                          = xr.T @ (Wqk @ tokn),  Wqk = scale * Wq.T @ Wkv[:C1]
    wqk = (scale * params["w_q"].astype(jnp.float32).T) \
        @ params["w_kv"][:C1].astype(jnp.float32)                     # (C1, C1)
    wv = params["w_kv"][C1:].astype(jnp.float32)                      # (C1, C1)

    y = _fused_attention_call(
        x.reshape(B, dim, HW).astype(jnp.float32),
        w_reduce, b_reduce.reshape(C1, 1),
        pmat, dww, dwb,
        params["ln_gamma"].reshape(C1, 1).astype(jnp.float32),
        params["ln_beta"].reshape(C1, 1).astype(jnp.float32),
        wqk, wv, n_tok=N1)                                            # (B, C1, HW)

    # Exact PyTorch epilogue: (attn@v).transpose(1,2).contiguous().reshape(B,HW,C1)
    #   .reshape(B,H,W,C1).permute(0,3,1,2).  y is already the contiguous
    # (B, C1, HW) buffer, so this is a free reshape + one tiny transpose.
    # TODO(synk): this channel/spatial shuffle permutes elements across the
    # lane/sublane split and has no clean single-kernel Mosaic lowering; it is
    # kept as one small XLA transpose between the two Pallas calls.
    z = jnp.transpose(y.reshape(B, HW, C1), (0, 2, 1))                # (B, C1, HW)

    if stage != 1:
        z = _proj_call(z, params["w_proj"].astype(jnp.float32),
                       params["b_proj"].reshape(-1, 1).astype(jnp.float32))
    return z.reshape(B, -1, H, W)


# --------------------------- pure-JAX reference ----------------------------

def adaptive_avg_pool(x, out):
    B, C, H, W = x.shape
    return x.reshape(B, C, out, H // out, out, W // out).mean(axis=(3, 5))


def depthwise_conv3x3(x, w, b):
    y = jax.lax.conv_general_dilated(
        x, w, window_strides=(1, 1), padding=((1, 1), (1, 1)),
        feature_group_count=x.shape[1],
        dimension_numbers=("NCHW", "OIHW", "NCHW"))
    return y + b.reshape(1, -1, 1, 1)


def mpsm_tokens_ref(x, params):
    # Reference pooling uses reshape-mean, so it only covers the divisor pool
    # sizes of stages 1-3 (the kernel path's adaptive-pool matrices are general).
    B, C, H, W = x.shape
    outs = [16, 8, 4, 2, 1]
    toks = []
    for i, o in enumerate(outs):
        p = adaptive_avg_pool(x, o)
        p = p + depthwise_conv3x3(p, params[f"dw_w{i + 1}"], params[f"dw_b{i + 1}"])
        toks.append(p.reshape(B, C, -1))
    cat = jnp.concatenate(toks, axis=2)        # (B, C, N1)
    return jnp.transpose(cat, (0, 2, 1))       # (B, N1, C)


def reference_forward(x, params, *, stage, qk_scale):
    scale = float(qk_scale) ** -0.5
    if stage != 1:
        x = jnp.einsum("bchw,oc->bohw", x, params["w_reduce"]) \
            + params["b_reduce"].reshape(1, -1, 1, 1)
    B, C1, H, W = x.shape
    x1 = mpsm_tokens_ref(x, params)
    mu = x1.mean(-1, keepdims=True)
    var = ((x1 - mu) ** 2).mean(-1, keepdims=True)
    x1n = (x1 - mu) / jnp.sqrt(var + 1e-5) * params["ln_gamma"] + params["ln_beta"]
    kv = x1n @ params["w_kv"].T
    k, v = kv[..., :C1], kv[..., C1:]
    xq = jnp.transpose(x.reshape(B, C1, H * W), (0, 2, 1))
    q = xq @ params["w_q"].T
    attn = jax.nn.softmax(q @ jnp.swapaxes(k, -1, -2) * scale, axis=-1)
    y = attn @ v
    z = jnp.transpose(y, (0, 2, 1)).reshape(B, H * W, C1)
    z = jnp.transpose(z.reshape(B, H, W, C1), (0, 3, 1, 2))
    if stage != 1:
        z = jnp.einsum("bchw,oc->bohw", z, params["w_proj"]) \
            + params["b_proj"].reshape(1, -1, 1, 1)
    return z


# ---------------------------------- main -----------------------------------

if __name__ == "__main__":
    # Attention(dim=8, reduce_dim=2, stage=2, H=W=16, qk_scale=384)  -> C1 = 4.
    B, dim, reduce_dim, stage, H, W = 2, 8, 2, 2, 16, 16
    qk_scale = 384
    C1 = dim // reduce_dim

    key = jax.random.PRNGKey(0)
    keys = jax.random.split(key, 20)
    params = {
        "w_reduce": jax.random.normal(keys[0], (C1, dim)) * 0.1,     # Conv2d(dim, C1, 1)
        "b_reduce": jax.random.normal(keys[1], (C1,)) * 0.05,
        "w_proj":   jax.random.normal(keys[2], (dim, C1)) * 0.1,     # Conv2d(C1, dim, 1)
        "b_proj":   jax.random.normal(keys[3], (dim,)) * 0.05,
        "w_q":      jax.random.normal(keys[4], (C1, C1)) * 0.1,      # Linear(C1, C1), no bias
        "w_kv":     jax.random.normal(keys[5], (2 * C1, C1)) * 0.1,  # Linear(C1, 2*C1), no bias
        "ln_gamma": 1.0 + 0.1 * jax.random.normal(keys[6], (C1,)),
        "ln_beta":  0.05 * jax.random.normal(keys[7], (C1,)),
    }
    for i in range(5):  # MPSM depthwise 3x3 convs proj1..proj5
        params[f"dw_w{i + 1}"] = jax.random.normal(keys[8 + i], (C1, 1, 3, 3)) * 0.1
        params[f"dw_b{i + 1}"] = jax.random.normal(keys[13 + i], (C1,)) * 0.05
    params = jax.tree_util.tree_map(lambda a: a.astype(jnp.float32), params)

    x = jax.random.normal(keys[18], (B, dim, H, W), dtype=jnp.float32)

    fwd = jax.jit(functools.partial(attention_forward, stage=stage, qk_scale=qk_scale))
    out = jax.block_until_ready(fwd(x, params))
    assert out.shape == (B, dim, H, W), out.shape

    ref = reference_forward(x, params, stage=stage, qk_scale=qk_scale)
    max_err = float(jnp.max(jnp.abs(out - ref)))
    assert jnp.allclose(out, ref, atol=2e-4, rtol=2e-4), max_err

    print("KERNEL_OK")
</pallas_src>

<mosaic_0001>
module attributes {stable_mosaic.version = 11 : i64} {
  func.func @_fused_attention_kernel(%arg0: i32, %arg1: memref<1x8x256xf32, #tpu.memory_space<vmem>>, %arg2: memref<4x8xf32, #tpu.memory_space<vmem>>, %arg3: memref<4x1xf32, #tpu.memory_space<vmem>>, %arg4: memref<256x3840xf32, #tpu.memory_space<vmem>>, %arg5: memref<10x4x384xf32, #tpu.memory_space<vmem>>, %arg6: memref<4x384xf32, #tpu.memory_space<vmem>>, %arg7: memref<4x1xf32, #tpu.memory_space<vmem>>, %arg8: memref<4x1xf32, #tpu.memory_space<vmem>>, %arg9: memref<4x4xf32, #tpu.memory_space<vmem>>, %arg10: memref<4x4xf32, #tpu.memory_space<vmem>>, %arg11: memref<1x4x256xf32, #tpu.memory_space<vmem>>, %arg12: memref<4x256xf32, #tpu.memory_space<vmem>>) attributes {dimension_semantics = [#tpu.dimension_semantics<parallel>], iteration_bounds = array<i64: 2>, scalar_prefetch = 0 : i64, scratch_operands = 1 : i64, tpu.core_type = #tpu.core_type<tc>, window_params = [{transform_indices = @transform_0, window_bounds = array<i64: 1, 8, 256>}, {pipeline_mode = #tpu.pipeline_mode<synchronous>, transform_indices = @transform_1, window_bounds = array<i64: 4, 8>}, {pipeline_mode = #tpu.pipeline_mode<synchronous>, transform_indices = @transform_2, window_bounds = array<i64: 4, 1>}, {pipeline_mode = #tpu.pipeline_mode<synchronous>, transform_indices = @transform_3, window_bounds = array<i64: 256, 3840>}, {pipeline_mode = #tpu.pipeline_mode<synchronous>, transform_indices = @transform_4, window_bounds = array<i64: 10, 4, 384>}, {pipeline_mode = #tpu.pipeline_mode<synchronous>, transform_indices = @transform_5, window_bounds = array<i64: 4, 384>}, {pipeline_mode = #tpu.pipeline_mode<synchronous>, transform_indices = @transform_6, window_bounds = array<i64: 4, 1>}, {pipeline_mode = #tpu.pipeline_mode<synchronous>, transform_indices = @transform_7, window_bounds = array<i64: 4, 1>}, {pipeline_mode = #tpu.pipeline_mode<synchronous>, transform_indices = @transform_8, window_bounds = array<i64: 4, 4>}, {pipeline_mode = #tpu.pipeline_mode<synchronous>, transform_indices = @transform_9, window_bounds = array<i64: 4, 4>}, {transform_indices = @transform_10, window_bounds = array<i64: 1, 4, 256>}]} {
    %c0 = arith.constant 0 : index
    %c0_0 = arith.constant 0 : index
    %c0_1 = arith.constant 0 : index
    %0 = vector.load %arg1[%c0, %c0_0, %c0_1] : memref<1x8x256xf32, #tpu.memory_space<vmem>>, vector<1x8x256xf32>
    %1 = vector.shape_cast %0 : vector<1x8x256xf32> to vector<8x256xf32>
    %c0_2 = arith.constant 0 : index
    %c0_3 = arith.constant 0 : index
    %2 = vector.load %arg2[%c0_2, %c0_3] : memref<4x8xf32, #tpu.memory_space<vmem>>, vector<4x8xf32>
    %cst = arith.constant dense<0.000000e+00> : vector<4x256xf32>
    %3 = tpu.matmul %2, %1, %cst {dimension_numbers = #tpu.dot_dimension_numbers<[1], [0], [0], [1], [0, 0, 1, 1], [], []>} : vector<4x8xf32>, vector<8x256xf32>, vector<4x256xf32> -> vector<4x256xf32>
    %c0_4 = arith.constant 0 : index
    %c0_5 = arith.constant 0 : index
    %4 = vector.load %arg3[%c0_4, %c0_5] : memref<4x1xf32, #tpu.memory_space<vmem>>, vector<4x1xf32>
    %5 = vector.broadcast %4 : vector<4x1xf32> to vector<4x256xf32>
    %6 = arith.addf %3, %5 : vector<4x256xf32>
    %c0_6 = arith.constant 0 : index
    %c0_7 = arith.constant 0 : index
    %7 = vector.load %arg4[%c0_6, %c0_7] : memref<256x3840xf32, #tpu.memory_space<vmem>>, vector<256x3840xf32>
    %cst_8 = arith.constant dense<0.000000e+00> : vector<4x3840xf32>
    %8 = tpu.matmul %6, %7, %cst_8 {dimension_numbers = #tpu.dot_dimension_numbers<[1], [0], [0], [1], [0, 0, 1, 1], [], []>} : vector<4x256xf32>, vector<256x3840xf32>, vector<4x3840xf32> -> vector<4x3840xf32>
    %c0_9 = arith.constant 0 : index
    %c0_10 = arith.constant 0 : index
    %9 = vector.load %arg6[%c0_9, %c0_10] : memref<4x384xf32, #tpu.memory_space<vmem>>, vector<4x384xf32>
    %c0_11 = arith.constant 0 : index
    %c0_12 = arith.constant 0 : index
    %c0_13 = arith.constant 0 : index
    %10 = vector.load %arg5[%c0_11, %c0_12, %c0_13] : memref<10x4x384xf32, #tpu.memory_space<vmem>>, vector<1x4x384xf32>
    %11 = vector.shape_cast %10 : vector<1x4x384xf32> to vector<4x384xf32>
    %12 = vector.extract_strided_slice %8 {offsets = [0, 0], sizes = [4, 384], strides = [1, 1]} : vector<4x3840xf32> to vector<4x384xf32>
    %13 = arith.mulf %11, %12 : vector<4x384xf32>
    %14 = arith.addf %9, %13 : vector<4x384xf32>
    %c1 = arith.constant 1 : index
    %c0_14 = arith.constant 0 : index
    %c0_15 = arith.constant 0 : index
    %15 = vector.load %arg5[%c1, %c0_14, %c0_15] : memref<10x4x384xf32, #tpu.memory_space<vmem>>, vector<1x4x384xf32>
    %16 = vector.shape_cast %15 : vector<1x4x384xf32> to vector<4x384xf32>
    %17 = vector.extract_strided_slice %8 {offsets = [0, 384], sizes = [4, 384], strides = [1, 1]} : vector<4x3840xf32> to vector<4x384xf32>
    %18 = arith.mulf %16, %17 : vector<4x384xf32>
    %19 = arith.addf %14, %18 : vector<4x384xf32>
    %c2 = arith.constant 2 : index
    %c0_16 = arith.constant 0 : index
    %c0_17 = arith.constant 0 : index
    %20 = vector.load %arg5[%c2, %c0_16, %c0_17] : memref<10x4x384xf32, #tpu.memory_space<vmem>>, vector<1x4x384xf32>
    %21 = vector.shape_cast %20 : vector<1x4x384xf32> to vector<4x384xf32>
    %22 = vector.extract_strided_slice %8 {offsets = [0, 768], sizes = [4, 384], strides = [1, 1]} : vector<4x3840xf32> to vector<4x384xf32>
    %23 = arith.mulf %21, %22 : vector<4x384xf32>
    %24 = arith.addf %19, %23 : vector<4x384xf32>
    %c3 = arith.constant 3 : index
    %c0_18 = arith.constant 0 : index
    %c0_19 = arith.constant 0 : index
    %25 = vector.load %arg5[%c3, %c0_18, %c0_19] : memref<10x4x384xf32, #tpu.memory_space<vmem>>, vector<1x4x384xf32>
    %26 = vector.shape_cast %25 : vector<1x4x384xf32> to vector<4x384xf32>
    %27 = vector.extract_strided_slice %8 {offsets = [0, 1152], sizes = [4, 384], strides = [1, 1]} : vector<4x3840xf32> to vector<4x384xf32>
    %28 = arith.mulf %26, %27 : vector<4x384xf32>
    %29 = arith.addf %24, %28 : vector<4x384xf32>
    %c4 = arith.constant 4 : index
    %c0_20 = arith.constant 0 : index
    %c0_21 = arith.constant 0 : index
    %30 = vector.load %arg5[%c4, %c0_20, %c0_21] : memref<10x4x384xf32, #tpu.memory_space<vmem>>, vector<1x4x384xf32>
    %31 = vector.shape_cast %30 : vector<1x4x384xf32> to vector<4x384xf32>
    %32 = vector.extract_strided_slice %8 {offsets = [0, 1536], sizes = [4, 384], strides = [1, 1]} : vector<4x3840xf32> to vector<4x384xf32>
    %33 = arith.mulf %31, %32 : vector<4x384xf32>
    %34 = arith.addf %29, %33 : vector<4x384xf32>
    %c5 = arith.constant 5 : index
    %c0_22 = arith.constant 0 : index
    %c0_23 = arith.constant 0 : index
    %35 = vector.load %arg5[%c5, %c0_22, %c0_23] : memref<10x4x384xf32, #tpu.memory_space<vmem>>, vector<1x4x384xf32>
    %36 = vector.shape_cast %35 : vector<1x4x384xf32> to vector<4x384xf32>
    %37 = vector.extract_strided_slice %8 {offsets = [0, 1920], sizes = [4, 384], strides = [1, 1]} : vector<4x3840xf32> to vector<4x384xf32>
    %38 = arith.mulf %36, %37 : vector<4x384xf32>
    %39 = arith.addf %34, %38 : vector<4x384xf32>
    %c6 = arith.constant 6 : index
    %c0_24 = arith.constant 0 : index
    %c0_25 = arith.constant 0 : index
    %40 = vector.load %arg5[%c6, %c0_24, %c0_25] : memref<10x4x384xf32, #tpu.memory_space<vmem>>, vector<1x4x384xf32>
    %41 = vector.shape_cast %40 : vector<1x4x384xf32> to vector<4x384xf32>
    %42 = vector.extract_strided_slice %8 {offsets = [0, 2304], sizes = [4, 384], strides = [1, 1]} : vector<4x3840xf32> to vector<4x384xf32>
    %43 = arith.mulf %41, %42 : vector<4x384xf32>
    %44 = arith.addf %39, %43 : vector<4x384xf32>
    %c7 = arith.constant 7 : index
    %c0_26 = arith.constant 0 : index
    %c0_27 = arith.constant 0 : index
    %45 = vector.load %arg5[%c7, %c0_26, %c0_27] : memref<10x4x384xf32, #tpu.memory_space<vmem>>, vector<1x4x384xf32>
    %46 = vector.shape_cast %45 : vector<1x4x384xf32> to vector<4x384xf32>
    %47 = vector.extract_strided_slice %8 {offsets = [0, 2688], sizes = [4, 384], strides = [1, 1]} : vector<4x3840xf32> to vector<4x384xf32>
    %48 = arith.mulf %46, %47 : vector<4x384xf32>
    %49 = arith.addf %44, %48 : vector<4x384xf32>
    %c8 = arith.constant 8 : index
    %c0_28 = arith.constant 0 : index
    %c0_29 = arith.constant 0 : index
    %50 = vector.load %arg5[%c8, %c0_28, %c0_29] : memref<10x4x384xf32, #tpu.memory_space<vmem>>, vector<1x4x384xf32>
    %51 = vector.shape_cast %50 : vector<1x4x384xf32> to vector<4x384xf32>
    %52 = vector.extract_strided_slice %8 {offsets = [0, 3072], sizes = [4, 384], strides = [1, 1]} : vector<4x3840xf32> to vector<4x384xf32>
    %53 = arith.mulf %51, %52 : vector<4x384xf32>
    %54 = arith.addf %49, %53 : vector<4x384xf32>
    %c9 = arith.constant 9 : index
    %c0_30 = arith.constant 0 : index
    %c0_31 = arith.constant 0 : index
    %55 = vector.load %arg5[%c9, %c0_30, %c0_31] : memref<10x4x384xf32, #tpu.memory_space<vmem>>, vector<1x4x384xf32>
    %56 = vector.shape_cast %55 : vector<1x4x384xf32> to vector<4x384xf32>
    %57 = vector.extract_strided_slice %8 {offsets = [0, 3456], sizes = [4, 384], strides = [1, 1]} : vector<4x3840xf32> to vector<4x384xf32>
    %58 = arith.mulf %56, %57 : vector<4x384xf32>
    %59 = arith.addf %54, %58 : vector<4x384xf32>
    %cst_32 = arith.constant dense<0.000000e+00> : vector<384xf32>
    %60 = vector.multi_reduction <add>, %59, %cst_32 [0] : vector<4x384xf32> to vector<384xf32>
    %61 = vector.shape_cast %60 : vector<384xf32> to vector<1x384xf32>
    %cst_33 = arith.constant 4.000000e+00 : f32
    %62 = vector.broadcast %cst_33 : f32 to vector<1x384xf32>
    %63 = arith.divf %61, %62 : vector<1x384xf32>
    %64 = vector.broadcast %63 : vector<1x384xf32> to vector<4x384xf32>
    %65 = arith.subf %59, %64 : vector<4x384xf32>
    %66 = arith.mulf %65, %65 : vector<4x384xf32>
    %cst_34 = arith.constant dense<0.000000e+00> : vector<384xf32>
    %67 = vector.multi_reduction <add>, %66, %cst_34 [0] : vector<4x384xf32> to vector<384xf32>
    %68 = vector.shape_cast %67 : vector<384xf32> to vector<1x384xf32>
    %cst_35 = arith.constant 4.000000e+00 : f32
    %69 = vector.broadcast %cst_35 : f32 to vector<1x384xf32>
    %70 = arith.divf %68, %69 : vector<1x384xf32>
    %71 = vector.broadcast %63 : vector<1x384xf32> to vector<4x384xf32>
    %72 = arith.subf %59, %71 : vector<4x384xf32>
    %cst_36 = arith.constant 9.99999974E-6 : f32
    %73 = vector.broadcast %cst_36 : f32 to vector<1x384xf32>
    %74 = arith.addf %70, %73 : vector<1x384xf32>
    %75 = math.rsqrt %74 : vector<1x384xf32>
    %76 = vector.broadcast %75 : vector<1x384xf32> to vector<4x384xf32>
    %77 = arith.mulf %72, %76 : vector<4x384xf32>
    %c0_37 = arith.constant 0 : index
    %c0_38 = arith.constant 0 : index
    %78 = vector.load %arg7[%c0_37, %c0_38] : memref<4x1xf32, #tpu.memory_space<vmem>>, vector<4x1xf32>
    %79 = vector.broadcast %78 : vector<4x1xf32> to vector<4x384xf32>
    %80 = arith.mulf %77, %79 : vector<4x384xf32>
    %c0_39 = arith.constant 0 : index
    %c0_40 = arith.constant 0 : index
    %81 = vector.load %arg8[%c0_39, %c0_40] : memref<4x1xf32, #tpu.memory_space<vmem>>, vector<4x1xf32>
    %82 = vector.broadcast %81 : vector<4x1xf32> to vector<4x384xf32>
    %83 = arith.addf %80, %82 : vector<4x384xf32>
    %c0_41 = arith.constant 0 : index
    %c0_42 = arith.constant 0 : index
    %84 = vector.load %arg9[%c0_41, %c0_42] : memref<4x4xf32, #tpu.memory_space<vmem>>, vector<4x4xf32>
    %cst_43 = arith.constant dense<0.000000e+00> : vector<4x384xf32>
    %85 = tpu.matmul %84, %83, %cst_43 {dimension_numbers = #tpu.dot_dimension_numbers<[1], [0], [0], [1], [0, 0, 1, 1], [], []>} : vector<4x4xf32>, vector<4x384xf32>, vector<4x384xf32> -> vector<4x384xf32>
    %c0_44 = arith.constant 0 : index
    %c0_45 = arith.constant 0 : index
    %86 = vector.load %arg10[%c0_44, %c0_45] : memref<4x4xf32, #tpu.memory_space<vmem>>, vector<4x4xf32>
    %cst_46 = arith.constant dense<0.000000e+00> : vector<4x384xf32>
    %87 = tpu.matmul %86, %83, %cst_46 {dimension_numbers = #tpu.dot_dimension_numbers<[1], [0], [0], [1], [0, 0, 1, 1], [], []>} : vector<4x4xf32>, vector<4x384xf32>, vector<4x384xf32> -> vector<4x384xf32>
    %88 = tpu.transpose %85, [1, 0] : vector<4x384xf32> -> vector<384x4xf32>
    %89 = tpu.iota {dimensions = array<i32: 0>} : vector<384x1xi32>
    %c341_i32 = arith.constant 341 : i32
    %90 = vector.broadcast %c341_i32 : i32 to vector<384x1xi32>
    %91 = arith.cmpi slt, %89, %90 : vector<384x1xi32>
    %cst_47 = arith.constant 0.000000e+00 : f32
    %cst_48 = arith.constant -1.000000e+30 : f32
    %92 = vector.broadcast %cst_47 : f32 to vector<384x1xf32>
    %93 = vector.broadcast %cst_48 : f32 to vector<384x1xf32>
    %94 = arith.select %91, %92, %93 : vector<384x1xi1>, vector<384x1xf32>
    %c0_49 = arith.constant 0 : index
    %c0_50 = arith.constant 0 : index
    %95 = vector.load %arg12[%c0_49, %c0_50] : memref<4x256xf32, #tpu.memory_space<vmem>>, vector<4x256xf32>
    tpu.vector_store %arg12[%c0_49, %c0_50], %6 {strides = array<i32>} : memref<4x256xf32, #tpu.memory_space<vmem>>, vector<4x256xf32>,
    %c0_i32 = arith.constant 0 : i32
    %c2_i32 = arith.constant 2 : i32
    %96 = arith.addi %c0_i32, %c2_i32 : i32
    %c1_i32 = arith.constant 1 : i32
    scf.for %arg13 = %c0_i32 to %96 step %c1_i32  : i32 {
      %c1_i32_52 = arith.constant 1 : i32
      %97 = arith.muli %arg13, %c1_i32_52 : i32
      %c0_i32_53 = arith.constant 0 : i32
      %98 = arith.addi %c0_i32_53, %97 : i32
      %c128_i32 = arith.constant 128 : i32
      %99 = arith.muli %98, %c128_i32 : i32
      %100 = tpu.assume_multiple %99, 128 : i32
      %c0_54 = arith.constant 0 : index
      %101 = arith.index_cast %100 : i32 to index
      %102 = vector.load %arg12[%c0_54, %101] : memref<4x256xf32, #tpu.memory_space<vmem>>, vector<4x128xf32>
      %cst_55 = arith.constant dense<0.000000e+00> : vector<384x128xf32>
      %103 = tpu.matmul %88, %102, %cst_55 {dimension_numbers = #tpu.dot_dimension_numbers<[1], [0], [0], [1], [0, 0, 1, 1], [], []>} : vector<384x4xf32>, vector<4x128xf32>, vector<384x128xf32> -> vector<384x128xf32>
      %104 = vector.broadcast %94 : vector<384x1xf32> to vector<384x128xf32>
      %105 = arith.addf %103, %104 : vector<384x128xf32>
      %cst_56 = arith.constant dense<0xFF800000> : vector<128xf32>
      %106 = vector.multi_reduction <maximumf>, %105, %cst_56 [0] : vector<384x128xf32> to vector<128xf32>
      %107 = vector.shape_cast %106 : vector<128xf32> to vector<1x128xf32>
      %108 = vector.broadcast %107 : vector<1x128xf32> to vector<384x128xf32>
      %109 = arith.subf %105, %108 : vector<384x128xf32>
      %110 = math.exp %109 : vector<384x128xf32>
      %cst_57 = arith.constant dense<0.000000e+00> : vector<128xf32>
      %111 = vector.multi_reduction <add>, %110, %cst_57 [0] : vector<384x128xf32> to vector<128xf32>
      %112 = vector.shape_cast %111 : vector<128xf32> to vector<1x128xf32>
      %113 = tpu.reciprocal %112 {approx = true} : vector<1x128xf32> -> vector<1x128xf32>
      %114 = arith.mulf %112, %113 : vector<1x128xf32>
      %cst_58 = arith.constant 2.000000e+00 : f32
      %115 = vector.broadcast %cst_58 : f32 to vector<1x128xf32>
      %116 = arith.subf %115, %114 : vector<1x128xf32>
      %117 = arith.mulf %113, %116 : vector<1x128xf32>
      %118 = vector.broadcast %117 : vector<1x128xf32> to vector<384x128xf32>
      %119 = arith.mulf %110, %118 : vector<384x128xf32>
      %cst_59 = arith.constant dense<0.000000e+00> : vector<4x128xf32>
      %120 = tpu.matmul %87, %119, %cst_59 {dimension_numbers = #tpu.dot_dimension_numbers<[1], [0], [0], [1], [0, 0, 1, 1], [], []>} : vector<4x384xf32>, vector<384x128xf32>, vector<4x128xf32> -> vector<4x128xf32>
      %c0_60 = arith.constant 0 : index
      %c0_61 = arith.constant 0 : index
      %121 = arith.index_cast %100 : i32 to index
      %122 = vector.load %arg11[%c0_60, %c0_61, %121] : memref<1x4x256xf32, #tpu.memory_space<vmem>>, vector<1x4x128xf32>
      %123 = vector.shape_cast %122 : vector<1x4x128xf32> to vector<4x128xf32>
      %124 = vector.shape_cast %120 : vector<4x128xf32> to vector<1x4x128xf32>
      tpu.vector_store %arg11[%c0_60, %c0_61, %121], %124 {strides = array<i32>} : memref<1x4x256xf32, #tpu.memory_space<vmem>>, vector<1x4x128xf32>,
    }
    %c2_i32_51 = arith.constant 2 : i32
    return
  }
  func.func @transform_0(%arg0: i32) -> (i32, i32, i32) {
    %c0_i32 = arith.constant 0 : i32
    %c0_i32_0 = arith.constant 0 : i32
    %c0_i32_1 = arith.constant 0 : i32
    return %arg0, %c0_i32, %c0_i32_0 : i32, i32, i32
  }
  func.func @transform_1(%arg0: i32) -> (i32, i32) {
    %c0_i32 = arith.constant 0 : i32
    %c0_i32_0 = arith.constant 0 : i32
    %c0_i32_1 = arith.constant 0 : i32
    return %c0_i32, %c0_i32_0 : i32, i32
  }
  func.func @transform_2(%arg0: i32) -> (i32, i32) {
    %c0_i32 = arith.constant 0 : i32
    %c0_i32_0 = arith.constant 0 : i32
    %c0_i32_1 = arith.constant 0 : i32
    return %c0_i32, %c0_i32_0 : i32, i32
  }
  func.func @transform_3(%arg0: i32) -> (i32, i32) {
    %c0_i32 = arith.constant 0 : i32
    %c0_i32_0 = arith.constant 0 : i32
    %c0_i32_1 = arith.constant 0 : i32
    return %c0_i32, %c0_i32_0 : i32, i32
  }
  func.func @transform_4(%arg0: i32) -> (i32, i32, i32) {
    %c0_i32 = arith.constant 0 : i32
    %c0_i32_0 = arith.constant 0 : i32
    %c0_i32_1 = arith.constant 0 : i32
    %c0_i32_2 = arith.constant 0 : i32
    return %c0_i32, %c0_i32_0, %c0_i32_1 : i32, i32, i32
  }
  func.func @transform_5(%arg0: i32) -> (i32, i32) {
    %c0_i32 = arith.constant 0 : i32
    %c0_i32_0 = arith.constant 0 : i32
    %c0_i32_1 = arith.constant 0 : i32
    return %c0_i32, %c0_i32_0 : i32, i32
  }
  func.func @transform_6(%arg0: i32) -> (i32, i32) {
    %c0_i32 = arith.constant 0 : i32
    %c0_i32_0 = arith.constant 0 : i32
    %c0_i32_1 = arith.constant 0 : i32
    return %c0_i32, %c0_i32_0 : i32, i32
  }
  func.func @transform_7(%arg0: i32) -> (i32, i32) {
    %c0_i32 = arith.constant 0 : i32
    %c0_i32_0 = arith.constant 0 : i32
    %c0_i32_1 = arith.constant 0 : i32
    return %c0_i32, %c0_i32_0 : i32, i32
  }
  func.func @transform_8(%arg0: i32) -> (i32, i32) {
    %c0_i32 = arith.constant 0 : i32
    %c0_i32_0 = arith.constant 0 : i32
    %c0_i32_1 = arith.constant 0 : i32
    return %c0_i32, %c0_i32_0 : i32, i32
  }
  func.func @transform_9(%arg0: i32) -> (i32, i32) {
    %c0_i32 = arith.constant 0 : i32
    %c0_i32_0 = arith.constant 0 : i32
    %c0_i32_1 = arith.constant 0 : i32
    return %c0_i32, %c0_i32_0 : i32, i32
  }
  func.func @transform_10(%arg0: i32) -> (i32, i32, i32) {
    %c0_i32 = arith.constant 0 : i32
    %c0_i32_0 = arith.constant 0 : i32
    %c0_i32_1 = arith.constant 0 : i32
    return %arg0, %c0_i32, %c0_i32_0 : i32, i32, i32
  }
}

module attributes {stable_mosaic.version = 11 : i64} {
  func.func @_proj_kernel(%arg0: i32, %arg1: memref<1x4x256xf32, #tpu.memory_space<vmem>>, %arg2: memref<8x4xf32, #tpu.memory_space<vmem>>, %arg3: memref<8x1xf32, #tpu.memory_space<vmem>>, %arg4: memref<1x8x256xf32, #tpu.memory_space<vmem>>) attributes {dimension_semantics = [#tpu.dimension_semantics<parallel>], iteration_bounds = array<i64: 2>, scalar_prefetch = 0 : i64, scratch_operands = 0 : i64, tpu.core_type = #tpu.core_type<tc>, window_params = [{transform_indices = @transform_0, window_bounds = array<i64: 1, 4, 256>}, {pipeline_mode = #tpu.pipeline_mode<synchronous>, transform_indices = @transform_1, window_bounds = array<i64: 8, 4>}, {pipeline_mode = #tpu.pipeline_mode<synchronous>, transform_indices = @transform_2, window_bounds = array<i64: 8, 1>}, {transform_indices = @transform_3, window_bounds = array<i64: 1, 8, 256>}]} {
    %c0 = arith.constant 0 : index
    %c0_0 = arith.constant 0 : index
    %0 = vector.load %arg2[%c0, %c0_0] : memref<8x4xf32, #tpu.memory_space<vmem>>, vector<8x4xf32>
    %c0_1 = arith.constant 0 : index
    %c0_2 = arith.constant 0 : index
    %c0_3 = arith.constant 0 : index
    %1 = vector.load %arg1[%c0_1, %c0_2, %c0_3] : memref<1x4x256xf32, #tpu.memory_space<vmem>>, vector<1x4x256xf32>
    %2 = vector.shape_cast %1 : vector<1x4x256xf32> to vector<4x256xf32>
    %cst = arith.constant dense<0.000000e+00> : vector<8x256xf32>
    %3 = tpu.matmul %0, %2, %cst {dimension_numbers = #tpu.dot_dimension_numbers<[1], [0], [0], [1], [0, 0, 1, 1], [], []>} : vector<8x4xf32>, vector<4x256xf32>, vector<8x256xf32> -> vector<8x256xf32>
    %c0_4 = arith.constant 0 : index
    %c0_5 = arith.constant 0 : index
    %4 = vector.load %arg3[%c0_4, %c0_5] : memref<8x1xf32, #tpu.memory_space<vmem>>, vector<8x1xf32>
    %5 = vector.broadcast %4 : vector<8x1xf32> to vector<8x256xf32>
    %6 = arith.addf %3, %5 : vector<8x256xf32>
    %c0_6 = arith.constant 0 : index
    %c0_7 = arith.constant 0 : index
    %c0_8 = arith.constant 0 : index
    %7 = vector.load %arg4[%c0_6, %c0_7, %c0_8] : memref<1x8x256xf32, #tpu.memory_space<vmem>>, vector<1x8x256xf32>
    %8 = vector.shape_cast %7 : vector<1x8x256xf32> to vector<8x256xf32>
    %9 = vector.shape_cast %6 : vector<8x256xf32> to vector<1x8x256xf32>
    tpu.vector_store %arg4[%c0_6, %c0_7, %c0_8], %9 {strides = array<i32>} : memref<1x8x256xf32, #tpu.memory_space<vmem>>, vector<1x8x256xf32>,
    return
  }
  func.func @transform_0(%arg0: i32) -> (i32, i32, i32) {
    %c0_i32 = arith.constant 0 : i32
    %c0_i32_0 = arith.constant 0 : i32
    %c0_i32_1 = arith.constant 0 : i32
    return %arg0, %c0_i32, %c0_i32_0 : i32, i32, i32
  }
  func.func @transform_1(%arg0: i32) -> (i32, i32) {
    %c0_i32 = arith.constant 0 : i32
    %c0_i32_0 = arith.constant 0 : i32
    %c0_i32_1 = arith.constant 0 : i32
    return %c0_i32, %c0_i32_0 : i32, i32
  }
  func.func @transform_2(%arg0: i32) -> (i32, i32) {
    %c0_i32 = arith.constant 0 : i32
    %c0_i32_0 = arith.constant 0 : i32
    %c0_i32_1 = arith.constant 0 : i32
    return %c0_i32, %c0_i32_0 : i32, i32
  }
  func.func @transform_3(%arg0: i32) -> (i32, i32, i32) {
    %c0_i32 = arith.constant 0 : i32
    %c0_i32_0 = arith.constant 0 : i32
    %c0_i32_1 = arith.constant 0 : i32
    return %arg0, %c0_i32, %c0_i32_0 : i32, i32, i32
  }
}

</mosaic_0001>

<bundles_post_ra>
// kernel: attention_forward.3
= control target key start
LH: loop header
LB: loop body
LE: loop exit
PB: predicated region body
PF: predicated region fallthrough
CT: control target
= control target key end

     0   :  { %s376_s12 = smov 0   ;;  %s399_s0 = inlined_call_operand.vmem [shape: f32[2,4,256], index: 0, kind: input, shape index: {}]   ;;  %s400_s1 = inlined_call_operand.vmem [shape: f32[8,4], index: 1, kind: input, shape index: {}]   ;;  %s401_s2 = inlined_call_operand.vmem [shape: f32[8,1], index: 2, kind: input, shape index: {}]   ;;  %s402_s3 = inlined_call_operand.vmem [shape: f32[2,8,256], index: 3, kind: output, shape index: {}]  }
   0x1 LB: > { %s318_s13 = sadd.s32 4294967295, %s352_s12   ;;  %p322_p0 = scmp.ge.s32.totalorder %s352_s12, 1  ;;  %s352_s12 = sphi %s376_s12, %s13_s12  }
   0x2   : > { %p137_p1 = scmp.lt.s32.totalorder %s352_s12, 3 }
   0x4   : > { %p138_p2 = pnand %p322_p0, %p137_p1 }
   0x5   : > { %p161_p3 = scmp.lt.s32.totalorder (!%p138_p2), %s318_s13, 1 }
   0x6   : > { %141 = sbr.rel (%p138_p2) target bundleno = 217 (0xd9), region = 32 }
   0xb   : > { %v354_v0 = vmov 0.0   ;;  %v355_v1 = vmov 0   ;;  %v173_v2 = vld [vmem:[%s401_s2] sm:$0xff]  ;;  %s404_s13 = smov (!%p161_p3, %s318_s13), 1  ;;  %vm185_vm0 = vcmask 1043456   ;;  %vm181_vm1 = vcmask 31744  }
   0xc   : > { %254 = vmatprep.mubr.f32.mxu0 %v354_v0  ;;  %344 = vset.pattern.permute.xlu0 %v355_v1  ;;  %s332_s16 = sshll.u32 %s404_s13, 3  ;;  %v171_v5 = vld [vmem:[%s400_s1] sm:$0xff]  ;;  %s333_s22 = sshll.u32 %s404_s13, 4 }
   0xd   : > { %176 = vperm.xlu0 %344, %v173_v2   ;;  %s165_s19 = scalar_lea.vmem %s399_s0, %s332_s16  ;;  %s170_s25 = scalar_lea.vmem %s402_s3, %s333_s22 }
   0xe   : > { %v172_v3 = vld [vmem:[%s165_s19] sm:$0xff] }
   0xf   : > { %v180_v4 = vcombine.high %v172_v3, %v172_v3 }
  0x11   : > { %327 = vmatprep.subr.msk.mxu0 %vm185_vm0, %v180_v4 }
  0x12   : > { %328 = vmatpush1.msk.msra.mxu0 %vm185_vm0, %v172_v3 }
  0x13   : > { %329 = vmatmul.mubr.msk.f32.vlgmr.msra.gmra.mxu0 %vm181_vm1, %v171_v5 }
  0x88   : > { %v177_v6 = vpop.permute.xlu0 %176 }
  0xd3   : > { %v256_v7 = vpop.f32.mrf.mxu0 }
  0xd4   : > { %v257_v8 = vadd.f32 %v256_v7, %v177_v6 }
  0xd5   : > { %v258_v9 = vpop.f32.mrf.mxu0 }
  0xd6   : > { %261 = vst [vmem:[%s170_s25] sm:$0xff] %v257_v8  ;;  %v259_v10 = vadd.f32 %v258_v9, %v177_v6 }
  0xd8   : > { %262 = vst [vmem:[%s170_s25 + $0x8] sm:$0xff] %v259_v10 }
  0xd9 PF: > { %s13_s12 = sadd.s32 1, %s352_s12  }
  0xda   : > { %p10_p4 = scmp.ge.s32.totalorder %s13_s12, 4  }
  0xdc   :  { %12 = sbr.rel (!%p10_p4) target bundleno = 1 (0x1), region = 62 }

// kernel: attention_forward.2
= control target key start
LH: loop header
LB: loop body
LE: loop exit
PB: predicated region body
PF: predicated region fallthrough
CT: control target
= control target key end

     0   :  { %15 = vsyncpa [#allocation4], 0  ;;  %s5825_s0 = inlined_call_operand.vmem [shape: f32[2,8,256], index: 0, kind: input, shape index: {}]   ;;  %s5826_s1 = inlined_call_operand.hbm [shape: f32[4,8], index: 1, kind: input, shape index: {}]   ;;  %s5827_s2 = inlined_call_operand.vmem [shape: f32[4,1], index: 2, kind: input, shape index: {}]   ;;  %s5828_s3 = inlined_call_operand.hbm [shape: f32[256,3840], index: 3, kind: input, shape index: {}]   ;;  %s5829_s4 = inlined_call_operand.vmem [shape: f32[10,4,384], index: 4, kind: input, shape index: {}]   ;;  %s5830_s5 = inlined_call_operand.vmem [shape: f32[4,384], index: 5, kind: input, shape index: {}]   ;;  %s5831_s6 = inlined_call_operand.vmem [shape: f32[4,1], index: 6, kind: input, shape index: {}]   ;;  %s5832_s7 = inlined_call_operand.vmem [shape: f32[4,1], index: 7, kind: input, shape index: {}]   ;;  %s5833_s8 = inlined_call_operand.vmem [shape: f32[4,4], index: 8, kind: input, shape index: {}]   ;;  %s5834_s9 = inlined_call_operand.vmem [shape: f32[4,4], index: 9, kind: input, shape index: {}]   ;;  %s5835_s10 = inlined_call_operand.vmem [shape: f32[2,4,256], index: 10, kind: output, shape index: {}]  }
   0x1   :  { %16 = vsyncpa [#allocation6], 0  ;;  %s4871_s13 = smov 0  }
   0x2 LB: > { %s4877_s14 = sadd.s32 4294967295, %s4799_s13   ;;  %p4257_p0 = scmp.ge.s32.totalorder %s4799_s13, 1  ;;  %s4799_s13 = sphi %s4871_s13, %s22_s13  }
   0x3   : > { %p268_p1 = scmp.lt.s32.totalorder %s4799_s13, 3  ;;  %p5836_p2 = scmp.eq.s32.totalorder %s4877_s14, 0 }
   0x4   : > { %s4805_s15 = smov [#allocation3]   ;;  %s4806_s18 = smov [#allocation5]  }
   0x5   : > { %s281_s16 = sshll.u32 %s4805_s15, 4  ;;  %p4882_p3 = pnand %p4257_p0, %p268_p1  ;;  %s282_s16 = int_to_ptr.vmem [resolvable:$true] %s281_s16 }
   0x6   : > { %s294_s19 = sshll.u32 %s4806_s18, 4  ;;  %s4740_s21 = scalar_lea.vmem %s282_s16, 64  ;;  %s295_s19 = int_to_ptr.vmem [resolvable:$true] %s294_s19 }
   0x7   : > { %s5841_s17 = scalar_select %p4882_p3, 1, 0 }
   0x8   : > { %p4585_p4 = pneg %p4882_p3  ;;  %p4741_p7 = scmp.ne.s32.totalorder %s282_s16, %s4740_s21 }
   0x9   : > { %p4748_p10 = scmp.lt.s32.totalorder %s282_s16, %s282_s16  ;;  %p4749_p11 = scmp.lt.s32.totalorder %s4740_s21, %s4740_s21 }
   0xa   : > { %p4890_p5 = pnand %p5836_p2, %p4585_p4 }
   0xb   : > { %p4750_p12 = por %p4749_p11, %p4748_p10 }
   0xc   : > { %p4731_p6 = pneg %p4890_p5 }
   0xe   : > { %p4743_p8 = pnand %p4741_p7, %p4731_p6 }
  0x10   : > { %p4744_p9 = pneg %p4743_p8 }
  0x12   : > { %p4751_p13 = pnand %p4750_p12, %p4744_p9 }
  0x14   : > { %4754 = shalt.err (!%p4751_p13)
}
  0x15   : > { %4588 = dma.hbm_to_vmem [thread:$0]  (!%p4890_p5), %s5826_s1, 64, %s282_s16, [#allocation4]  }
  0x16   : > { %s4766_s24 = scalar_lea.vmem %s295_s19, 122880  ;;  %p4774_p7 = scmp.lt.s32.totalorder %s295_s19, %s295_s19 }
  0x17   : > { %p4767_p0 = scmp.ne.s32.totalorder %s295_s19, %s4766_s24  ;;  %p4775_p8 = scmp.lt.s32.totalorder %s4766_s24, %s4766_s24 }
  0x19   : > { %p4769_p1 = pnand %p4767_p0, %p4731_p6  ;;  %p4776_p2 = por %p4775_p8, %p4774_p7 }
  0x1b   : > { %p4770_p4 = pneg %p4769_p1 }
  0x1d   : > { %p4777_p3 = pnand %p4776_p2, %p4770_p4 }
  0x1f   : > { %4780 = shalt.err (!%p4777_p3)
}
  0x20   : > { %s4807_s25 = smov 3840   ;;  %s4808_s26 = smov 240  }
  0x21   : > { %4591 = dma.hbm_to_vmem [thread:$0]  (!%p4890_p5), %s5828_s3, 122880, %s295_s19, [#allocation6], %s4807_s25, %s4807_s25, %s4808_s26  }
  0x22   : > { %p5843_p9 = scmp.ne.s32.totalorder %s5841_s17, 0 }
  0x23   : > { %p5844_p10 = scmp.eq.s32.totalorder (!%p5843_p9), %s4877_s14, 0 }
  0x24   : > { %336 = sbr.rel (%p5843_p9) target bundleno = 2146 (0x862), region = 60 }
  0x29   : > { %4790 = dma.done.wait (%p5844_p10), [#allocation4], 64   ;;  %p5845_p6 = pmov %p5844_p10 }
  0x2b   : > { %4792 = vsyncadd (%p5845_p6), [#allocation4], 4294967232  ;;  %p5846_p2 = pmov %p5845_p6 }
  0x2d   : > { %4794 = dma.done.wait (%p5846_p2), [#allocation6], 122880   ;;  %p5847_p3 = pmov %p5846_p2 }
  0x2e   : > { %p378_p11 = scmp.lt.s32.totalorder %s4877_s14, 1  ;;  %v4809_v0 = vmov 0.0   ;;  %v4810_v1 = vmov 0   ;;  %v390_v4 = vld [vmem:[#allocation3] sm:$0xf]  ;;  %vm397_vm0 = vcmask 64512  }
  0x2f   : > { %4796 = vsyncadd (%p5847_p3), [#allocation6], 4294844416  ;;  %465 = vmatprep.mubr.f32.mxu0 %v4809_v0  ;;  %4623 = vset.pattern.permute.xlu0 %v4810_v1  ;;  %v391_v5 = vld [vmem:[%s5827_s2] sm:$0xf]  ;;  %v923_v6 = vld [vmem:[#allocation5 + $0xe18] sm:$0xff]  ;;  %vm2611_vm2 = vcmask 1043456  }
  0x30   : > { %s5965_s14 = smov (!%p378_p11, %s4877_s14), 1  ;;  %4624 = vset.pattern.permute.xlu1 %v4810_v1  ;;  %394 = vperm.xlu0 %4623, %v391_v5   ;;  %v925_v7 = vld [vmem:[#allocation5 + $0xe28] sm:$0xff]  ;;  %v922_v8 = vld [vmem:[#allocation5 + $0xe10] sm:$0xff]  ;;  %v924_v9 = vld [vmem:[#allocation5 + $0xe20] sm:$0xff]  ;;  %vm2718_vm3 = vcmask 31744   ;;  %vm4813_vm4 = vmmov 0  }
  0x31   : > { %s4351_s29 = sshll.u32 %s5965_s14, 4  ;;  %s4352_s30 = sshll.u32 %s5965_s14, 3  ;;  %v2684_v10 = vld [vmem:[%s5831_s6] sm:$0xf]  ;;  %1432 = vmatprep.subr.mxu1 %v923_v6  ;;  %v893_v11 = vld [vmem:[#allocation5 + $0xd28] sm:$0xff]  ;;  %v895_v12 = vld [vmem:[#allocation5 + $0xd38] sm:$0xff] }
  0x32   : > { %s382_s15 = scalar_lea.vmem %s5825_s0, %s4351_s29  ;;  %s4931_s18 = scalar_lea.vmem %s5835_s10, %s4352_s30  ;;  %1433 = vmatpush1.msra.mxu1 %v922_v8  ;;  %v892_v13 = vld [vmem:[#allocation5 + $0xd20] sm:$0xff]  ;;  %v894_v14 = vld [vmem:[#allocation5 + $0xd30] sm:$0xff]  ;;  %v863_v15 = vld [vmem:[#allocation5 + $0xc38] sm:$0xff] }
  0x33   : > { %v389_v2 = vld [vmem:[%s382_s15 + $0x8] sm:$0xff]  ;;  %v388_v3 = vld [vmem:[%s382_s15] sm:$0xff]  ;;  %1434 = vmatprep.subr.mxu1 %v893_v11  ;;  %v865_v16 = vld [vmem:[#allocation5 + $0xc48] sm:$0xff]  ;;  %s5180_s19 = smov 0  }
  0x34   : > { %431 = vmatprep.subr.mxu0 %v389_v2  ;;  %2687 = vperm.xlu0 %4623, %v2684_v10   ;;  %v862_v17 = vld [vmem:[#allocation5 + $0xc30] sm:$0xff]  ;;  %v864_v18 = vld [vmem:[#allocation5 + $0xc40] sm:$0xff]  ;;  %v833_v19 = vld [vmem:[#allocation5 + $0xb48] sm:$0xff] }
  0x35   : > { %432 = vmatpush1.msra.mxu0 %v388_v3  ;;  %1435 = vmatpush1.msra.mxu1 %v892_v13  ;;  %v835_v20 = vld [vmem:[#allocation5 + $0xb58] sm:$0xff]  ;;  %v832_v21 = vld [vmem:[#allocation5 + $0xb40] sm:$0xff]  ;;  %v834_v22 = vld [vmem:[#allocation5 + $0xb50] sm:$0xff] }
  0x36   : > { %4268 = vmatmul.mubr.msk.f32.vlgmr.msra.gmra.mxu0 %vm397_vm0, %v390_v4  ;;  %1503 = vmatprep.subr.mxu0 %v925_v7  ;;  %v803_v23 = vld [vmem:[#allocation5 + $0xa58] sm:$0xff]  ;;  %v805_v24 = vld [vmem:[#allocation5 + $0xa68] sm:$0xff]  ;;  %v802_v25 = vld [vmem:[#allocation5 + $0xa50] sm:$0xff] }
  0x37   : > { %1504 = vmatpush1.msra.mxu0 %v924_v9  ;;  %1436 = vmatprep.subr.mxu1 %v863_v15  ;;  %v804_v26 = vld [vmem:[#allocation5 + $0xa60] sm:$0xff]  ;;  %v773_v27 = vld [vmem:[#allocation5 + $0x968] sm:$0xff]  ;;  %v775_v28 = vld [vmem:[#allocation5 + $0x978] sm:$0xff] }
  0x38   : > { %1505 = vmatprep.subr.mxu0 %v895_v12  ;;  %1437 = vmatpush1.msra.mxu1 %v862_v17  ;;  %v772_v29 = vld [vmem:[#allocation5 + $0x960] sm:$0xff]  ;;  %v774_v30 = vld [vmem:[#allocation5 + $0x970] sm:$0xff]  ;;  %v743_v31 = vld [vmem:[#allocation5 + $0x878] sm:$0xff] }
  0x39   : > { %1506 = vmatpush1.msra.mxu0 %v894_v14  ;;  %1438 = vmatprep.subr.mxu1 %v833_v19  ;;  %v745_v32 = vld [vmem:[#allocation5 + $0x888] sm:$0xff]  ;;  %v742_v33 = vld [vmem:[#allocation5 + $0x870] sm:$0xff]  ;;  %v744_v34 = vld [vmem:[#allocation5 + $0x880] sm:$0xff] }
  0x3a   : > { %1507 = vmatprep.subr.mxu0 %v865_v16  ;;  %1439 = vmatpush1.msra.mxu1 %v832_v21  ;;  %v713_v35 = vld [vmem:[#allocation5 + $0x788] sm:$0xff]  ;;  %v715_v36 = vld [vmem:[#allocation5 + $0x798] sm:$0xff]  ;;  %v712_v37 = vld [vmem:[#allocation5 + $0x780] sm:$0xff] }
  0x3b   : > { %1508 = vmatpush1.msra.mxu0 %v864_v18  ;;  %1440 = vmatprep.subr.mxu1 %v803_v23  ;;  %v714_v38 = vld [vmem:[#allocation5 + $0x790] sm:$0xff]  ;;  %v683_v39 = vld [vmem:[#allocation5 + $0x698] sm:$0xff]  ;;  %v685_v40 = vld [vmem:[#allocation5 + $0x6a8] sm:$0xff] }
  0x3c   : > { %1509 = vmatprep.subr.mxu0 %v835_v20  ;;  %1441 = vmatpush1.msra.mxu1 %v802_v25  ;;  %v682_v41 = vld [vmem:[#allocation5 + $0x690] sm:$0xff]  ;;  %v684_v42 = vld [vmem:[#allocation5 + $0x6a0] sm:$0xff]  ;;  %v653_v43 = vld [vmem:[#allocation5 + $0x5a8] sm:$0xff] }
  0x3d   : > { %1510 = vmatpush1.msra.mxu0 %v834_v22  ;;  %1442 = vmatprep.subr.mxu1 %v773_v27  ;;  %v655_v44 = vld [vmem:[#allocation5 + $0x5b8] sm:$0xff]  ;;  %v652_v45 = vld [vmem:[#allocation5 + $0x5a0] sm:$0xff]  ;;  %v654_v46 = vld [vmem:[#allocation5 + $0x5b0] sm:$0xff] }
  0x3e   : > { %1511 = vmatprep.subr.mxu0 %v805_v24  ;;  %1443 = vmatpush1.msra.mxu1 %v772_v29  ;;  %v623_v47 = vld [vmem:[#allocation5 + $0x4b8] sm:$0xff]  ;;  %v625_v48 = vld [vmem:[#allocation5 + $0x4c8] sm:$0xff]  ;;  %v622_v49 = vld [vmem:[#allocation5 + $0x4b0] sm:$0xff] }
  0x3f   : > { %1512 = vmatpush1.msra.mxu0 %v804_v26  ;;  %1444 = vmatprep.subr.mxu1 %v743_v31  ;;  %v624_v50 = vld [vmem:[#allocation5 + $0x4c0] sm:$0xff]  ;;  %v593_v51 = vld [vmem:[#allocation5 + $0x3c8] sm:$0xff]  ;;  %v595_v52 = vld [vmem:[#allocation5 + $0x3d8] sm:$0xff] }
  0x40   : > { %1513 = vmatprep.subr.mxu0 %v775_v28  ;;  %1445 = vmatpush1.msra.mxu1 %v742_v33  ;;  %v592_v53 = vld [vmem:[#allocation5 + $0x3c0] sm:$0xff]  ;;  %v594_v54 = vld [vmem:[#allocation5 + $0x3d0] sm:$0xff]  ;;  %v563_v55 = vld [vmem:[#allocation5 + $0x2d8] sm:$0xff] }
  0x41   : > { %1514 = vmatpush1.msra.mxu0 %v774_v30  ;;  %1446 = vmatprep.subr.mxu1 %v713_v35  ;;  %v565_v56 = vld [vmem:[#allocation5 + $0x2e8] sm:$0xff]  ;;  %v562_v57 = vld [vmem:[#allocation5 + $0x2d0] sm:$0xff]  ;;  %v564_v58 = vld [vmem:[#allocation5 + $0x2e0] sm:$0xff] }
  0x42   : > { %1515 = vmatprep.subr.mxu0 %v745_v32  ;;  %1447 = vmatpush1.msra.mxu1 %v712_v37  ;;  %v533_v59 = vld [vmem:[#allocation5 + $0x1e8] sm:$0xff]  ;;  %v535_v60 = vld [vmem:[#allocation5 + $0x1f8] sm:$0xff]  ;;  %v532_v61 = vld [vmem:[#allocation5 + $0x1e0] sm:$0xff] }
  0x43   : > { %1516 = vmatpush1.msra.mxu0 %v744_v34  ;;  %1448 = vmatprep.subr.mxu1 %v683_v39  ;;  %v534_v62 = vld [vmem:[#allocation5 + $0x1f0] sm:$0xff]  ;;  %v503_v63 = vld [vmem:[#allocation5 + $0xf8] sm:$0xff]  ;;  %v505_v1 = vld [vmem:[#allocation5 + $0x108] sm:$0xff] }
  0x44   : > { %1517 = vmatprep.subr.mxu0 %v715_v36  ;;  %1449 = vmatpush1.msra.mxu1 %v682_v41  ;;  %v502_v2 = vld [vmem:[#allocation5 + $0xf0] sm:$0xff]  ;;  %v504_v3 = vld [vmem:[#allocation5 + $0x100] sm:$0xff]  ;;  %v473_v4 = vld [vmem:[#allocation5 + $0x8] sm:$0xff] }
  0x45   : > { %1518 = vmatpush1.msra.mxu0 %v714_v38  ;;  %1450 = vmatprep.subr.mxu1 %v653_v43  ;;  %v475_v5 = vld [vmem:[#allocation5 + $0x18] sm:$0xff]  ;;  %v472_v6 = vld [vmem:[#allocation5] sm:$0xff]  ;;  %v474_v7 = vld [vmem:[#allocation5 + $0x10] sm:$0xff] }
  0x46   : > { %1519 = vmatprep.subr.mxu0 %v685_v40  ;;  %1451 = vmatpush1.msra.mxu1 %v652_v45  ;;  %v1403_v8 = vld [vmem:[#allocation5 + $0x1d18] sm:$0xff]  ;;  %v1405_v9 = vld [vmem:[#allocation5 + $0x1d28] sm:$0xff]  ;;  %v1402_v10 = vld [vmem:[#allocation5 + $0x1d10] sm:$0xff] }
  0x47   : > { %1520 = vmatpush1.msra.mxu0 %v684_v42  ;;  %1452 = vmatprep.subr.mxu1 %v623_v47  ;;  %v1404_v11 = vld [vmem:[#allocation5 + $0x1d20] sm:$0xff]  ;;  %v1373_v12 = vld [vmem:[#allocation5 + $0x1c28] sm:$0xff]  ;;  %v1375_v13 = vld [vmem:[#allocation5 + $0x1c38] sm:$0xff] }
  0x48   : > { %1521 = vmatprep.subr.mxu0 %v655_v44  ;;  %1453 = vmatpush1.msra.mxu1 %v622_v49  ;;  %v1372_v14 = vld [vmem:[#allocation5 + $0x1c20] sm:$0xff]  ;;  %v1374_v15 = vld [vmem:[#allocation5 + $0x1c30] sm:$0xff]  ;;  %v1343_v16 = vld [vmem:[#allocation5 + $0x1b38] sm:$0xff] }
  0x49   : > { %1522 = vmatpush1.msra.mxu0 %v654_v46  ;;  %1454 = vmatprep.subr.mxu1 %v593_v51  ;;  %v1345_v17 = vld [vmem:[#allocation5 + $0x1b48] sm:$0xff]  ;;  %v1342_v18 = vld [vmem:[#allocation5 + $0x1b30] sm:$0xff]  ;;  %v1344_v19 = vld [vmem:[#allocation5 + $0x1b40] sm:$0xff] }
  0x4a   : > { %1523 = vmatprep.subr.mxu0 %v625_v48  ;;  %1455 = vmatpush1.msra.mxu1 %v592_v53  ;;  %v1313_v20 = vld [vmem:[#allocation5 + $0x1a48] sm:$0xff]  ;;  %v1315_v21 = vld [vmem:[#allocation5 + $0x1a58] sm:$0xff]  ;;  %v1312_v22 = vld [vmem:[#allocation5 + $0x1a40] sm:$0xff] }
  0x4b   : > { %1524 = vmatpush1.msra.mxu0 %v624_v50  ;;  %1456 = vmatprep.subr.mxu1 %v563_v55  ;;  %v1314_v23 = vld [vmem:[#allocation5 + $0x1a50] sm:$0xff]  ;;  %v1283_v24 = vld [vmem:[#allocation5 + $0x1958] sm:$0xff]  ;;  %v1285_v25 = vld [vmem:[#allocation5 + $0x1968] sm:$0xff] }
  0x4c   : > { %1525 = vmatprep.subr.mxu0 %v595_v52  ;;  %1457 = vmatpush1.msra.mxu1 %v562_v57  ;;  %v1282_v26 = vld [vmem:[#allocation5 + $0x1950] sm:$0xff]  ;;  %v1284_v27 = vld [vmem:[#allocation5 + $0x1960] sm:$0xff]  ;;  %v1253_v28 = vld [vmem:[#allocation5 + $0x1868] sm:$0xff] }
  0x4d   : > { %1526 = vmatpush1.msra.mxu0 %v594_v54  ;;  %1458 = vmatprep.subr.mxu1 %v533_v59  ;;  %v1255_v29 = vld [vmem:[#allocation5 + $0x1878] sm:$0xff]  ;;  %v1252_v30 = vld [vmem:[#allocation5 + $0x1860] sm:$0xff]  ;;  %v1254_v31 = vld [vmem:[#allocation5 + $0x1870] sm:$0xff] }
  0x4e   : > { %1527 = vmatprep.subr.mxu0 %v565_v56  ;;  %1459 = vmatpush1.msra.mxu1 %v532_v61  ;;  %v1223_v32 = vld [vmem:[#allocation5 + $0x1778] sm:$0xff]  ;;  %v1225_v33 = vld [vmem:[#allocation5 + $0x1788] sm:$0xff]  ;;  %v1222_v34 = vld [vmem:[#allocation5 + $0x1770] sm:$0xff] }
  0x4f   : > { %1528 = vmatpush1.msra.mxu0 %v564_v58  ;;  %1460 = vmatprep.subr.mxu1 %v503_v63  ;;  %v1224_v35 = vld [vmem:[#allocation5 + $0x1780] sm:$0xff]  ;;  %v1193_v36 = vld [vmem:[#allocation5 + $0x1688] sm:$0xff]  ;;  %v1195_v37 = vld [vmem:[#allocation5 + $0x1698] sm:$0xff] }
  0x50   : > { %1529 = vmatprep.subr.mxu0 %v535_v60  ;;  %1461 = vmatpush1.msra.mxu1 %v502_v2  ;;  %v1192_v38 = vld [vmem:[#allocation5 + $0x1680] sm:$0xff]  ;;  %v1194_v39 = vld [vmem:[#allocation5 + $0x1690] sm:$0xff]  ;;  %v1163_v40 = vld [vmem:[#allocation5 + $0x1598] sm:$0xff] }
  0x51   : > { %1530 = vmatpush1.msra.mxu0 %v534_v62  ;;  %1462 = vmatprep.subr.mxu1 %v473_v4  ;;  %v1165_v41 = vld [vmem:[#allocation5 + $0x15a8] sm:$0xff]  ;;  %v1162_v42 = vld [vmem:[#allocation5 + $0x1590] sm:$0xff]  ;;  %v1164_v43 = vld [vmem:[#allocation5 + $0x15a0] sm:$0xff]  ;;  %v2692_v62 = vlaneseq }
  0x52   : > { %1531 = vmatprep.subr.mxu0 %v505_v1  ;;  %1463 = vmatpush1.msra.mxu1 %v472_v6  ;;  %v1133_v44 = vld [vmem:[#allocation5 + $0x14a8] sm:$0xff]  ;;  %v1135_v45 = vld [vmem:[#allocation5 + $0x14b8] sm:$0xff]  ;;  %v1132_v46 = vld [vmem:[#allocation5 + $0x14a0] sm:$0xff] }
  0x53   : > { %1532 = vmatpush1.msra.mxu0 %v504_v3  ;;  %1464 = vmatprep.subr.mxu1 %v1403_v8  ;;  %v1134_v47 = vld [vmem:[#allocation5 + $0x14b0] sm:$0xff]  ;;  %v1103_v48 = vld [vmem:[#allocation5 + $0x13b8] sm:$0xff]  ;;  %v1105_v49 = vld [vmem:[#allocation5 + $0x13c8] sm:$0xff]  ;;  %v4939_v2 = vshrl.u32 %v2692_v62, 7 }
  0x54   : > { %1533 = vmatprep.subr.mxu0 %v475_v5  ;;  %1465 = vmatpush2.msra.mxu1 %v1402_v10  ;;  %v1102_v50 = vld [vmem:[#allocation5 + $0x13b0] sm:$0xff]  ;;  %v1104_v51 = vld [vmem:[#allocation5 + $0x13c0] sm:$0xff]  ;;  %v1073_v52 = vld [vmem:[#allocation5 + $0x12c8] sm:$0xff] }
  0x55   : > { %1534 = vmatpush1.msra.mxu0 %v474_v7  ;;  %1466 = vmatprep.subr.mxu1 %v1373_v12  ;;  %v1075_v53 = vld [vmem:[#allocation5 + $0x12d8] sm:$0xff]  ;;  %v1072_v54 = vld [vmem:[#allocation5 + $0x12c0] sm:$0xff]  ;;  %v1074_v55 = vld [vmem:[#allocation5 + $0x12d0] sm:$0xff]  ;;  %v3153_v6 = vadd.s32 336, %v4939_v2  ;;  %v4811_v12 = vmov -1e+30  }
  0x56   : > { %1535 = vmatprep.subr.mxu0 %v1405_v9  ;;  %1467 = vmatpush2.msra.mxu1 %v1372_v14  ;;  %v1043_v56 = vld [vmem:[#allocation5 + $0x11d8] sm:$0xff]  ;;  %v1045_v57 = vld [vmem:[#allocation5 + $0x11e8] sm:$0xff]  ;;  %v1042_v58 = vld [vmem:[#allocation5 + $0x11d0] sm:$0xff] }
  0x57   : > { %1536 = vmatpush2.msra.mxu0 %v1404_v11  ;;  %1468 = vmatprep.subr.mxu1 %v1343_v16  ;;  %v1044_v59 = vld [vmem:[#allocation5 + $0x11e0] sm:$0xff]  ;;  %v1013_v60 = vld [vmem:[#allocation5 + $0x10e8] sm:$0xff]  ;;  %v1015_v61 = vld [vmem:[#allocation5 + $0x10f8] sm:$0xff]  ;;  %vm3201_vm1 = vcmp.lt.s32.totalorder %v3153_v6, 341 }
  0x58   : > { %1537 = vmatprep.subr.mxu0 %v1375_v13  ;;  %1469 = vmatpush2.msra.mxu1 %v1342_v18  ;;  %v1012_v63 = vld [vmem:[#allocation5 + $0x10e0] sm:$0xff]  ;;  %v1014_v1 = vld [vmem:[#allocation5 + $0x10f0] sm:$0xff]  ;;  %v983_v3 = vld [vmem:[#allocation5 + $0xff8] sm:$0xff]  ;;  %v4942_v13 = vsel %vm3201_vm1, 0.0, %v4811_v12 }
  0x59   : > { %1538 = vmatpush2.msra.mxu0 %v1374_v15  ;;  %1470 = vmatprep.subr.mxu1 %v1313_v20  ;;  %v985_v4 = vld [vmem:[#allocation5 + $0x1008] sm:$0xff]  ;;  %v982_v5 = vld [vmem:[#allocation5 + $0xff0] sm:$0xff]  ;;  %v984_v7 = vld [vmem:[#allocation5 + $0x1000] sm:$0xff]  ;;  %5848 = vst [vmem:[#allocation9_spill] sm:$0xff] %v4942_v13 }
  0x5a   : > { %1539 = vmatprep.subr.mxu0 %v1345_v17  ;;  %1471 = vmatpush2.msra.mxu1 %v1312_v22  ;;  %v953_v8 = vld [vmem:[#allocation5 + $0xf08] sm:$0xff]  ;;  %v955_v9 = vld [vmem:[#allocation5 + $0xf18] sm:$0xff]  ;;  %v952_v10 = vld [vmem:[#allocation5 + $0xf00] sm:$0xff] }
  0x5b   : > { %1540 = vmatpush2.msra.mxu0 %v1344_v19  ;;  %1472 = vmatprep.subr.mxu1 %v1283_v24  ;;  %v954_v11 = vld [vmem:[#allocation5 + $0xf10] sm:$0xff]  ;;  %v927_v14 = vld [vmem:[#allocation5 + $0xe38] sm:$0xff]  ;;  %v929_v15 = vld [vmem:[#allocation5 + $0xe48] sm:$0xff] }
  0x5c   : > { %1541 = vmatprep.subr.mxu0 %v1315_v21  ;;  %1473 = vmatpush2.msra.mxu1 %v1282_v26  ;;  %v926_v21 = vld [vmem:[#allocation5 + $0xe30] sm:$0xff]  ;;  %v928_v22 = vld [vmem:[#allocation5 + $0xe40] sm:$0xff]  ;;  %v897_v24 = vld [vmem:[#allocation5 + $0xd48] sm:$0xff] }
  0x5d   : > { %1542 = vmatpush2.msra.mxu0 %v1314_v23  ;;  %1474 = vmatprep.subr.mxu1 %v1253_v28  ;;  %v896_v26 = vld [vmem:[#allocation5 + $0xd40] sm:$0xff]  ;;  %v867_v28 = vld [vmem:[#allocation5 + $0xc58] sm:$0xff]  ;;  %v626_v62 = vld [vmem:[#allocation5 + $0x4d0] sm:$0xff] }
  0x5e   : > { %1543 = vmatprep.subr.mxu0 %v1285_v25  ;;  %1475 = vmatpush2.msra.mxu1 %v1252_v30  ;;  %v899_v25 = vld [vmem:[#allocation5 + $0xd58] sm:$0xff]  ;;  %v866_v30 = vld [vmem:[#allocation5 + $0xc50] sm:$0xff]  ;;  %v536_v12 = vld [vmem:[#allocation5 + $0x200] sm:$0xff] }
  0x5f   : > { %1544 = vmatpush2.msra.mxu0 %v1284_v27  ;;  %1476 = vmatprep.subr.mxu1 %v1223_v32  ;;  %v898_v27 = vld [vmem:[#allocation5 + $0xd50] sm:$0xff]  ;;  %v837_v32 = vld [vmem:[#allocation5 + $0xb68] sm:$0xff]  ;;  %v567_v6 = vld [vmem:[#allocation5 + $0x2f8] sm:$0xff] }
  0x60   : > { %1545 = vmatprep.subr.mxu0 %v1255_v29  ;;  %1477 = vmatpush2.msra.mxu1 %v1222_v34  ;;  %v869_v29 = vld [vmem:[#allocation5 + $0xc68] sm:$0xff]  ;;  %v836_v34 = vld [vmem:[#allocation5 + $0xb60] sm:$0xff] }
  0x61   : > { %1546 = vmatpush2.msra.mxu0 %v1254_v31  ;;  %1478 = vmatprep.subr.mxu1 %v1193_v36  ;;  %v868_v31 = vld [vmem:[#allocation5 + $0xc60] sm:$0xff]  ;;  %v807_v36 = vld [vmem:[#allocation5 + $0xa78] sm:$0xff] }
  0x62   : > { %1547 = vmatprep.subr.mxu0 %v1225_v33  ;;  %1479 = vmatpush2.msra.mxu1 %v1192_v38  ;;  %v839_v33 = vld [vmem:[#allocation5 + $0xb78] sm:$0xff]  ;;  %v806_v38 = vld [vmem:[#allocation5 + $0xa70] sm:$0xff] }
  0x63   : > { %1548 = vmatpush2.msra.mxu0 %v1224_v35  ;;  %1480 = vmatprep.subr.mxu1 %v1163_v40  ;;  %v838_v35 = vld [vmem:[#allocation5 + $0xb70] sm:$0xff]  ;;  %v777_v40 = vld [vmem:[#allocation5 + $0x988] sm:$0xff] }
  0x64   : > { %1549 = vmatprep.subr.mxu0 %v1195_v37  ;;  %1481 = vmatpush2.msra.mxu1 %v1162_v42  ;;  %v809_v37 = vld [vmem:[#allocation5 + $0xa88] sm:$0xff]  ;;  %v776_v42 = vld [vmem:[#allocation5 + $0x980] sm:$0xff] }
  0x65   : > { %1550 = vmatpush2.msra.mxu0 %v1194_v39  ;;  %1482 = vmatprep.subr.mxu1 %v1133_v44  ;;  %v808_v39 = vld [vmem:[#allocation5 + $0xa80] sm:$0xff]  ;;  %v747_v44 = vld [vmem:[#allocation5 + $0x898] sm:$0xff] }
  0x66   : > { %1551 = vmatprep.subr.mxu0 %v1165_v41  ;;  %1483 = vmatpush2.msra.mxu1 %v1132_v46  ;;  %v779_v41 = vld [vmem:[#allocation5 + $0x998] sm:$0xff]  ;;  %v746_v46 = vld [vmem:[#allocation5 + $0x890] sm:$0xff] }
  0x67   : > { %1552 = vmatpush2.msra.mxu0 %v1164_v43  ;;  %1484 = vmatprep.subr.mxu1 %v1103_v48  ;;  %v778_v43 = vld [vmem:[#allocation5 + $0x990] sm:$0xff]  ;;  %v717_v48 = vld [vmem:[#allocation5 + $0x7a8] sm:$0xff] }
  0x68   : > { %1553 = vmatprep.subr.mxu0 %v1135_v45  ;;  %1485 = vmatpush2.msra.mxu1 %v1102_v50  ;;  %v749_v45 = vld [vmem:[#allocation5 + $0x8a8] sm:$0xff]  ;;  %v716_v50 = vld [vmem:[#allocation5 + $0x7a0] sm:$0xff] }
  0x69   : > { %1554 = vmatpush2.msra.mxu0 %v1134_v47  ;;  %1486 = vmatprep.subr.mxu1 %v1073_v52  ;;  %v748_v47 = vld [vmem:[#allocation5 + $0x8a0] sm:$0xff]  ;;  %v687_v52 = vld [vmem:[#allocation5 + $0x6b8] sm:$0xff] }
  0x6a   : > { %1555 = vmatprep.subr.mxu0 %v1105_v49  ;;  %1487 = vmatpush2.msra.mxu1 %v1072_v54  ;;  %v719_v49 = vld [vmem:[#allocation5 + $0x7b8] sm:$0xff]  ;;  %v686_v54 = vld [vmem:[#allocation5 + $0x6b0] sm:$0xff] }
  0x6b   : > { %1556 = vmatpush2.msra.mxu0 %v1104_v51  ;;  %1488 = vmatprep.subr.mxu1 %v1043_v56  ;;  %v718_v51 = vld [vmem:[#allocation5 + $0x7b0] sm:$0xff]  ;;  %v657_v56 = vld [vmem:[#allocation5 + $0x5c8] sm:$0xff] }
  0x6c   : > { %1557 = vmatprep.subr.mxu0 %v1075_v53  ;;  %1489 = vmatpush2.msra.mxu1 %v1042_v58  ;;  %v689_v53 = vld [vmem:[#allocation5 + $0x6c8] sm:$0xff]  ;;  %v656_v58 = vld [vmem:[#allocation5 + $0x5c0] sm:$0xff] }
  0x6d   : > { %1558 = vmatpush2.msra.mxu0 %v1074_v55  ;;  %1490 = vmatprep.subr.mxu1 %v1013_v60  ;;  %v688_v55 = vld [vmem:[#allocation5 + $0x6c0] sm:$0xff]  ;;  %v627_v60 = vld [vmem:[#allocation5 + $0x4d8] sm:$0xff] }
  0x6e   : > { %1559 = vmatprep.subr.mxu0 %v1045_v57  ;;  %1491 = vmatpush2.msra.mxu1 %v1012_v63  ;;  %v659_v57 = vld [vmem:[#allocation5 + $0x5d8] sm:$0xff]  ;;  %v628_v63 = vld [vmem:[#allocation5 + $0x4e0] sm:$0xff] }
  0x6f   : > { %1560 = vmatpush2.msra.mxu0 %v1044_v59  ;;  %1492 = vmatprep.subr.mxu1 %v983_v3  ;;  %v658_v59 = vld [vmem:[#allocation5 + $0x5d0] sm:$0xff]  ;;  %v599_v3 = vld [vmem:[#allocation5 + $0x3f8] sm:$0xff] }
  0x70   : > { %1561 = vmatprep.subr.mxu0 %v1015_v61  ;;  %1493 = vmatpush2.msra.mxu1 %v982_v5  ;;  %v629_v61 = vld [vmem:[#allocation5 + $0x4e8] sm:$0xff]  ;;  %v598_v5 = vld [vmem:[#allocation5 + $0x3f0] sm:$0xff] }
  0x71   : > { %1562 = vmatpush2.msra.mxu0 %v1014_v1  ;;  %1494 = vmatprep.subr.mxu1 %v953_v8  ;;  %v597_v1 = vld [vmem:[#allocation5 + $0x3e8] sm:$0xff]  ;;  %v566_v8 = vld [vmem:[#allocation5 + $0x2f0] sm:$0xff] }
  0x72   : > { %1563 = vmatprep.subr.mxu0 %v985_v4  ;;  %1495 = vmatpush2.msra.mxu1 %v952_v10  ;;  %v596_v4 = vld [vmem:[#allocation5 + $0x3e0] sm:$0xff]  ;;  %v537_v10 = vld [vmem:[#allocation5 + $0x208] sm:$0xff] }
  0x73   : > { %1564 = vmatpush2.msra.mxu0 %v984_v7  ;;  %1574 = vmatprep.subr.mxu1 %v927_v14  ;;  %v569_v7 = vld [vmem:[#allocation5 + $0x308] sm:$0xff]  ;;  %v538_v14 = vld [vmem:[#allocation5 + $0x210] sm:$0xff] }
  0x74   : > { %1565 = vmatprep.subr.mxu0 %v955_v9  ;;  %v568_v9 = vld [vmem:[#allocation5 + $0x300] sm:$0xff] }
  0x75   : > { %1566 = vmatpush2.msra.mxu0 %v954_v11  ;;  %v539_v11 = vld [vmem:[#allocation5 + $0x218] sm:$0xff] }
  0x76   : > { %1645 = vmatprep.subr.mxu0 %v929_v15  ;;  %v507_v15 = vld [vmem:[#allocation5 + $0x118] sm:$0xff] }
  0xab   : > { %v395_v17 = vpop.permute.xlu0 %394 }
  0xf6   : > { %v467_v16 = vpop.f32.mrf.mxu0 }
  0xf7   : > { %v4944_v19 = vadd.f32 %v467_v16, %v395_v17  ;;  %v509_v16 = vld [vmem:[#allocation5 + $0x128] sm:$0xff] }
  0xf8   : > { %v469_v18 = vpop.f32.mrf.mxu0 }
  0xf9   : > { %v4946_v20 = vadd.f32 %v469_v18, %v395_v17  ;;  %v506_v17 = vld [vmem:[#allocation5 + $0x110] sm:$0xff]  ;;  %v508_v18 = vld [vmem:[#allocation5 + $0x120] sm:$0xff] }
  0xfb   : > { %v3257_v23 = vcombine.low %v4944_v19, %v4946_v20  ;;  %1496 = vmatprep.mubr.f32.mxu1 %v4946_v20  ;;  %1567 = vmatprep.mubr.f32.mxu0 %v4946_v20 }
  0xfc   : > { %1497 = vmatmul.mubr.f32.vlgmr.msra.gmra.mxu1 %v4944_v19  ;;  %1568 = vmatmul.mubr.f32.vlgmr.msra.gmra.mxu0 %v4944_v19 }
  0xfd   : > { %3259 = vst [vmem:[#allocation2] sm:$0xff] %v3257_v23  ;;  %1575 = vmatpush1.msra.mxu1 %v926_v21  ;;  %1646 = vmatpush1.msra.mxu0 %v928_v22  ;;  %v477_v21 = vld [vmem:[#allocation5 + $0x28] sm:$0xff]  ;;  %v479_v22 = vld [vmem:[#allocation5 + $0x38] sm:$0xff]  ;;  %v476_v23 = vld [vmem:[#allocation5 + $0x20] sm:$0xff] }
  0xfe   : > { %1576 = vmatprep.subr.mxu1 %v897_v24  ;;  %1638 = vmatprep.mubr.f32.mxu1 %v4946_v20  ;;  %v478_v24 = vld [vmem:[#allocation5 + $0x30] sm:$0xff] }
  0xff   : > { %1647 = vmatprep.subr.mxu0 %v899_v25  ;;  %1709 = vmatprep.mubr.f32.mxu0 %v4946_v20  ;;  %v1407_v25 = vld [vmem:[#allocation5 + $0x1d38] sm:$0xff] }
 0x100   : > { %1577 = vmatpush1.msra.mxu1 %v896_v26  ;;  %1648 = vmatpush1.msra.mxu0 %v898_v27  ;;  %v1409_v26 = vld [vmem:[#allocation5 + $0x1d48] sm:$0xff]  ;;  %v1406_v27 = vld [vmem:[#allocation5 + $0x1d30] sm:$0xff] }
 0x101   : > { %1578 = vmatprep.subr.mxu1 %v867_v28  ;;  %1649 = vmatprep.subr.mxu0 %v869_v29  ;;  %v1408_v28 = vld [vmem:[#allocation5 + $0x1d40] sm:$0xff]  ;;  %v1377_v29 = vld [vmem:[#allocation5 + $0x1c48] sm:$0xff] }
 0x102   : > { %1579 = vmatpush1.msra.mxu1 %v866_v30  ;;  %1650 = vmatpush1.msra.mxu0 %v868_v31  ;;  %v1379_v30 = vld [vmem:[#allocation5 + $0x1c58] sm:$0xff]  ;;  %v1376_v31 = vld [vmem:[#allocation5 + $0x1c40] sm:$0xff] }
 0x103   : > { %1580 = vmatprep.subr.mxu1 %v837_v32  ;;  %1651 = vmatprep.subr.mxu0 %v839_v33  ;;  %v1378_v32 = vld [vmem:[#allocation5 + $0x1c50] sm:$0xff]  ;;  %v1347_v33 = vld [vmem:[#allocation5 + $0x1b58] sm:$0xff] }
 0x104   : > { %1581 = vmatpush1.msra.mxu1 %v836_v34  ;;  %1652 = vmatpush1.msra.mxu0 %v838_v35  ;;  %v1349_v34 = vld [vmem:[#allocation5 + $0x1b68] sm:$0xff]  ;;  %v1346_v35 = vld [vmem:[#allocation5 + $0x1b50] sm:$0xff] }
 0x105   : > { %1582 = vmatprep.subr.mxu1 %v807_v36  ;;  %1653 = vmatprep.subr.mxu0 %v809_v37  ;;  %v1348_v36 = vld [vmem:[#allocation5 + $0x1b60] sm:$0xff]  ;;  %v1317_v37 = vld [vmem:[#allocation5 + $0x1a68] sm:$0xff] }
 0x106   : > { %1583 = vmatpush1.msra.mxu1 %v806_v38  ;;  %1654 = vmatpush1.msra.mxu0 %v808_v39  ;;  %v1319_v38 = vld [vmem:[#allocation5 + $0x1a78] sm:$0xff]  ;;  %v1316_v39 = vld [vmem:[#allocation5 + $0x1a60] sm:$0xff] }
 0x107   : > { %1584 = vmatprep.subr.mxu1 %v777_v40  ;;  %1655 = vmatprep.subr.mxu0 %v779_v41  ;;  %v1318_v40 = vld [vmem:[#allocation5 + $0x1a70] sm:$0xff]  ;;  %v1287_v41 = vld [vmem:[#allocation5 + $0x1978] sm:$0xff] }
 0x108   : > { %1585 = vmatpush1.msra.mxu1 %v776_v42  ;;  %1656 = vmatpush1.msra.mxu0 %v778_v43  ;;  %v1289_v42 = vld [vmem:[#allocation5 + $0x1988] sm:$0xff]  ;;  %v1286_v43 = vld [vmem:[#allocation5 + $0x1970] sm:$0xff] }
 0x109   : > { %1586 = vmatprep.subr.mxu1 %v747_v44  ;;  %1657 = vmatprep.subr.mxu0 %v749_v45  ;;  %v1288_v44 = vld [vmem:[#allocation5 + $0x1980] sm:$0xff]  ;;  %v1257_v45 = vld [vmem:[#allocation5 + $0x1888] sm:$0xff] }
 0x10a   : > { %1587 = vmatpush1.msra.mxu1 %v746_v46  ;;  %1658 = vmatpush1.msra.mxu0 %v748_v47  ;;  %v1259_v46 = vld [vmem:[#allocation5 + $0x1898] sm:$0xff]  ;;  %v1256_v47 = vld [vmem:[#allocation5 + $0x1880] sm:$0xff] }
 0x10b   : > { %1588 = vmatprep.subr.mxu1 %v717_v48  ;;  %1659 = vmatprep.subr.mxu0 %v719_v49  ;;  %v1258_v48 = vld [vmem:[#allocation5 + $0x1890] sm:$0xff]  ;;  %v1227_v49 = vld [vmem:[#allocation5 + $0x1798] sm:$0xff] }
 0x10c   : > { %1589 = vmatpush1.msra.mxu1 %v716_v50  ;;  %1660 = vmatpush1.msra.mxu0 %v718_v51  ;;  %v1229_v50 = vld [vmem:[#allocation5 + $0x17a8] sm:$0xff]  ;;  %v1226_v51 = vld [vmem:[#allocation5 + $0x1790] sm:$0xff] }
 0x10d   : > { %1590 = vmatprep.subr.mxu1 %v687_v52  ;;  %1661 = vmatprep.subr.mxu0 %v689_v53  ;;  %v1228_v52 = vld [vmem:[#allocation5 + $0x17a0] sm:$0xff]  ;;  %v1197_v53 = vld [vmem:[#allocation5 + $0x16a8] sm:$0xff] }
 0x10e   : > { %1591 = vmatpush1.msra.mxu1 %v686_v54  ;;  %1662 = vmatpush1.msra.mxu0 %v688_v55  ;;  %v1199_v54 = vld [vmem:[#allocation5 + $0x16b8] sm:$0xff]  ;;  %v1196_v55 = vld [vmem:[#allocation5 + $0x16a0] sm:$0xff] }
 0x10f   : > { %1592 = vmatprep.subr.mxu1 %v657_v56  ;;  %1663 = vmatprep.subr.mxu0 %v659_v57  ;;  %v1198_v56 = vld [vmem:[#allocation5 + $0x16b0] sm:$0xff]  ;;  %v1167_v57 = vld [vmem:[#allocation5 + $0x15b8] sm:$0xff] }
 0x110   : > { %1593 = vmatpush1.msra.mxu1 %v656_v58  ;;  %1664 = vmatpush1.msra.mxu0 %v658_v59  ;;  %v1169_v58 = vld [vmem:[#allocation5 + $0x15c8] sm:$0xff]  ;;  %v1166_v59 = vld [vmem:[#allocation5 + $0x15b0] sm:$0xff] }
 0x111   : > { %1594 = vmatprep.subr.mxu1 %v627_v60  ;;  %1665 = vmatprep.subr.mxu0 %v629_v61  ;;  %v1168_v60 = vld [vmem:[#allocation5 + $0x15c0] sm:$0xff]  ;;  %v1137_v61 = vld [vmem:[#allocation5 + $0x14c8] sm:$0xff] }
 0x112   : > { %1595 = vmatpush1.msra.mxu1 %v626_v62  ;;  %1666 = vmatpush1.msra.mxu0 %v628_v63  ;;  %v1139_v62 = vld [vmem:[#allocation5 + $0x14d8] sm:$0xff]  ;;  %v1136_v63 = vld [vmem:[#allocation5 + $0x14c0] sm:$0xff] }
 0x113   : > { %1596 = vmatprep.subr.mxu1 %v597_v1  ;;  %1667 = vmatprep.subr.mxu0 %v599_v3  ;;  %v1138_v1 = vld [vmem:[#allocation5 + $0x14d0] sm:$0xff]  ;;  %v1107_v3 = vld [vmem:[#allocation5 + $0x13d8] sm:$0xff] }
 0x114   : > { %1597 = vmatpush1.msra.mxu1 %v596_v4  ;;  %1668 = vmatpush1.msra.mxu0 %v598_v5  ;;  %v1109_v4 = vld [vmem:[#allocation5 + $0x13e8] sm:$0xff]  ;;  %v1106_v5 = vld [vmem:[#allocation5 + $0x13d0] sm:$0xff] }
 0x115   : > { %1598 = vmatprep.subr.mxu1 %v567_v6  ;;  %1669 = vmatprep.subr.mxu0 %v569_v7  ;;  %v1108_v6 = vld [vmem:[#allocation5 + $0x13e0] sm:$0xff]  ;;  %v1077_v7 = vld [vmem:[#allocation5 + $0x12e8] sm:$0xff] }
 0x116   : > { %1599 = vmatpush1.msra.mxu1 %v566_v8  ;;  %1670 = vmatpush1.msra.mxu0 %v568_v9  ;;  %v1079_v8 = vld [vmem:[#allocation5 + $0x12f8] sm:$0xff]  ;;  %v1076_v9 = vld [vmem:[#allocation5 + $0x12e0] sm:$0xff] }
 0x117   : > { %1600 = vmatprep.subr.mxu1 %v537_v10  ;;  %1671 = vmatprep.subr.mxu0 %v539_v11  ;;  %v1078_v10 = vld [vmem:[#allocation5 + $0x12f0] sm:$0xff]  ;;  %v1047_v11 = vld [vmem:[#allocation5 + $0x11f8] sm:$0xff] }
 0x118   : > { %1601 = vmatpush1.msra.mxu1 %v536_v12  ;;  %1672 = vmatpush1.msra.mxu0 %v538_v14  ;;  %v1049_v12 = vld [vmem:[#allocation5 + $0x1208] sm:$0xff]  ;;  %v1046_v14 = vld [vmem:[#allocation5 + $0x11f0] sm:$0xff] }
 0x119   : > { %1602 = vmatprep.subr.mxu1 %v507_v15  ;;  %1673 = vmatprep.subr.mxu0 %v509_v16  ;;  %v1048_v15 = vld [vmem:[#allocation5 + $0x1200] sm:$0xff]  ;;  %v1017_v16 = vld [vmem:[#allocation5 + $0x1108] sm:$0xff] }
 0x11a   : > { %1603 = vmatpush1.msra.mxu1 %v506_v17  ;;  %1674 = vmatpush1.msra.mxu0 %v508_v18  ;;  %v1019_v17 = vld [vmem:[#allocation5 + $0x1118] sm:$0xff]  ;;  %v1016_v18 = vld [vmem:[#allocation5 + $0x1100] sm:$0xff] }
 0x11b   : > { %1604 = vmatprep.subr.mxu1 %v477_v21  ;;  %1675 = vmatprep.subr.mxu0 %v479_v22  ;;  %v1018_v21 = vld [vmem:[#allocation5 + $0x1110] sm:$0xff]  ;;  %v987_v22 = vld [vmem:[#allocation5 + $0x1018] sm:$0xff] }
 0x11c   : > { %1605 = vmatpush1.msra.mxu1 %v476_v23  ;;  %1676 = vmatpush1.msra.mxu0 %v478_v24  ;;  %v989_v23 = vld [vmem:[#allocation5 + $0x1028] sm:$0xff]  ;;  %v986_v24 = vld [vmem:[#allocation5 + $0x1010] sm:$0xff] }
 0x11d   : > { %1606 = vmatprep.subr.mxu1 %v1407_v25  ;;  %1677 = vmatprep.subr.mxu0 %v1409_v26  ;;  %v988_v25 = vld [vmem:[#allocation5 + $0x1020] sm:$0xff]  ;;  %v957_v26 = vld [vmem:[#allocation5 + $0xf28] sm:$0xff] }
 0x11e   : > { %1607 = vmatpush2.msra.mxu1 %v1406_v27  ;;  %1678 = vmatpush2.msra.mxu0 %v1408_v28  ;;  %v959_v27 = vld [vmem:[#allocation5 + $0xf38] sm:$0xff]  ;;  %v956_v28 = vld [vmem:[#allocation5 + $0xf20] sm:$0xff] }
 0x11f   : > { %1608 = vmatprep.subr.mxu1 %v1377_v29  ;;  %1679 = vmatprep.subr.mxu0 %v1379_v30  ;;  %v958_v29 = vld [vmem:[#allocation5 + $0xf30] sm:$0xff]  ;;  %v931_v30 = vld [vmem:[#allocation5 + $0xe58] sm:$0xff] }
 0x120   : > { %1609 = vmatpush2.msra.mxu1 %v1376_v31  ;;  %1680 = vmatpush2.msra.mxu0 %v1378_v32  ;;  %v933_v31 = vld [vmem:[#allocation5 + $0xe68] sm:$0xff]  ;;  %v930_v32 = vld [vmem:[#allocation5 + $0xe50] sm:$0xff] }
 0x121   : > { %1610 = vmatprep.subr.mxu1 %v1347_v33  ;;  %1681 = vmatprep.subr.mxu0 %v1349_v34  ;;  %v932_v33 = vld [vmem:[#allocation5 + $0xe60] sm:$0xff]  ;;  %v901_v34 = vld [vmem:[#allocation5 + $0xd68] sm:$0xff] }
 0x122   : > { %1611 = vmatpush2.msra.mxu1 %v1346_v35  ;;  %1682 = vmatpush2.msra.mxu0 %v1348_v36  ;;  %v903_v35 = vld [vmem:[#allocation5 + $0xd78] sm:$0xff]  ;;  %v900_v36 = vld [vmem:[#allocation5 + $0xd60] sm:$0xff] }
 0x123   : > { %1612 = vmatprep.subr.mxu1 %v1317_v37  ;;  %1683 = vmatprep.subr.mxu0 %v1319_v38  ;;  %v902_v37 = vld [vmem:[#allocation5 + $0xd70] sm:$0xff]  ;;  %v871_v38 = vld [vmem:[#allocation5 + $0xc78] sm:$0xff] }
 0x124   : > { %1613 = vmatpush2.msra.mxu1 %v1316_v39  ;;  %1684 = vmatpush2.msra.mxu0 %v1318_v40  ;;  %v873_v39 = vld [vmem:[#allocation5 + $0xc88] sm:$0xff]  ;;  %v870_v40 = vld [vmem:[#allocation5 + $0xc70] sm:$0xff] }
 0x125   : > { %1614 = vmatprep.subr.mxu1 %v1287_v41  ;;  %1685 = vmatprep.subr.mxu0 %v1289_v42  ;;  %v872_v41 = vld [vmem:[#allocation5 + $0xc80] sm:$0xff]  ;;  %v841_v42 = vld [vmem:[#allocation5 + $0xb88] sm:$0xff] }
 0x126   : > { %1615 = vmatpush2.msra.mxu1 %v1286_v43  ;;  %1686 = vmatpush2.msra.mxu0 %v1288_v44  ;;  %v843_v43 = vld [vmem:[#allocation5 + $0xb98] sm:$0xff]  ;;  %v840_v44 = vld [vmem:[#allocation5 + $0xb80] sm:$0xff] }
 0x127   : > { %1616 = vmatprep.subr.mxu1 %v1257_v45  ;;  %1687 = vmatprep.subr.mxu0 %v1259_v46  ;;  %v842_v45 = vld [vmem:[#allocation5 + $0xb90] sm:$0xff]  ;;  %v811_v46 = vld [vmem:[#allocation5 + $0xa98] sm:$0xff] }
 0x128   : > { %1617 = vmatpush2.msra.mxu1 %v1256_v47  ;;  %1688 = vmatpush2.msra.mxu0 %v1258_v48  ;;  %v813_v47 = vld [vmem:[#allocation5 + $0xaa8] sm:$0xff]  ;;  %v810_v48 = vld [vmem:[#allocation5 + $0xa90] sm:$0xff] }
 0x129   : > { %1618 = vmatprep.subr.mxu1 %v1227_v49  ;;  %1689 = vmatprep.subr.mxu0 %v1229_v50  ;;  %v812_v49 = vld [vmem:[#allocation5 + $0xaa0] sm:$0xff]  ;;  %v781_v50 = vld [vmem:[#allocation5 + $0x9a8] sm:$0xff] }
 0x12a   : > { %1619 = vmatpush2.msra.mxu1 %v1226_v51  ;;  %1690 = vmatpush2.msra.mxu0 %v1228_v52  ;;  %v783_v51 = vld [vmem:[#allocation5 + $0x9b8] sm:$0xff]  ;;  %v780_v52 = vld [vmem:[#allocation5 + $0x9a0] sm:$0xff] }
 0x12b   : > { %1620 = vmatprep.subr.mxu1 %v1197_v53  ;;  %1691 = vmatprep.subr.mxu0 %v1199_v54  ;;  %v782_v53 = vld [vmem:[#allocation5 + $0x9b0] sm:$0xff]  ;;  %v751_v54 = vld [vmem:[#allocation5 + $0x8b8] sm:$0xff] }
 0x12c   : > { %1621 = vmatpush2.msra.mxu1 %v1196_v55  ;;  %1692 = vmatpush2.msra.mxu0 %v1198_v56  ;;  %v753_v55 = vld [vmem:[#allocation5 + $0x8c8] sm:$0xff]  ;;  %v750_v56 = vld [vmem:[#allocation5 + $0x8b0] sm:$0xff] }
 0x12d   : > { %1622 = vmatprep.subr.mxu1 %v1167_v57  ;;  %1693 = vmatprep.subr.mxu0 %v1169_v58  ;;  %v752_v57 = vld [vmem:[#allocation5 + $0x8c0] sm:$0xff]  ;;  %v721_v58 = vld [vmem:[#allocation5 + $0x7c8] sm:$0xff] }
 0x12e   : > { %1623 = vmatpush2.msra.mxu1 %v1166_v59  ;;  %1694 = vmatpush2.msra.mxu0 %v1168_v60  ;;  %v723_v59 = vld [vmem:[#allocation5 + $0x7d8] sm:$0xff]  ;;  %v720_v60 = vld [vmem:[#allocation5 + $0x7c0] sm:$0xff] }
 0x12f   : > { %1624 = vmatprep.subr.mxu1 %v1137_v61  ;;  %1695 = vmatprep.subr.mxu0 %v1139_v62  ;;  %v722_v61 = vld [vmem:[#allocation5 + $0x7d0] sm:$0xff]  ;;  %v691_v62 = vld [vmem:[#allocation5 + $0x6d8] sm:$0xff] }
 0x130   : > { %1625 = vmatpush2.msra.mxu1 %v1136_v63  ;;  %1696 = vmatpush2.msra.mxu0 %v1138_v1  ;;  %v693_v63 = vld [vmem:[#allocation5 + $0x6e8] sm:$0xff]  ;;  %v690_v1 = vld [vmem:[#allocation5 + $0x6d0] sm:$0xff] }
 0x131   : > { %1626 = vmatprep.subr.mxu1 %v1107_v3  ;;  %1697 = vmatprep.subr.mxu0 %v1109_v4  ;;  %v692_v3 = vld [vmem:[#allocation5 + $0x6e0] sm:$0xff]  ;;  %v661_v4 = vld [vmem:[#allocation5 + $0x5e8] sm:$0xff] }
 0x132   : > { %1627 = vmatpush2.msra.mxu1 %v1106_v5  ;;  %1698 = vmatpush2.msra.mxu0 %v1108_v6  ;;  %v663_v5 = vld [vmem:[#allocation5 + $0x5f8] sm:$0xff]  ;;  %v660_v6 = vld [vmem:[#allocation5 + $0x5e0] sm:$0xff] }
 0x133   : > { %1628 = vmatprep.subr.mxu1 %v1077_v7  ;;  %1699 = vmatprep.subr.mxu0 %v1079_v8  ;;  %v662_v7 = vld [vmem:[#allocation5 + $0x5f0] sm:$0xff]  ;;  %v631_v8 = vld [vmem:[#allocation5 + $0x4f8] sm:$0xff] }
 0x134   : > { %1629 = vmatpush2.msra.mxu1 %v1076_v9  ;;  %1700 = vmatpush2.msra.mxu0 %v1078_v10  ;;  %v633_v9 = vld [vmem:[#allocation5 + $0x508] sm:$0xff]  ;;  %v630_v10 = vld [vmem:[#allocation5 + $0x4f0] sm:$0xff] }
 0x135   : > { %1630 = vmatprep.subr.mxu1 %v1047_v11  ;;  %1701 = vmatprep.subr.mxu0 %v1049_v12  ;;  %v632_v11 = vld [vmem:[#allocation5 + $0x500] sm:$0xff]  ;;  %v601_v12 = vld [vmem:[#allocation5 + $0x408] sm:$0xff] }
 0x136   : > { %1631 = vmatpush2.msra.mxu1 %v1046_v14  ;;  %1702 = vmatpush2.msra.mxu0 %v1048_v15  ;;  %v603_v14 = vld [vmem:[#allocation5 + $0x418] sm:$0xff]  ;;  %v600_v15 = vld [vmem:[#allocation5 + $0x400] sm:$0xff] }
 0x137   : > { %1632 = vmatprep.subr.mxu1 %v1017_v16  ;;  %1703 = vmatprep.subr.mxu0 %v1019_v17  ;;  %v602_v16 = vld [vmem:[#allocation5 + $0x410] sm:$0xff]  ;;  %v571_v17 = vld [vmem:[#allocation5 + $0x318] sm:$0xff] }
 0x138   : > { %1633 = vmatpush2.msra.mxu1 %v1016_v18  ;;  %1704 = vmatpush2.msra.mxu0 %v1018_v21  ;;  %v573_v18 = vld [vmem:[#allocation5 + $0x328] sm:$0xff]  ;;  %v570_v21 = vld [vmem:[#allocation5 + $0x310] sm:$0xff] }
 0x139   : > { %1634 = vmatprep.subr.mxu1 %v987_v22  ;;  %1705 = vmatprep.subr.mxu0 %v989_v23  ;;  %v572_v22 = vld [vmem:[#allocation5 + $0x320] sm:$0xff]  ;;  %v541_v23 = vld [vmem:[#allocation5 + $0x228] sm:$0xff] }
 0x13a   : > { %1635 = vmatpush2.msra.mxu1 %v986_v24  ;;  %1706 = vmatpush2.msra.mxu0 %v988_v25  ;;  %v543_v24 = vld [vmem:[#allocation5 + $0x238] sm:$0xff]  ;;  %v540_v25 = vld [vmem:[#allocation5 + $0x220] sm:$0xff] }
 0x13b   : > { %1636 = vmatprep.subr.mxu1 %v957_v26  ;;  %1707 = vmatprep.subr.mxu0 %v959_v27  ;;  %v542_v26 = vld [vmem:[#allocation5 + $0x230] sm:$0xff]  ;;  %v511_v27 = vld [vmem:[#allocation5 + $0x138] sm:$0xff] }
 0x13c   : > { %1637 = vmatpush2.msra.mxu1 %v956_v28  ;;  %1708 = vmatpush2.msra.mxu0 %v958_v29  ;;  %v513_v28 = vld [vmem:[#allocation5 + $0x148] sm:$0xff]  ;;  %v510_v29 = vld [vmem:[#allocation5 + $0x130] sm:$0xff] }
 0x13d   : > { %1639 = vmatmul.mubr.f32.vlgmr.msra.gmra.mxu1 %v4944_v19  ;;  %1710 = vmatmul.mubr.f32.vlgmr.msra.gmra.mxu0 %v4944_v19 }
 0x13e   : > { %1716 = vmatprep.subr.mxu1 %v931_v30  ;;  %1787 = vmatprep.subr.mxu0 %v933_v31  ;;  %v512_v30 = vld [vmem:[#allocation5 + $0x140] sm:$0xff]  ;;  %v481_v31 = vld [vmem:[#allocation5 + $0x48] sm:$0xff] }
 0x13f   : > { %1717 = vmatpush1.msra.mxu1 %v930_v32  ;;  %1780 = vmatprep.mubr.f32.mxu1 %v4946_v20  ;;  %v483_v32 = vld [vmem:[#allocation5 + $0x58] sm:$0xff] }
 0x140   : > { %1788 = vmatpush1.msra.mxu0 %v932_v33  ;;  %1851 = vmatprep.mubr.f32.mxu0 %v4946_v20  ;;  %v480_v33 = vld [vmem:[#allocation5 + $0x40] sm:$0xff] }
 0x141   : > { %1718 = vmatprep.subr.mxu1 %v901_v34  ;;  %1789 = vmatprep.subr.mxu0 %v903_v35  ;;  %v482_v34 = vld [vmem:[#allocation5 + $0x50] sm:$0xff]  ;;  %v1411_v35 = vld [vmem:[#allocation5 + $0x1d58] sm:$0xff] }
 0x142   : > { %1719 = vmatpush1.msra.mxu1 %v900_v36  ;;  %1790 = vmatpush1.msra.mxu0 %v902_v37  ;;  %v1413_v36 = vld [vmem:[#allocation5 + $0x1d68] sm:$0xff]  ;;  %v1410_v37 = vld [vmem:[#allocation5 + $0x1d50] sm:$0xff] }
 0x143   : > { %1720 = vmatprep.subr.mxu1 %v871_v38  ;;  %1791 = vmatprep.subr.mxu0 %v873_v39  ;;  %v1412_v38 = vld [vmem:[#allocation5 + $0x1d60] sm:$0xff]  ;;  %v1381_v39 = vld [vmem:[#allocation5 + $0x1c68] sm:$0xff] }
 0x144   : > { %1721 = vmatpush1.msra.mxu1 %v870_v40  ;;  %1792 = vmatpush1.msra.mxu0 %v872_v41  ;;  %v1383_v40 = vld [vmem:[#allocation5 + $0x1c78] sm:$0xff]  ;;  %v1380_v41 = vld [vmem:[#allocation5 + $0x1c60] sm:$0xff] }
 0x145   : > { %1722 = vmatprep.subr.mxu1 %v841_v42  ;;  %1793 = vmatprep.subr.mxu0 %v843_v43  ;;  %v1382_v42 = vld [vmem:[#allocation5 + $0x1c70] sm:$0xff]  ;;  %v1351_v43 = vld [vmem:[#allocation5 + $0x1b78] sm:$0xff] }
 0x146   : > { %1723 = vmatpush1.msra.mxu1 %v840_v44  ;;  %1794 = vmatpush1.msra.mxu0 %v842_v45  ;;  %v1353_v44 = vld [vmem:[#allocation5 + $0x1b88] sm:$0xff]  ;;  %v1350_v45 = vld [vmem:[#allocation5 + $0x1b70] sm:$0xff] }
 0x147   : > { %1724 = vmatprep.subr.mxu1 %v811_v46  ;;  %1795 = vmatprep.subr.mxu0 %v813_v47  ;;  %v1352_v46 = vld [vmem:[#allocation5 + $0x1b80] sm:$0xff]  ;;  %v1321_v47 = vld [vmem:[#allocation5 + $0x1a88] sm:$0xff] }
 0x148   : > { %1725 = vmatpush1.msra.mxu1 %v810_v48  ;;  %1796 = vmatpush1.msra.mxu0 %v812_v49  ;;  %v1323_v48 = vld [vmem:[#allocation5 + $0x1a98] sm:$0xff]  ;;  %v1320_v49 = vld [vmem:[#allocation5 + $0x1a80] sm:$0xff] }
 0x149   : > { %1726 = vmatprep.subr.mxu1 %v781_v50  ;;  %1797 = vmatprep.subr.mxu0 %v783_v51  ;;  %v1322_v50 = vld [vmem:[#allocation5 + $0x1a90] sm:$0xff]  ;;  %v1291_v51 = vld [vmem:[#allocation5 + $0x1998] sm:$0xff] }
 0x14a   : > { %1727 = vmatpush1.msra.mxu1 %v780_v52  ;;  %1798 = vmatpush1.msra.mxu0 %v782_v53  ;;  %v1293_v52 = vld [vmem:[#allocation5 + $0x19a8] sm:$0xff]  ;;  %v1290_v53 = vld [vmem:[#allocation5 + $0x1990] sm:$0xff] }
 0x14b   : > { %1728 = vmatprep.subr.mxu1 %v751_v54  ;;  %1799 = vmatprep.subr.mxu0 %v753_v55  ;;  %v1292_v54 = vld [vmem:[#allocation5 + $0x19a0] sm:$0xff]  ;;  %v1261_v55 = vld [vmem:[#allocation5 + $0x18a8] sm:$0xff] }
 0x14c   : > { %1729 = vmatpush1.msra.mxu1 %v750_v56  ;;  %1800 = vmatpush1.msra.mxu0 %v752_v57  ;;  %v1263_v56 = vld [vmem:[#allocation5 + $0x18b8] sm:$0xff]  ;;  %v1260_v57 = vld [vmem:[#allocation5 + $0x18a0] sm:$0xff] }
 0x14d   : > { %1730 = vmatprep.subr.mxu1 %v721_v58  ;;  %1801 = vmatprep.subr.mxu0 %v723_v59  ;;  %v1262_v58 = vld [vmem:[#allocation5 + $0x18b0] sm:$0xff]  ;;  %v1231_v59 = vld [vmem:[#allocation5 + $0x17b8] sm:$0xff] }
 0x14e   : > { %1731 = vmatpush1.msra.mxu1 %v720_v60  ;;  %1802 = vmatpush1.msra.mxu0 %v722_v61  ;;  %v1233_v60 = vld [vmem:[#allocation5 + $0x17c8] sm:$0xff]  ;;  %v1230_v61 = vld [vmem:[#allocation5 + $0x17b0] sm:$0xff] }
 0x14f   : > { %1732 = vmatprep.subr.mxu1 %v691_v62  ;;  %1803 = vmatprep.subr.mxu0 %v693_v63  ;;  %v1232_v62 = vld [vmem:[#allocation5 + $0x17c0] sm:$0xff]  ;;  %v1201_v63 = vld [vmem:[#allocation5 + $0x16c8] sm:$0xff] }
 0x150   : > { %1733 = vmatpush1.msra.mxu1 %v690_v1  ;;  %1804 = vmatpush1.msra.mxu0 %v692_v3  ;;  %v1203_v1 = vld [vmem:[#allocation5 + $0x16d8] sm:$0xff]  ;;  %v1200_v3 = vld [vmem:[#allocation5 + $0x16c0] sm:$0xff] }
 0x151   : > { %1734 = vmatprep.subr.mxu1 %v661_v4  ;;  %1805 = vmatprep.subr.mxu0 %v663_v5  ;;  %v1202_v4 = vld [vmem:[#allocation5 + $0x16d0] sm:$0xff]  ;;  %v1171_v5 = vld [vmem:[#allocation5 + $0x15d8] sm:$0xff] }
 0x152   : > { %1735 = vmatpush1.msra.mxu1 %v660_v6  ;;  %1806 = vmatpush1.msra.mxu0 %v662_v7  ;;  %v1173_v6 = vld [vmem:[#allocation5 + $0x15e8] sm:$0xff]  ;;  %v1170_v7 = vld [vmem:[#allocation5 + $0x15d0] sm:$0xff] }
 0x153   : > { %1736 = vmatprep.subr.mxu1 %v631_v8  ;;  %1807 = vmatprep.subr.mxu0 %v633_v9  ;;  %v1172_v8 = vld [vmem:[#allocation5 + $0x15e0] sm:$0xff]  ;;  %v1141_v9 = vld [vmem:[#allocation5 + $0x14e8] sm:$0xff] }
 0x154   : > { %1737 = vmatpush1.msra.mxu1 %v630_v10  ;;  %1808 = vmatpush1.msra.mxu0 %v632_v11  ;;  %v1143_v10 = vld [vmem:[#allocation5 + $0x14f8] sm:$0xff]  ;;  %v1140_v11 = vld [vmem:[#allocation5 + $0x14e0] sm:$0xff] }
 0x155   : > { %1738 = vmatprep.subr.mxu1 %v601_v12  ;;  %1809 = vmatprep.subr.mxu0 %v603_v14  ;;  %v1142_v12 = vld [vmem:[#allocation5 + $0x14f0] sm:$0xff]  ;;  %v1111_v14 = vld [vmem:[#allocation5 + $0x13f8] sm:$0xff] }
 0x156   : > { %1739 = vmatpush1.msra.mxu1 %v600_v15  ;;  %1810 = vmatpush1.msra.mxu0 %v602_v16  ;;  %v1113_v15 = vld [vmem:[#allocation5 + $0x1408] sm:$0xff]  ;;  %v1110_v16 = vld [vmem:[#allocation5 + $0x13f0] sm:$0xff] }
 0x157   : > { %1740 = vmatprep.subr.mxu1 %v571_v17  ;;  %1811 = vmatprep.subr.mxu0 %v573_v18  ;;  %v1112_v17 = vld [vmem:[#allocation5 + $0x1400] sm:$0xff]  ;;  %v1081_v18 = vld [vmem:[#allocation5 + $0x1308] sm:$0xff] }
 0x158   : > { %1741 = vmatpush1.msra.mxu1 %v570_v21  ;;  %1812 = vmatpush1.msra.mxu0 %v572_v22  ;;  %v1083_v21 = vld [vmem:[#allocation5 + $0x1318] sm:$0xff]  ;;  %v1080_v22 = vld [vmem:[#allocation5 + $0x1300] sm:$0xff] }
 0x159   : > { %1742 = vmatprep.subr.mxu1 %v541_v23  ;;  %1813 = vmatprep.subr.mxu0 %v543_v24  ;;  %v1082_v23 = vld [vmem:[#allocation5 + $0x1310] sm:$0xff]  ;;  %v1051_v24 = vld [vmem:[#allocation5 + $0x1218] sm:$0xff] }
 0x15a   : > { %1743 = vmatpush1.msra.mxu1 %v540_v25  ;;  %1814 = vmatpush1.msra.mxu0 %v542_v26  ;;  %v1053_v25 = vld [vmem:[#allocation5 + $0x1228] sm:$0xff]  ;;  %v1050_v26 = vld [vmem:[#allocation5 + $0x1210] sm:$0xff] }
 0x15b   : > { %1744 = vmatprep.subr.mxu1 %v511_v27  ;;  %1815 = vmatprep.subr.mxu0 %v513_v28  ;;  %v1052_v27 = vld [vmem:[#allocation5 + $0x1220] sm:$0xff]  ;;  %v1021_v28 = vld [vmem:[#allocation5 + $0x1128] sm:$0xff] }
 0x15c   : > { %1745 = vmatpush1.msra.mxu1 %v510_v29  ;;  %1816 = vmatpush1.msra.mxu0 %v512_v30  ;;  %v1023_v29 = vld [vmem:[#allocation5 + $0x1138] sm:$0xff]  ;;  %v1020_v30 = vld [vmem:[#allocation5 + $0x1120] sm:$0xff] }
 0x15d   : > { %1746 = vmatprep.subr.mxu1 %v481_v31  ;;  %1817 = vmatprep.subr.mxu0 %v483_v32  ;;  %v1022_v31 = vld [vmem:[#allocation5 + $0x1130] sm:$0xff]  ;;  %v991_v32 = vld [vmem:[#allocation5 + $0x1038] sm:$0xff] }
 0x15e   : > { %1747 = vmatpush1.msra.mxu1 %v480_v33  ;;  %1818 = vmatpush1.msra.mxu0 %v482_v34  ;;  %v993_v33 = vld [vmem:[#allocation5 + $0x1048] sm:$0xff]  ;;  %v990_v34 = vld [vmem:[#allocation5 + $0x1030] sm:$0xff] }
 0x15f   : > { %1748 = vmatprep.subr.mxu1 %v1411_v35  ;;  %1819 = vmatprep.subr.mxu0 %v1413_v36  ;;  %v992_v35 = vld [vmem:[#allocation5 + $0x1040] sm:$0xff]  ;;  %v961_v36 = vld [vmem:[#allocation5 + $0xf48] sm:$0xff] }
 0x160   : > { %1749 = vmatpush2.msra.mxu1 %v1410_v37  ;;  %1820 = vmatpush2.msra.mxu0 %v1412_v38  ;;  %v963_v37 = vld [vmem:[#allocation5 + $0xf58] sm:$0xff]  ;;  %v960_v38 = vld [vmem:[#allocation5 + $0xf40] sm:$0xff] }
 0x161   : > { %1750 = vmatprep.subr.mxu1 %v1381_v39  ;;  %1821 = vmatprep.subr.mxu0 %v1383_v40  ;;  %v962_v39 = vld [vmem:[#allocation5 + $0xf50] sm:$0xff]  ;;  %v935_v40 = vld [vmem:[#allocation5 + $0xe78] sm:$0xff] }
 0x162   : > { %1751 = vmatpush2.msra.mxu1 %v1380_v41  ;;  %1822 = vmatpush2.msra.mxu0 %v1382_v42  ;;  %v937_v41 = vld [vmem:[#allocation5 + $0xe88] sm:$0xff]  ;;  %v934_v42 = vld [vmem:[#allocation5 + $0xe70] sm:$0xff] }
 0x163   : > { %1752 = vmatprep.subr.mxu1 %v1351_v43  ;;  %1823 = vmatprep.subr.mxu0 %v1353_v44  ;;  %v936_v43 = vld [vmem:[#allocation5 + $0xe80] sm:$0xff]  ;;  %v905_v44 = vld [vmem:[#allocation5 + $0xd88] sm:$0xff] }
 0x164   : > { %1753 = vmatpush2.msra.mxu1 %v1350_v45  ;;  %1824 = vmatpush2.msra.mxu0 %v1352_v46  ;;  %v907_v45 = vld [vmem:[#allocation5 + $0xd98] sm:$0xff]  ;;  %v904_v46 = vld [vmem:[#allocation5 + $0xd80] sm:$0xff] }
 0x165   : > { %1754 = vmatprep.subr.mxu1 %v1321_v47  ;;  %1825 = vmatprep.subr.mxu0 %v1323_v48  ;;  %v906_v47 = vld [vmem:[#allocation5 + $0xd90] sm:$0xff]  ;;  %v875_v48 = vld [vmem:[#allocation5 + $0xc98] sm:$0xff] }
 0x166   : > { %1755 = vmatpush2.msra.mxu1 %v1320_v49  ;;  %1826 = vmatpush2.msra.mxu0 %v1322_v50  ;;  %v877_v49 = vld [vmem:[#allocation5 + $0xca8] sm:$0xff]  ;;  %v874_v50 = vld [vmem:[#allocation5 + $0xc90] sm:$0xff] }
 0x167   : > { %1756 = vmatprep.subr.mxu1 %v1291_v51  ;;  %1827 = vmatprep.subr.mxu0 %v1293_v52  ;;  %v876_v51 = vld [vmem:[#allocation5 + $0xca0] sm:$0xff]  ;;  %v845_v52 = vld [vmem:[#allocation5 + $0xba8] sm:$0xff] }
 0x168   : > { %1757 = vmatpush2.msra.mxu1 %v1290_v53  ;;  %1828 = vmatpush2.msra.mxu0 %v1292_v54  ;;  %v847_v53 = vld [vmem:[#allocation5 + $0xbb8] sm:$0xff]  ;;  %v844_v54 = vld [vmem:[#allocation5 + $0xba0] sm:$0xff] }
 0x169   : > { %1758 = vmatprep.subr.mxu1 %v1261_v55  ;;  %1829 = vmatprep.subr.mxu0 %v1263_v56  ;;  %v846_v55 = vld [vmem:[#allocation5 + $0xbb0] sm:$0xff]  ;;  %v815_v56 = vld [vmem:[#allocation5 + $0xab8] sm:$0xff] }
 0x16a   : > { %1759 = vmatpush2.msra.mxu1 %v1260_v57  ;;  %1830 = vmatpush2.msra.mxu0 %v1262_v58  ;;  %v817_v57 = vld [vmem:[#allocation5 + $0xac8] sm:$0xff]  ;;  %v814_v58 = vld [vmem:[#allocation5 + $0xab0] sm:$0xff] }
 0x16b   : > { %1760 = vmatprep.subr.mxu1 %v1231_v59  ;;  %1831 = vmatprep.subr.mxu0 %v1233_v60  ;;  %v816_v59 = vld [vmem:[#allocation5 + $0xac0] sm:$0xff]  ;;  %v785_v60 = vld [vmem:[#allocation5 + $0x9c8] sm:$0xff] }
 0x16c   : > { %1761 = vmatpush2.msra.mxu1 %v1230_v61  ;;  %1832 = vmatpush2.msra.mxu0 %v1232_v62  ;;  %v787_v61 = vld [vmem:[#allocation5 + $0x9d8] sm:$0xff]  ;;  %v784_v62 = vld [vmem:[#allocation5 + $0x9c0] sm:$0xff] }
 0x16d   : > { %1762 = vmatprep.subr.mxu1 %v1201_v63  ;;  %1833 = vmatprep.subr.mxu0 %v1203_v1  ;;  %v786_v63 = vld [vmem:[#allocation5 + $0x9d0] sm:$0xff]  ;;  %v755_v1 = vld [vmem:[#allocation5 + $0x8d8] sm:$0xff] }
 0x16e   : > { %1763 = vmatpush2.msra.mxu1 %v1200_v3  ;;  %1834 = vmatpush2.msra.mxu0 %v1202_v4  ;;  %v757_v3 = vld [vmem:[#allocation5 + $0x8e8] sm:$0xff]  ;;  %v754_v4 = vld [vmem:[#allocation5 + $0x8d0] sm:$0xff] }
 0x16f   : > { %1764 = vmatprep.subr.mxu1 %v1171_v5  ;;  %1835 = vmatprep.subr.mxu0 %v1173_v6  ;;  %v756_v5 = vld [vmem:[#allocation5 + $0x8e0] sm:$0xff]  ;;  %v725_v6 = vld [vmem:[#allocation5 + $0x7e8] sm:$0xff] }
 0x170   : > { %1765 = vmatpush2.msra.mxu1 %v1170_v7  ;;  %1836 = vmatpush2.msra.mxu0 %v1172_v8  ;;  %v727_v7 = vld [vmem:[#allocation5 + $0x7f8] sm:$0xff]  ;;  %v724_v8 = vld [vmem:[#allocation5 + $0x7e0] sm:$0xff] }
 0x171   : > { %1766 = vmatprep.subr.mxu1 %v1141_v9  ;;  %1837 = vmatprep.subr.mxu0 %v1143_v10  ;;  %v726_v9 = vld [vmem:[#allocation5 + $0x7f0] sm:$0xff]  ;;  %v695_v10 = vld [vmem:[#allocation5 + $0x6f8] sm:$0xff] }
 0x172   : > { %1767 = vmatpush2.msra.mxu1 %v1140_v11  ;;  %1838 = vmatpush2.msra.mxu0 %v1142_v12  ;;  %v697_v11 = vld [vmem:[#allocation5 + $0x708] sm:$0xff]  ;;  %v694_v12 = vld [vmem:[#allocation5 + $0x6f0] sm:$0xff] }
 0x173   : > { %1768 = vmatprep.subr.mxu1 %v1111_v14  ;;  %1839 = vmatprep.subr.mxu0 %v1113_v15  ;;  %v696_v14 = vld [vmem:[#allocation5 + $0x700] sm:$0xff]  ;;  %v665_v15 = vld [vmem:[#allocation5 + $0x608] sm:$0xff] }
 0x174   : > { %1769 = vmatpush2.msra.mxu1 %v1110_v16  ;;  %1840 = vmatpush2.msra.mxu0 %v1112_v17  ;;  %v667_v16 = vld [vmem:[#allocation5 + $0x618] sm:$0xff]  ;;  %v664_v17 = vld [vmem:[#allocation5 + $0x600] sm:$0xff] }
 0x175   : > { %1770 = vmatprep.subr.mxu1 %v1081_v18  ;;  %1841 = vmatprep.subr.mxu0 %v1083_v21  ;;  %v666_v18 = vld [vmem:[#allocation5 + $0x610] sm:$0xff]  ;;  %v635_v21 = vld [vmem:[#allocation5 + $0x518] sm:$0xff] }
 0x176   : > { %1771 = vmatpush2.msra.mxu1 %v1080_v22  ;;  %1842 = vmatpush2.msra.mxu0 %v1082_v23  ;;  %v637_v22 = vld [vmem:[#allocation5 + $0x528] sm:$0xff]  ;;  %v634_v23 = vld [vmem:[#allocation5 + $0x510] sm:$0xff] }
 0x177   : > { %1772 = vmatprep.subr.mxu1 %v1051_v24  ;;  %1843 = vmatprep.subr.mxu0 %v1053_v25  ;;  %v636_v24 = vld [vmem:[#allocation5 + $0x520] sm:$0xff]  ;;  %v605_v25 = vld [vmem:[#allocation5 + $0x428] sm:$0xff] }
 0x178   : > { %1773 = vmatpush2.msra.mxu1 %v1050_v26  ;;  %1844 = vmatpush2.msra.mxu0 %v1052_v27  ;;  %v607_v26 = vld [vmem:[#allocation5 + $0x438] sm:$0xff]  ;;  %v604_v27 = vld [vmem:[#allocation5 + $0x420] sm:$0xff] }
 0x179   : > { %1774 = vmatprep.subr.mxu1 %v1021_v28  ;;  %1845 = vmatprep.subr.mxu0 %v1023_v29  ;;  %v606_v28 = vld [vmem:[#allocation5 + $0x430] sm:$0xff]  ;;  %v575_v29 = vld [vmem:[#allocation5 + $0x338] sm:$0xff] }
 0x17a   : > { %1775 = vmatpush2.msra.mxu1 %v1020_v30  ;;  %1846 = vmatpush2.msra.mxu0 %v1022_v31  ;;  %v577_v30 = vld [vmem:[#allocation5 + $0x348] sm:$0xff]  ;;  %v574_v31 = vld [vmem:[#allocation5 + $0x330] sm:$0xff] }
 0x17b   : > { %1776 = vmatprep.subr.mxu1 %v991_v32  ;;  %1847 = vmatprep.subr.mxu0 %v993_v33  ;;  %v576_v32 = vld [vmem:[#allocation5 + $0x340] sm:$0xff]  ;;  %v545_v33 = vld [vmem:[#allocation5 + $0x248] sm:$0xff] }
 0x17c   : > { %1777 = vmatpush2.msra.mxu1 %v990_v34  ;;  %1848 = vmatpush2.msra.mxu0 %v992_v35  ;;  %v547_v34 = vld [vmem:[#allocation5 + $0x258] sm:$0xff]  ;;  %v544_v35 = vld [vmem:[#allocation5 + $0x240] sm:$0xff] }
 0x17d   : > { %1778 = vmatprep.subr.mxu1 %v961_v36  ;;  %1849 = vmatprep.subr.mxu0 %v963_v37  ;;  %v546_v36 = vld [vmem:[#allocation5 + $0x250] sm:$0xff]  ;;  %v515_v37 = vld [vmem:[#allocation5 + $0x158] sm:$0xff] }
 0x17e   : > { %1779 = vmatpush2.msra.mxu1 %v960_v38  ;;  %1850 = vmatpush2.msra.mxu0 %v962_v39  ;;  %v517_v38 = vld [vmem:[#allocation5 + $0x168] sm:$0xff]  ;;  %v514_v39 = vld [vmem:[#allocation5 + $0x150] sm:$0xff] }
 0x17f   : > { %1781 = vmatmul.mubr.f32.vlgmr.msra.gmra.mxu1 %v4944_v19  ;;  %1852 = vmatmul.mubr.f32.vlgmr.msra.gmra.mxu0 %v4944_v19 }
 0x180   : > { %1858 = vmatprep.subr.mxu1 %v935_v40  ;;  %1929 = vmatprep.subr.mxu0 %v937_v41  ;;  %v516_v40 = vld [vmem:[#allocation5 + $0x160] sm:$0xff]  ;;  %v485_v41 = vld [vmem:[#allocation5 + $0x68] sm:$0xff] }
 0x181   : > { %1859 = vmatpush1.msra.mxu1 %v934_v42  ;;  %1922 = vmatprep.mubr.f32.mxu1 %v4946_v20  ;;  %v487_v42 = vld [vmem:[#allocation5 + $0x78] sm:$0xff] }
 0x182   : > { %1930 = vmatpush1.msra.mxu0 %v936_v43  ;;  %1993 = vmatprep.mubr.f32.mxu0 %v4946_v20  ;;  %v484_v43 = vld [vmem:[#allocation5 + $0x60] sm:$0xff] }
 0x183   : > { %1860 = vmatprep.subr.mxu1 %v905_v44  ;;  %1931 = vmatprep.subr.mxu0 %v907_v45  ;;  %v486_v44 = vld [vmem:[#allocation5 + $0x70] sm:$0xff]  ;;  %v1415_v45 = vld [vmem:[#allocation5 + $0x1d78] sm:$0xff] }
 0x184   : > { %1861 = vmatpush1.msra.mxu1 %v904_v46  ;;  %1932 = vmatpush1.msra.mxu0 %v906_v47  ;;  %v1417_v46 = vld [vmem:[#allocation5 + $0x1d88] sm:$0xff]  ;;  %v1414_v47 = vld [vmem:[#allocation5 + $0x1d70] sm:$0xff] }
 0x185   : > { %1862 = vmatprep.subr.mxu1 %v875_v48  ;;  %1933 = vmatprep.subr.mxu0 %v877_v49  ;;  %v1416_v48 = vld [vmem:[#allocation5 + $0x1d80] sm:$0xff]  ;;  %v1385_v49 = vld [vmem:[#allocation5 + $0x1c88] sm:$0xff] }
 0x186   : > { %1863 = vmatpush1.msra.mxu1 %v874_v50  ;;  %1934 = vmatpush1.msra.mxu0 %v876_v51  ;;  %v1387_v50 = vld [vmem:[#allocation5 + $0x1c98] sm:$0xff]  ;;  %v1384_v51 = vld [vmem:[#allocation5 + $0x1c80] sm:$0xff] }
 0x187   : > { %1864 = vmatprep.subr.mxu1 %v845_v52  ;;  %1935 = vmatprep.subr.mxu0 %v847_v53  ;;  %v1386_v52 = vld [vmem:[#allocation5 + $0x1c90] sm:$0xff]  ;;  %v1355_v53 = vld [vmem:[#allocation5 + $0x1b98] sm:$0xff] }
 0x188   : > { %1865 = vmatpush1.msra.mxu1 %v844_v54  ;;  %1936 = vmatpush1.msra.mxu0 %v846_v55  ;;  %v1357_v54 = vld [vmem:[#allocation5 + $0x1ba8] sm:$0xff]  ;;  %v1354_v55 = vld [vmem:[#allocation5 + $0x1b90] sm:$0xff] }
 0x189   : > { %1866 = vmatprep.subr.mxu1 %v815_v56  ;;  %1937 = vmatprep.subr.mxu0 %v817_v57  ;;  %v1356_v56 = vld [vmem:[#allocation5 + $0x1ba0] sm:$0xff]  ;;  %v1325_v57 = vld [vmem:[#allocation5 + $0x1aa8] sm:$0xff] }
 0x18a   : > { %1867 = vmatpush1.msra.mxu1 %v814_v58  ;;  %1938 = vmatpush1.msra.mxu0 %v816_v59  ;;  %v1327_v58 = vld [vmem:[#allocation5 + $0x1ab8] sm:$0xff]  ;;  %v1324_v59 = vld [vmem:[#allocation5 + $0x1aa0] sm:$0xff] }
 0x18b   : > { %1868 = vmatprep.subr.mxu1 %v785_v60  ;;  %1939 = vmatprep.subr.mxu0 %v787_v61  ;;  %v1326_v60 = vld [vmem:[#allocation5 + $0x1ab0] sm:$0xff]  ;;  %v1295_v61 = vld [vmem:[#allocation5 + $0x19b8] sm:$0xff] }
 0x18c   : > { %1869 = vmatpush1.msra.mxu1 %v784_v62  ;;  %1940 = vmatpush1.msra.mxu0 %v786_v63  ;;  %v1297_v62 = vld [vmem:[#allocation5 + $0x19c8] sm:$0xff]  ;;  %v1294_v63 = vld [vmem:[#allocation5 + $0x19b0] sm:$0xff] }
 0x18d   : > { %1870 = vmatprep.subr.mxu1 %v755_v1  ;;  %1941 = vmatprep.subr.mxu0 %v757_v3  ;;  %v1296_v1 = vld [vmem:[#allocation5 + $0x19c0] sm:$0xff]  ;;  %v1265_v3 = vld [vmem:[#allocation5 + $0x18c8] sm:$0xff] }
 0x18e   : > { %1871 = vmatpush1.msra.mxu1 %v754_v4  ;;  %1942 = vmatpush1.msra.mxu0 %v756_v5  ;;  %v1267_v4 = vld [vmem:[#allocation5 + $0x18d8] sm:$0xff]  ;;  %v1264_v5 = vld [vmem:[#allocation5 + $0x18c0] sm:$0xff] }
 0x18f   : > { %1872 = vmatprep.subr.mxu1 %v725_v6  ;;  %1943 = vmatprep.subr.mxu0 %v727_v7  ;;  %v1266_v6 = vld [vmem:[#allocation5 + $0x18d0] sm:$0xff]  ;;  %v1235_v7 = vld [vmem:[#allocation5 + $0x17d8] sm:$0xff] }
 0x190   : > { %1873 = vmatpush1.msra.mxu1 %v724_v8  ;;  %1944 = vmatpush1.msra.mxu0 %v726_v9  ;;  %v1237_v8 = vld [vmem:[#allocation5 + $0x17e8] sm:$0xff]  ;;  %v1234_v9 = vld [vmem:[#allocation5 + $0x17d0] sm:$0xff] }
 0x191   : > { %1874 = vmatprep.subr.mxu1 %v695_v10  ;;  %1945 = vmatprep.subr.mxu0 %v697_v11  ;;  %v1236_v10 = vld [vmem:[#allocation5 + $0x17e0] sm:$0xff]  ;;  %v1205_v11 = vld [vmem:[#allocation5 + $0x16e8] sm:$0xff] }
 0x192   : > { %1875 = vmatpush1.msra.mxu1 %v694_v12  ;;  %1946 = vmatpush1.msra.mxu0 %v696_v14  ;;  %v1207_v12 = vld [vmem:[#allocation5 + $0x16f8] sm:$0xff]  ;;  %v1204_v14 = vld [vmem:[#allocation5 + $0x16e0] sm:$0xff] }
 0x193   : > { %1876 = vmatprep.subr.mxu1 %v665_v15  ;;  %1947 = vmatprep.subr.mxu0 %v667_v16  ;;  %v1206_v15 = vld [vmem:[#allocation5 + $0x16f0] sm:$0xff]  ;;  %v1175_v16 = vld [vmem:[#allocation5 + $0x15f8] sm:$0xff] }
 0x194   : > { %1877 = vmatpush1.msra.mxu1 %v664_v17  ;;  %1948 = vmatpush1.msra.mxu0 %v666_v18  ;;  %v1177_v17 = vld [vmem:[#allocation5 + $0x1608] sm:$0xff]  ;;  %v1174_v18 = vld [vmem:[#allocation5 + $0x15f0] sm:$0xff] }
 0x195   : > { %1878 = vmatprep.subr.mxu1 %v635_v21  ;;  %1949 = vmatprep.subr.mxu0 %v637_v22  ;;  %v1176_v21 = vld [vmem:[#allocation5 + $0x1600] sm:$0xff]  ;;  %v1145_v22 = vld [vmem:[#allocation5 + $0x1508] sm:$0xff] }
 0x196   : > { %1879 = vmatpush1.msra.mxu1 %v634_v23  ;;  %1950 = vmatpush1.msra.mxu0 %v636_v24  ;;  %v1147_v23 = vld [vmem:[#allocation5 + $0x1518] sm:$0xff]  ;;  %v1144_v24 = vld [vmem:[#allocation5 + $0x1500] sm:$0xff] }
 0x197   : > { %1880 = vmatprep.subr.mxu1 %v605_v25  ;;  %1951 = vmatprep.subr.mxu0 %v607_v26  ;;  %v1146_v25 = vld [vmem:[#allocation5 + $0x1510] sm:$0xff]  ;;  %v1115_v26 = vld [vmem:[#allocation5 + $0x1418] sm:$0xff] }
 0x198   : > { %1881 = vmatpush1.msra.mxu1 %v604_v27  ;;  %1952 = vmatpush1.msra.mxu0 %v606_v28  ;;  %v1117_v27 = vld [vmem:[#allocation5 + $0x1428] sm:$0xff]  ;;  %v1114_v28 = vld [vmem:[#allocation5 + $0x1410] sm:$0xff] }
 0x199   : > { %1882 = vmatprep.subr.mxu1 %v575_v29  ;;  %1953 = vmatprep.subr.mxu0 %v577_v30  ;;  %v1116_v29 = vld [vmem:[#allocation5 + $0x1420] sm:$0xff]  ;;  %v1085_v30 = vld [vmem:[#allocation5 + $0x1328] sm:$0xff] }
 0x19a   : > { %1883 = vmatpush1.msra.mxu1 %v574_v31  ;;  %1954 = vmatpush1.msra.mxu0 %v576_v32  ;;  %v1087_v31 = vld [vmem:[#allocation5 + $0x1338] sm:$0xff]  ;;  %v1084_v32 = vld [vmem:[#allocation5 + $0x1320] sm:$0xff] }
 0x19b   : > { %1884 = vmatprep.subr.mxu1 %v545_v33  ;;  %1955 = vmatprep.subr.mxu0 %v547_v34  ;;  %v1086_v33 = vld [vmem:[#allocation5 + $0x1330] sm:$0xff]  ;;  %v1055_v34 = vld [vmem:[#allocation5 + $0x1238] sm:$0xff] }
 0x19c   : > { %1885 = vmatpush1.msra.mxu1 %v544_v35  ;;  %1956 = vmatpush1.msra.mxu0 %v546_v36  ;;  %v1057_v35 = vld [vmem:[#allocation5 + $0x1248] sm:$0xff]  ;;  %v1054_v36 = vld [vmem:[#allocation5 + $0x1230] sm:$0xff] }
 0x19d   : > { %1886 = vmatprep.subr.mxu1 %v515_v37  ;;  %1957 = vmatprep.subr.mxu0 %v517_v38  ;;  %v1056_v37 = vld [vmem:[#allocation5 + $0x1240] sm:$0xff]  ;;  %v1025_v38 = vld [vmem:[#allocation5 + $0x1148] sm:$0xff] }
 0x19e   : > { %1887 = vmatpush1.msra.mxu1 %v514_v39  ;;  %1958 = vmatpush1.msra.mxu0 %v516_v40  ;;  %v1027_v39 = vld [vmem:[#allocation5 + $0x1158] sm:$0xff]  ;;  %v1024_v40 = vld [vmem:[#allocation5 + $0x1140] sm:$0xff] }
 0x19f   : > { %1888 = vmatprep.subr.mxu1 %v485_v41  ;;  %1959 = vmatprep.subr.mxu0 %v487_v42  ;;  %v1026_v41 = vld [vmem:[#allocation5 + $0x1150] sm:$0xff]  ;;  %v995_v42 = vld [vmem:[#allocation5 + $0x1058] sm:$0xff] }
 0x1a0   : > { %1889 = vmatpush1.msra.mxu1 %v484_v43  ;;  %1960 = vmatpush1.msra.mxu0 %v486_v44  ;;  %v997_v43 = vld [vmem:[#allocation5 + $0x1068] sm:$0xff]  ;;  %v994_v44 = vld [vmem:[#allocation5 + $0x1050] sm:$0xff] }
 0x1a1   : > { %1890 = vmatprep.subr.mxu1 %v1415_v45  ;;  %1961 = vmatprep.subr.mxu0 %v1417_v46  ;;  %v996_v45 = vld [vmem:[#allocation5 + $0x1060] sm:$0xff]  ;;  %v965_v46 = vld [vmem:[#allocation5 + $0xf68] sm:$0xff] }
 0x1a2   : > { %1891 = vmatpush2.msra.mxu1 %v1414_v47  ;;  %1962 = vmatpush2.msra.mxu0 %v1416_v48  ;;  %v967_v47 = vld [vmem:[#allocation5 + $0xf78] sm:$0xff]  ;;  %v964_v48 = vld [vmem:[#allocation5 + $0xf60] sm:$0xff] }
 0x1a3   : > { %1892 = vmatprep.subr.mxu1 %v1385_v49  ;;  %1963 = vmatprep.subr.mxu0 %v1387_v50  ;;  %v966_v49 = vld [vmem:[#allocation5 + $0xf70] sm:$0xff]  ;;  %v939_v50 = vld [vmem:[#allocation5 + $0xe98] sm:$0xff] }
 0x1a4   : > { %1893 = vmatpush2.msra.mxu1 %v1384_v51  ;;  %1964 = vmatpush2.msra.mxu0 %v1386_v52  ;;  %v941_v51 = vld [vmem:[#allocation5 + $0xea8] sm:$0xff]  ;;  %v938_v52 = vld [vmem:[#allocation5 + $0xe90] sm:$0xff] }
 0x1a5   : > { %1894 = vmatprep.subr.mxu1 %v1355_v53  ;;  %1965 = vmatprep.subr.mxu0 %v1357_v54  ;;  %v940_v53 = vld [vmem:[#allocation5 + $0xea0] sm:$0xff]  ;;  %v909_v54 = vld [vmem:[#allocation5 + $0xda8] sm:$0xff] }
 0x1a6   : > { %1895 = vmatpush2.msra.mxu1 %v1354_v55  ;;  %1966 = vmatpush2.msra.mxu0 %v1356_v56  ;;  %v911_v55 = vld [vmem:[#allocation5 + $0xdb8] sm:$0xff]  ;;  %v908_v56 = vld [vmem:[#allocation5 + $0xda0] sm:$0xff] }
 0x1a7   : > { %1896 = vmatprep.subr.mxu1 %v1325_v57  ;;  %1967 = vmatprep.subr.mxu0 %v1327_v58  ;;  %v910_v57 = vld [vmem:[#allocation5 + $0xdb0] sm:$0xff]  ;;  %v879_v58 = vld [vmem:[#allocation5 + $0xcb8] sm:$0xff] }
 0x1a8   : > { %1897 = vmatpush2.msra.mxu1 %v1324_v59  ;;  %1968 = vmatpush2.msra.mxu0 %v1326_v60  ;;  %v881_v59 = vld [vmem:[#allocation5 + $0xcc8] sm:$0xff]  ;;  %v878_v60 = vld [vmem:[#allocation5 + $0xcb0] sm:$0xff] }
 0x1a9   : > { %1898 = vmatprep.subr.mxu1 %v1295_v61  ;;  %1969 = vmatprep.subr.mxu0 %v1297_v62  ;;  %v880_v61 = vld [vmem:[#allocation5 + $0xcc0] sm:$0xff]  ;;  %v849_v62 = vld [vmem:[#allocation5 + $0xbc8] sm:$0xff] }
 0x1aa   : > { %1899 = vmatpush2.msra.mxu1 %v1294_v63  ;;  %1970 = vmatpush2.msra.mxu0 %v1296_v1  ;;  %v851_v63 = vld [vmem:[#allocation5 + $0xbd8] sm:$0xff]  ;;  %v848_v1 = vld [vmem:[#allocation5 + $0xbc0] sm:$0xff] }
 0x1ab   : > { %1900 = vmatprep.subr.mxu1 %v1265_v3  ;;  %1971 = vmatprep.subr.mxu0 %v1267_v4  ;;  %v850_v3 = vld [vmem:[#allocation5 + $0xbd0] sm:$0xff]  ;;  %v819_v4 = vld [vmem:[#allocation5 + $0xad8] sm:$0xff] }
 0x1ac   : > { %1901 = vmatpush2.msra.mxu1 %v1264_v5  ;;  %1972 = vmatpush2.msra.mxu0 %v1266_v6  ;;  %v821_v5 = vld [vmem:[#allocation5 + $0xae8] sm:$0xff]  ;;  %v818_v6 = vld [vmem:[#allocation5 + $0xad0] sm:$0xff] }
 0x1ad   : > { %1902 = vmatprep.subr.mxu1 %v1235_v7  ;;  %1973 = vmatprep.subr.mxu0 %v1237_v8  ;;  %v820_v7 = vld [vmem:[#allocation5 + $0xae0] sm:$0xff]  ;;  %v789_v8 = vld [vmem:[#allocation5 + $0x9e8] sm:$0xff] }
 0x1ae   : > { %1903 = vmatpush2.msra.mxu1 %v1234_v9  ;;  %1974 = vmatpush2.msra.mxu0 %v1236_v10  ;;  %v791_v9 = vld [vmem:[#allocation5 + $0x9f8] sm:$0xff]  ;;  %v788_v10 = vld [vmem:[#allocation5 + $0x9e0] sm:$0xff] }
 0x1af   : > { %1904 = vmatprep.subr.mxu1 %v1205_v11  ;;  %1975 = vmatprep.subr.mxu0 %v1207_v12  ;;  %v790_v11 = vld [vmem:[#allocation5 + $0x9f0] sm:$0xff]  ;;  %v759_v12 = vld [vmem:[#allocation5 + $0x8f8] sm:$0xff] }
 0x1b0   : > { %1905 = vmatpush2.msra.mxu1 %v1204_v14  ;;  %1976 = vmatpush2.msra.mxu0 %v1206_v15  ;;  %v761_v14 = vld [vmem:[#allocation5 + $0x908] sm:$0xff]  ;;  %v758_v15 = vld [vmem:[#allocation5 + $0x8f0] sm:$0xff] }
 0x1b1   : > { %1906 = vmatprep.subr.mxu1 %v1175_v16  ;;  %1977 = vmatprep.subr.mxu0 %v1177_v17  ;;  %v760_v16 = vld [vmem:[#allocation5 + $0x900] sm:$0xff]  ;;  %v729_v17 = vld [vmem:[#allocation5 + $0x808] sm:$0xff] }
 0x1b2   : > { %1907 = vmatpush2.msra.mxu1 %v1174_v18  ;;  %1978 = vmatpush2.msra.mxu0 %v1176_v21  ;;  %v731_v18 = vld [vmem:[#allocation5 + $0x818] sm:$0xff]  ;;  %v728_v21 = vld [vmem:[#allocation5 + $0x800] sm:$0xff] }
 0x1b3   : > { %1908 = vmatprep.subr.mxu1 %v1145_v22  ;;  %1979 = vmatprep.subr.mxu0 %v1147_v23  ;;  %v730_v22 = vld [vmem:[#allocation5 + $0x810] sm:$0xff]  ;;  %v699_v23 = vld [vmem:[#allocation5 + $0x718] sm:$0xff] }
 0x1b4   : > { %1909 = vmatpush2.msra.mxu1 %v1144_v24  ;;  %1980 = vmatpush2.msra.mxu0 %v1146_v25  ;;  %v701_v24 = vld [vmem:[#allocation5 + $0x728] sm:$0xff]  ;;  %v698_v25 = vld [vmem:[#allocation5 + $0x710] sm:$0xff] }
 0x1b5   : > { %1910 = vmatprep.subr.mxu1 %v1115_v26  ;;  %1981 = vmatprep.subr.mxu0 %v1117_v27  ;;  %v700_v26 = vld [vmem:[#allocation5 + $0x720] sm:$0xff]  ;;  %v669_v27 = vld [vmem:[#allocation5 + $0x628] sm:$0xff] }
 0x1b6   : > { %1911 = vmatpush2.msra.mxu1 %v1114_v28  ;;  %1982 = vmatpush2.msra.mxu0 %v1116_v29  ;;  %v671_v28 = vld [vmem:[#allocation5 + $0x638] sm:$0xff]  ;;  %v668_v29 = vld [vmem:[#allocation5 + $0x620] sm:$0xff] }
 0x1b7   : > { %1912 = vmatprep.subr.mxu1 %v1085_v30  ;;  %1983 = vmatprep.subr.mxu0 %v1087_v31  ;;  %v670_v30 = vld [vmem:[#allocation5 + $0x630] sm:$0xff]  ;;  %v639_v31 = vld [vmem:[#allocation5 + $0x538] sm:$0xff] }
 0x1b8   : > { %1913 = vmatpush2.msra.mxu1 %v1084_v32  ;;  %1984 = vmatpush2.msra.mxu0 %v1086_v33  ;;  %v641_v32 = vld [vmem:[#allocation5 + $0x548] sm:$0xff]  ;;  %v638_v33 = vld [vmem:[#allocation5 + $0x530] sm:$0xff] }
 0x1b9   : > { %1914 = vmatprep.subr.mxu1 %v1055_v34  ;;  %1985 = vmatprep.subr.mxu0 %v1057_v35  ;;  %v640_v34 = vld [vmem:[#allocation5 + $0x540] sm:$0xff]  ;;  %v609_v35 = vld [vmem:[#allocation5 + $0x448] sm:$0xff] }
 0x1ba   : > { %1915 = vmatpush2.msra.mxu1 %v1054_v36  ;;  %1986 = vmatpush2.msra.mxu0 %v1056_v37  ;;  %v611_v36 = vld [vmem:[#allocation5 + $0x458] sm:$0xff]  ;;  %v608_v37 = vld [vmem:[#allocation5 + $0x440] sm:$0xff] }
 0x1bb   : > { %1916 = vmatprep.subr.mxu1 %v1025_v38  ;;  %1987 = vmatprep.subr.mxu0 %v1027_v39  ;;  %v610_v38 = vld [vmem:[#allocation5 + $0x450] sm:$0xff]  ;;  %v579_v39 = vld [vmem:[#allocation5 + $0x358] sm:$0xff] }
 0x1bc   : > { %1917 = vmatpush2.msra.mxu1 %v1024_v40  ;;  %1988 = vmatpush2.msra.mxu0 %v1026_v41  ;;  %v581_v40 = vld [vmem:[#allocation5 + $0x368] sm:$0xff]  ;;  %v578_v41 = vld [vmem:[#allocation5 + $0x350] sm:$0xff] }
 0x1bd   : > { %1918 = vmatprep.subr.mxu1 %v995_v42  ;;  %1989 = vmatprep.subr.mxu0 %v997_v43  ;;  %v580_v42 = vld [vmem:[#allocation5 + $0x360] sm:$0xff]  ;;  %v549_v43 = vld [vmem:[#allocation5 + $0x268] sm:$0xff] }
 0x1be   : > { %1919 = vmatpush2.msra.mxu1 %v994_v44  ;;  %1990 = vmatpush2.msra.mxu0 %v996_v45  ;;  %v551_v44 = vld [vmem:[#allocation5 + $0x278] sm:$0xff]  ;;  %v548_v45 = vld [vmem:[#allocation5 + $0x260] sm:$0xff] }
 0x1bf   : > { %1920 = vmatprep.subr.mxu1 %v965_v46  ;;  %1991 = vmatprep.subr.mxu0 %v967_v47  ;;  %v550_v46 = vld [vmem:[#allocation5 + $0x270] sm:$0xff]  ;;  %v519_v47 = vld [vmem:[#allocation5 + $0x178] sm:$0xff] }
 0x1c0   : > { %1921 = vmatpush2.msra.mxu1 %v964_v48  ;;  %1992 = vmatpush2.msra.mxu0 %v966_v49  ;;  %v521_v48 = vld [vmem:[#allocation5 + $0x188] sm:$0xff]  ;;  %v518_v49 = vld [vmem:[#allocation5 + $0x170] sm:$0xff] }
 0x1c1   : > { %1923 = vmatmul.mubr.f32.vlgmr.msra.gmra.mxu1 %v4944_v19  ;;  %1994 = vmatmul.mubr.f32.vlgmr.msra.gmra.mxu0 %v4944_v19 }
 0x1c2   : > { %2000 = vmatprep.subr.mxu1 %v939_v50  ;;  %2071 = vmatprep.subr.mxu0 %v941_v51  ;;  %v520_v50 = vld [vmem:[#allocation5 + $0x180] sm:$0xff]  ;;  %v489_v51 = vld [vmem:[#allocation5 + $0x88] sm:$0xff] }
 0x1c3   : > { %2001 = vmatpush1.msra.mxu1 %v938_v52  ;;  %2064 = vmatprep.mubr.f32.mxu1 %v4946_v20  ;;  %v491_v52 = vld [vmem:[#allocation5 + $0x98] sm:$0xff] }
 0x1c4   : > { %2072 = vmatpush1.msra.mxu0 %v940_v53  ;;  %2135 = vmatprep.mubr.f32.mxu0 %v4946_v20  ;;  %v488_v53 = vld [vmem:[#allocation5 + $0x80] sm:$0xff] }
 0x1c5   : > { %2002 = vmatprep.subr.mxu1 %v909_v54  ;;  %2073 = vmatprep.subr.mxu0 %v911_v55  ;;  %v490_v54 = vld [vmem:[#allocation5 + $0x90] sm:$0xff]  ;;  %v1419_v55 = vld [vmem:[#allocation5 + $0x1d98] sm:$0xff] }
 0x1c6   : > { %2003 = vmatpush1.msra.mxu1 %v908_v56  ;;  %2074 = vmatpush1.msra.mxu0 %v910_v57  ;;  %v1421_v56 = vld [vmem:[#allocation5 + $0x1da8] sm:$0xff]  ;;  %v1418_v57 = vld [vmem:[#allocation5 + $0x1d90] sm:$0xff] }
 0x1c7   : > { %2004 = vmatprep.subr.mxu1 %v879_v58  ;;  %2075 = vmatprep.subr.mxu0 %v881_v59  ;;  %v1420_v58 = vld [vmem:[#allocation5 + $0x1da0] sm:$0xff]  ;;  %v1389_v59 = vld [vmem:[#allocation5 + $0x1ca8] sm:$0xff] }
 0x1c8   : > { %2005 = vmatpush1.msra.mxu1 %v878_v60  ;;  %2076 = vmatpush1.msra.mxu0 %v880_v61  ;;  %v1391_v60 = vld [vmem:[#allocation5 + $0x1cb8] sm:$0xff]  ;;  %v1388_v61 = vld [vmem:[#allocation5 + $0x1ca0] sm:$0xff] }
 0x1c9   : > { %2006 = vmatprep.subr.mxu1 %v849_v62  ;;  %2077 = vmatprep.subr.mxu0 %v851_v63  ;;  %v1390_v62 = vld [vmem:[#allocation5 + $0x1cb0] sm:$0xff]  ;;  %v1359_v63 = vld [vmem:[#allocation5 + $0x1bb8] sm:$0xff] }
 0x1ca   : > { %2007 = vmatpush1.msra.mxu1 %v848_v1  ;;  %2078 = vmatpush1.msra.mxu0 %v850_v3  ;;  %v1361_v1 = vld [vmem:[#allocation5 + $0x1bc8] sm:$0xff]  ;;  %v1358_v3 = vld [vmem:[#allocation5 + $0x1bb0] sm:$0xff] }
 0x1cb   : > { %2008 = vmatprep.subr.mxu1 %v819_v4  ;;  %2079 = vmatprep.subr.mxu0 %v821_v5  ;;  %v1360_v4 = vld [vmem:[#allocation5 + $0x1bc0] sm:$0xff]  ;;  %v1329_v5 = vld [vmem:[#allocation5 + $0x1ac8] sm:$0xff] }
 0x1cc   : > { %2009 = vmatpush1.msra.mxu1 %v818_v6  ;;  %2080 = vmatpush1.msra.mxu0 %v820_v7  ;;  %v1331_v6 = vld [vmem:[#allocation5 + $0x1ad8] sm:$0xff]  ;;  %v1328_v7 = vld [vmem:[#allocation5 + $0x1ac0] sm:$0xff] }
 0x1cd   : > { %2010 = vmatprep.subr.mxu1 %v789_v8  ;;  %2081 = vmatprep.subr.mxu0 %v791_v9  ;;  %v1330_v8 = vld [vmem:[#allocation5 + $0x1ad0] sm:$0xff]  ;;  %v1299_v9 = vld [vmem:[#allocation5 + $0x19d8] sm:$0xff] }
 0x1ce   : > { %2011 = vmatpush1.msra.mxu1 %v788_v10  ;;  %2082 = vmatpush1.msra.mxu0 %v790_v11  ;;  %v1301_v10 = vld [vmem:[#allocation5 + $0x19e8] sm:$0xff]  ;;  %v1298_v11 = vld [vmem:[#allocation5 + $0x19d0] sm:$0xff] }
 0x1cf   : > { %2012 = vmatprep.subr.mxu1 %v759_v12  ;;  %2083 = vmatprep.subr.mxu0 %v761_v14  ;;  %v1300_v12 = vld [vmem:[#allocation5 + $0x19e0] sm:$0xff]  ;;  %v1269_v14 = vld [vmem:[#allocation5 + $0x18e8] sm:$0xff] }
 0x1d0   : > { %2013 = vmatpush1.msra.mxu1 %v758_v15  ;;  %2084 = vmatpush1.msra.mxu0 %v760_v16  ;;  %v1271_v15 = vld [vmem:[#allocation5 + $0x18f8] sm:$0xff]  ;;  %v1268_v16 = vld [vmem:[#allocation5 + $0x18e0] sm:$0xff] }
 0x1d1   : > { %2014 = vmatprep.subr.mxu1 %v729_v17  ;;  %2085 = vmatprep.subr.mxu0 %v731_v18  ;;  %v1270_v17 = vld [vmem:[#allocation5 + $0x18f0] sm:$0xff]  ;;  %v1239_v18 = vld [vmem:[#allocation5 + $0x17f8] sm:$0xff] }
 0x1d2   : > { %2015 = vmatpush1.msra.mxu1 %v728_v21  ;;  %2086 = vmatpush1.msra.mxu0 %v730_v22  ;;  %v1241_v21 = vld [vmem:[#allocation5 + $0x1808] sm:$0xff]  ;;  %v1238_v22 = vld [vmem:[#allocation5 + $0x17f0] sm:$0xff] }
 0x1d3   : > { %2016 = vmatprep.subr.mxu1 %v699_v23  ;;  %2087 = vmatprep.subr.mxu0 %v701_v24  ;;  %v1240_v23 = vld [vmem:[#allocation5 + $0x1800] sm:$0xff]  ;;  %v1209_v24 = vld [vmem:[#allocation5 + $0x1708] sm:$0xff] }
 0x1d4   : > { %2017 = vmatpush1.msra.mxu1 %v698_v25  ;;  %2088 = vmatpush1.msra.mxu0 %v700_v26  ;;  %v1211_v25 = vld [vmem:[#allocation5 + $0x1718] sm:$0xff]  ;;  %v1208_v26 = vld [vmem:[#allocation5 + $0x1700] sm:$0xff] }
 0x1d5   : > { %2018 = vmatprep.subr.mxu1 %v669_v27  ;;  %2089 = vmatprep.subr.mxu0 %v671_v28  ;;  %v1210_v27 = vld [vmem:[#allocation5 + $0x1710] sm:$0xff]  ;;  %v1179_v28 = vld [vmem:[#allocation5 + $0x1618] sm:$0xff] }
 0x1d6   : > { %2019 = vmatpush1.msra.mxu1 %v668_v29  ;;  %2090 = vmatpush1.msra.mxu0 %v670_v30  ;;  %v1181_v29 = vld [vmem:[#allocation5 + $0x1628] sm:$0xff]  ;;  %v1178_v30 = vld [vmem:[#allocation5 + $0x1610] sm:$0xff] }
 0x1d7   : > { %2020 = vmatprep.subr.mxu1 %v639_v31  ;;  %2091 = vmatprep.subr.mxu0 %v641_v32  ;;  %v1180_v31 = vld [vmem:[#allocation5 + $0x1620] sm:$0xff]  ;;  %v1149_v32 = vld [vmem:[#allocation5 + $0x1528] sm:$0xff] }
 0x1d8   : > { %2021 = vmatpush1.msra.mxu1 %v638_v33  ;;  %2092 = vmatpush1.msra.mxu0 %v640_v34  ;;  %v1151_v33 = vld [vmem:[#allocation5 + $0x1538] sm:$0xff]  ;;  %v1148_v34 = vld [vmem:[#allocation5 + $0x1520] sm:$0xff] }
 0x1d9   : > { %2022 = vmatprep.subr.mxu1 %v609_v35  ;;  %2093 = vmatprep.subr.mxu0 %v611_v36  ;;  %v1150_v35 = vld [vmem:[#allocation5 + $0x1530] sm:$0xff]  ;;  %v1119_v36 = vld [vmem:[#allocation5 + $0x1438] sm:$0xff] }
 0x1da   : > { %2023 = vmatpush1.msra.mxu1 %v608_v37  ;;  %2094 = vmatpush1.msra.mxu0 %v610_v38  ;;  %v1121_v37 = vld [vmem:[#allocation5 + $0x1448] sm:$0xff]  ;;  %v1118_v38 = vld [vmem:[#allocation5 + $0x1430] sm:$0xff] }
 0x1db   : > { %2024 = vmatprep.subr.mxu1 %v579_v39  ;;  %2095 = vmatprep.subr.mxu0 %v581_v40  ;;  %v1120_v39 = vld [vmem:[#allocation5 + $0x1440] sm:$0xff]  ;;  %v1089_v40 = vld [vmem:[#allocation5 + $0x1348] sm:$0xff] }
 0x1dc   : > { %2025 = vmatpush1.msra.mxu1 %v578_v41  ;;  %2096 = vmatpush1.msra.mxu0 %v580_v42  ;;  %v1091_v41 = vld [vmem:[#allocation5 + $0x1358] sm:$0xff]  ;;  %v1088_v42 = vld [vmem:[#allocation5 + $0x1340] sm:$0xff] }
 0x1dd   : > { %2026 = vmatprep.subr.mxu1 %v549_v43  ;;  %2097 = vmatprep.subr.mxu0 %v551_v44  ;;  %v1090_v43 = vld [vmem:[#allocation5 + $0x1350] sm:$0xff]  ;;  %v1059_v44 = vld [vmem:[#allocation5 + $0x1258] sm:$0xff] }
 0x1de   : > { %2027 = vmatpush1.msra.mxu1 %v548_v45  ;;  %2098 = vmatpush1.msra.mxu0 %v550_v46  ;;  %v1061_v45 = vld [vmem:[#allocation5 + $0x1268] sm:$0xff]  ;;  %v1058_v46 = vld [vmem:[#allocation5 + $0x1250] sm:$0xff] }
 0x1df   : > { %2028 = vmatprep.subr.mxu1 %v519_v47  ;;  %2099 = vmatprep.subr.mxu0 %v521_v48  ;;  %v1060_v47 = vld [vmem:[#allocation5 + $0x1260] sm:$0xff]  ;;  %v1029_v48 = vld [vmem:[#allocation5 + $0x1168] sm:$0xff] }
 0x1e0   : > { %2029 = vmatpush1.msra.mxu1 %v518_v49  ;;  %2100 = vmatpush1.msra.mxu0 %v520_v50  ;;  %v1031_v49 = vld [vmem:[#allocation5 + $0x1178] sm:$0xff]  ;;  %v1028_v50 = vld [vmem:[#allocation5 + $0x1160] sm:$0xff] }
 0x1e1   : > { %2030 = vmatprep.subr.mxu1 %v489_v51  ;;  %2101 = vmatprep.subr.mxu0 %v491_v52  ;;  %v1030_v51 = vld [vmem:[#allocation5 + $0x1170] sm:$0xff]  ;;  %v999_v52 = vld [vmem:[#allocation5 + $0x1078] sm:$0xff] }
 0x1e2   : > { %2031 = vmatpush1.msra.mxu1 %v488_v53  ;;  %2102 = vmatpush1.msra.mxu0 %v490_v54  ;;  %v1001_v53 = vld [vmem:[#allocation5 + $0x1088] sm:$0xff]  ;;  %v998_v54 = vld [vmem:[#allocation5 + $0x1070] sm:$0xff] }
 0x1e3   : > { %2032 = vmatprep.subr.mxu1 %v1419_v55  ;;  %2103 = vmatprep.subr.mxu0 %v1421_v56  ;;  %v1000_v55 = vld [vmem:[#allocation5 + $0x1080] sm:$0xff]  ;;  %v969_v56 = vld [vmem:[#allocation5 + $0xf88] sm:$0xff] }
 0x1e4   : > { %2033 = vmatpush2.msra.mxu1 %v1418_v57  ;;  %2104 = vmatpush2.msra.mxu0 %v1420_v58  ;;  %v971_v57 = vld [vmem:[#allocation5 + $0xf98] sm:$0xff]  ;;  %v968_v58 = vld [vmem:[#allocation5 + $0xf80] sm:$0xff] }
 0x1e5   : > { %2034 = vmatprep.subr.mxu1 %v1389_v59  ;;  %2105 = vmatprep.subr.mxu0 %v1391_v60  ;;  %v970_v59 = vld [vmem:[#allocation5 + $0xf90] sm:$0xff]  ;;  %v943_v60 = vld [vmem:[#allocation5 + $0xeb8] sm:$0xff] }
 0x1e6   : > { %2035 = vmatpush2.msra.mxu1 %v1388_v61  ;;  %2106 = vmatpush2.msra.mxu0 %v1390_v62  ;;  %v945_v61 = vld [vmem:[#allocation5 + $0xec8] sm:$0xff]  ;;  %v942_v62 = vld [vmem:[#allocation5 + $0xeb0] sm:$0xff] }
 0x1e7   : > { %2036 = vmatprep.subr.mxu1 %v1359_v63  ;;  %2107 = vmatprep.subr.mxu0 %v1361_v1  ;;  %v944_v63 = vld [vmem:[#allocation5 + $0xec0] sm:$0xff]  ;;  %v913_v1 = vld [vmem:[#allocation5 + $0xdc8] sm:$0xff] }
 0x1e8   : > { %2037 = vmatpush2.msra.mxu1 %v1358_v3  ;;  %2108 = vmatpush2.msra.mxu0 %v1360_v4  ;;  %v915_v3 = vld [vmem:[#allocation5 + $0xdd8] sm:$0xff]  ;;  %v912_v4 = vld [vmem:[#allocation5 + $0xdc0] sm:$0xff] }
 0x1e9   : > { %2038 = vmatprep.subr.mxu1 %v1329_v5  ;;  %2109 = vmatprep.subr.mxu0 %v1331_v6  ;;  %v914_v5 = vld [vmem:[#allocation5 + $0xdd0] sm:$0xff]  ;;  %v883_v6 = vld [vmem:[#allocation5 + $0xcd8] sm:$0xff] }
 0x1ea   : > { %2039 = vmatpush2.msra.mxu1 %v1328_v7  ;;  %2110 = vmatpush2.msra.mxu0 %v1330_v8  ;;  %v885_v7 = vld [vmem:[#allocation5 + $0xce8] sm:$0xff]  ;;  %v882_v8 = vld [vmem:[#allocation5 + $0xcd0] sm:$0xff] }
 0x1eb   : > { %2040 = vmatprep.subr.mxu1 %v1299_v9  ;;  %2111 = vmatprep.subr.mxu0 %v1301_v10  ;;  %v884_v9 = vld [vmem:[#allocation5 + $0xce0] sm:$0xff]  ;;  %v853_v10 = vld [vmem:[#allocation5 + $0xbe8] sm:$0xff] }
 0x1ec   : > { %2041 = vmatpush2.msra.mxu1 %v1298_v11  ;;  %2112 = vmatpush2.msra.mxu0 %v1300_v12  ;;  %v855_v11 = vld [vmem:[#allocation5 + $0xbf8] sm:$0xff]  ;;  %v852_v12 = vld [vmem:[#allocation5 + $0xbe0] sm:$0xff] }
 0x1ed   : > { %2042 = vmatprep.subr.mxu1 %v1269_v14  ;;  %2113 = vmatprep.subr.mxu0 %v1271_v15  ;;  %v854_v14 = vld [vmem:[#allocation5 + $0xbf0] sm:$0xff]  ;;  %v823_v15 = vld [vmem:[#allocation5 + $0xaf8] sm:$0xff] }
 0x1ee   : > { %2043 = vmatpush2.msra.mxu1 %v1268_v16  ;;  %2114 = vmatpush2.msra.mxu0 %v1270_v17  ;;  %v825_v16 = vld [vmem:[#allocation5 + $0xb08] sm:$0xff]  ;;  %v822_v17 = vld [vmem:[#allocation5 + $0xaf0] sm:$0xff] }
 0x1ef   : > { %2044 = vmatprep.subr.mxu1 %v1239_v18  ;;  %2115 = vmatprep.subr.mxu0 %v1241_v21  ;;  %v824_v18 = vld [vmem:[#allocation5 + $0xb00] sm:$0xff]  ;;  %v793_v21 = vld [vmem:[#allocation5 + $0xa08] sm:$0xff] }
 0x1f0   : > { %2045 = vmatpush2.msra.mxu1 %v1238_v22  ;;  %2116 = vmatpush2.msra.mxu0 %v1240_v23  ;;  %v795_v22 = vld [vmem:[#allocation5 + $0xa18] sm:$0xff]  ;;  %v792_v23 = vld [vmem:[#allocation5 + $0xa00] sm:$0xff] }
 0x1f1   : > { %2046 = vmatprep.subr.mxu1 %v1209_v24  ;;  %2117 = vmatprep.subr.mxu0 %v1211_v25  ;;  %v794_v24 = vld [vmem:[#allocation5 + $0xa10] sm:$0xff]  ;;  %v763_v25 = vld [vmem:[#allocation5 + $0x918] sm:$0xff] }
 0x1f2   : > { %2047 = vmatpush2.msra.mxu1 %v1208_v26  ;;  %2118 = vmatpush2.msra.mxu0 %v1210_v27  ;;  %v765_v26 = vld [vmem:[#allocation5 + $0x928] sm:$0xff]  ;;  %v762_v27 = vld [vmem:[#allocation5 + $0x910] sm:$0xff] }
 0x1f3   : > { %2048 = vmatprep.subr.mxu1 %v1179_v28  ;;  %2119 = vmatprep.subr.mxu0 %v1181_v29  ;;  %v764_v28 = vld [vmem:[#allocation5 + $0x920] sm:$0xff]  ;;  %v733_v29 = vld [vmem:[#allocation5 + $0x828] sm:$0xff] }
 0x1f4   : > { %2049 = vmatpush2.msra.mxu1 %v1178_v30  ;;  %2120 = vmatpush2.msra.mxu0 %v1180_v31  ;;  %v735_v30 = vld [vmem:[#allocation5 + $0x838] sm:$0xff]  ;;  %v732_v31 = vld [vmem:[#allocation5 + $0x820] sm:$0xff] }
 0x1f5   : > { %2050 = vmatprep.subr.mxu1 %v1149_v32  ;;  %2121 = vmatprep.subr.mxu0 %v1151_v33  ;;  %v734_v32 = vld [vmem:[#allocation5 + $0x830] sm:$0xff]  ;;  %v703_v33 = vld [vmem:[#allocation5 + $0x738] sm:$0xff] }
 0x1f6   : > { %2051 = vmatpush2.msra.mxu1 %v1148_v34  ;;  %2122 = vmatpush2.msra.mxu0 %v1150_v35  ;;  %v705_v34 = vld [vmem:[#allocation5 + $0x748] sm:$0xff]  ;;  %v702_v35 = vld [vmem:[#allocation5 + $0x730] sm:$0xff] }
 0x1f7   : > { %2052 = vmatprep.subr.mxu1 %v1119_v36  ;;  %2123 = vmatprep.subr.mxu0 %v1121_v37  ;;  %v704_v36 = vld [vmem:[#allocation5 + $0x740] sm:$0xff]  ;;  %v673_v37 = vld [vmem:[#allocation5 + $0x648] sm:$0xff] }
 0x1f8   : > { %2053 = vmatpush2.msra.mxu1 %v1118_v38  ;;  %2124 = vmatpush2.msra.mxu0 %v1120_v39  ;;  %v675_v38 = vld [vmem:[#allocation5 + $0x658] sm:$0xff]  ;;  %v672_v39 = vld [vmem:[#allocation5 + $0x640] sm:$0xff] }
 0x1f9   : > { %2054 = vmatprep.subr.mxu1 %v1089_v40  ;;  %2125 = vmatprep.subr.mxu0 %v1091_v41  ;;  %v674_v40 = vld [vmem:[#allocation5 + $0x650] sm:$0xff]  ;;  %v643_v41 = vld [vmem:[#allocation5 + $0x558] sm:$0xff] }
 0x1fa   : > { %2055 = vmatpush2.msra.mxu1 %v1088_v42  ;;  %2126 = vmatpush2.msra.mxu0 %v1090_v43  ;;  %v645_v42 = vld [vmem:[#allocation5 + $0x568] sm:$0xff]  ;;  %v642_v43 = vld [vmem:[#allocation5 + $0x550] sm:$0xff] }
 0x1fb   : > { %2056 = vmatprep.subr.mxu1 %v1059_v44  ;;  %2127 = vmatprep.subr.mxu0 %v1061_v45  ;;  %v644_v44 = vld [vmem:[#allocation5 + $0x560] sm:$0xff]  ;;  %v613_v45 = vld [vmem:[#allocation5 + $0x468] sm:$0xff] }
 0x1fc   : > { %2057 = vmatpush2.msra.mxu1 %v1058_v46  ;;  %2128 = vmatpush2.msra.mxu0 %v1060_v47  ;;  %v615_v46 = vld [vmem:[#allocation5 + $0x478] sm:$0xff]  ;;  %v612_v47 = vld [vmem:[#allocation5 + $0x460] sm:$0xff] }
 0x1fd   : > { %2058 = vmatprep.subr.mxu1 %v1029_v48  ;;  %2129 = vmatprep.subr.mxu0 %v1031_v49  ;;  %v614_v48 = vld [vmem:[#allocation5 + $0x470] sm:$0xff]  ;;  %v583_v49 = vld [vmem:[#allocation5 + $0x378] sm:$0xff] }
 0x1fe   : > { %2059 = vmatpush2.msra.mxu1 %v1028_v50  ;;  %2130 = vmatpush2.msra.mxu0 %v1030_v51  ;;  %v585_v50 = vld [vmem:[#allocation5 + $0x388] sm:$0xff]  ;;  %v582_v51 = vld [vmem:[#allocation5 + $0x370] sm:$0xff] }
 0x1ff   : > { %2060 = vmatprep.subr.mxu1 %v999_v52  ;;  %2131 = vmatprep.subr.mxu0 %v1001_v53  ;;  %v584_v52 = vld [vmem:[#allocation5 + $0x380] sm:$0xff]  ;;  %v553_v53 = vld [vmem:[#allocation5 + $0x288] sm:$0xff] }
 0x200   : > { %2061 = vmatpush2.msra.mxu1 %v998_v54  ;;  %2132 = vmatpush2.msra.mxu0 %v1000_v55  ;;  %v555_v54 = vld [vmem:[#allocation5 + $0x298] sm:$0xff]  ;;  %v552_v55 = vld [vmem:[#allocation5 + $0x280] sm:$0xff] }
 0x201   : > { %2062 = vmatprep.subr.mxu1 %v969_v56  ;;  %2133 = vmatprep.subr.mxu0 %v971_v57  ;;  %v554_v56 = vld [vmem:[#allocation5 + $0x290] sm:$0xff]  ;;  %v523_v57 = vld [vmem:[#allocation5 + $0x198] sm:$0xff] }
 0x202   : > { %2063 = vmatpush2.msra.mxu1 %v968_v58  ;;  %2134 = vmatpush2.msra.mxu0 %v970_v59  ;;  %v525_v58 = vld [vmem:[#allocation5 + $0x1a8] sm:$0xff]  ;;  %v522_v59 = vld [vmem:[#allocation5 + $0x190] sm:$0xff] }
 0x203   : > { %2065 = vmatmul.mubr.f32.vlgmr.msra.gmra.mxu1 %v4944_v19  ;;  %2136 = vmatmul.mubr.f32.vlgmr.msra.gmra.mxu0 %v4944_v19 }
 0x204   : > { %2142 = vmatprep.subr.mxu1 %v943_v60  ;;  %2213 = vmatprep.subr.mxu0 %v945_v61  ;;  %v524_v60 = vld [vmem:[#allocation5 + $0x1a0] sm:$0xff]  ;;  %v493_v61 = vld [vmem:[#allocation5 + $0xa8] sm:$0xff] }
 0x205   : > { %2143 = vmatpush1.msra.mxu1 %v942_v62  ;;  %2206 = vmatprep.mubr.f32.mxu1 %v4946_v20  ;;  %v495_v62 = vld [vmem:[#allocation5 + $0xb8] sm:$0xff] }
 0x206   : > { %2214 = vmatpush1.msra.mxu0 %v944_v63  ;;  %2277 = vmatprep.mubr.f32.mxu0 %v4946_v20  ;;  %v492_v63 = vld [vmem:[#allocation5 + $0xa0] sm:$0xff] }
 0x207   : > { %2144 = vmatprep.subr.mxu1 %v913_v1  ;;  %2215 = vmatprep.subr.mxu0 %v915_v3  ;;  %v494_v1 = vld [vmem:[#allocation5 + $0xb0] sm:$0xff]  ;;  %v1423_v3 = vld [vmem:[#allocation5 + $0x1db8] sm:$0xff] }
 0x208   : > { %2145 = vmatpush1.msra.mxu1 %v912_v4  ;;  %2216 = vmatpush1.msra.mxu0 %v914_v5  ;;  %v1425_v4 = vld [vmem:[#allocation5 + $0x1dc8] sm:$0xff]  ;;  %v1422_v5 = vld [vmem:[#allocation5 + $0x1db0] sm:$0xff] }
 0x209   : > { %2146 = vmatprep.subr.mxu1 %v883_v6  ;;  %2217 = vmatprep.subr.mxu0 %v885_v7  ;;  %v1424_v6 = vld [vmem:[#allocation5 + $0x1dc0] sm:$0xff]  ;;  %v1393_v7 = vld [vmem:[#allocation5 + $0x1cc8] sm:$0xff] }
 0x20a   : > { %2147 = vmatpush1.msra.mxu1 %v882_v8  ;;  %2218 = vmatpush1.msra.mxu0 %v884_v9  ;;  %v1395_v8 = vld [vmem:[#allocation5 + $0x1cd8] sm:$0xff]  ;;  %v1392_v9 = vld [vmem:[#allocation5 + $0x1cc0] sm:$0xff] }
 0x20b   : > { %2148 = vmatprep.subr.mxu1 %v853_v10  ;;  %2219 = vmatprep.subr.mxu0 %v855_v11  ;;  %v1394_v10 = vld [vmem:[#allocation5 + $0x1cd0] sm:$0xff]  ;;  %v1363_v11 = vld [vmem:[#allocation5 + $0x1bd8] sm:$0xff] }
 0x20c   : > { %2149 = vmatpush1.msra.mxu1 %v852_v12  ;;  %2220 = vmatpush1.msra.mxu0 %v854_v14  ;;  %v1365_v12 = vld [vmem:[#allocation5 + $0x1be8] sm:$0xff]  ;;  %v1362_v14 = vld [vmem:[#allocation5 + $0x1bd0] sm:$0xff] }
 0x20d   : > { %2150 = vmatprep.subr.mxu1 %v823_v15  ;;  %2221 = vmatprep.subr.mxu0 %v825_v16  ;;  %v1364_v15 = vld [vmem:[#allocation5 + $0x1be0] sm:$0xff]  ;;  %v1333_v16 = vld [vmem:[#allocation5 + $0x1ae8] sm:$0xff] }
 0x20e   : > { %2151 = vmatpush1.msra.mxu1 %v822_v17  ;;  %2222 = vmatpush1.msra.mxu0 %v824_v18  ;;  %v1335_v17 = vld [vmem:[#allocation5 + $0x1af8] sm:$0xff]  ;;  %v1332_v18 = vld [vmem:[#allocation5 + $0x1ae0] sm:$0xff] }
 0x20f   : > { %2152 = vmatprep.subr.mxu1 %v793_v21  ;;  %2223 = vmatprep.subr.mxu0 %v795_v22  ;;  %v1334_v21 = vld [vmem:[#allocation5 + $0x1af0] sm:$0xff]  ;;  %v1303_v22 = vld [vmem:[#allocation5 + $0x19f8] sm:$0xff] }
 0x210   : > { %2153 = vmatpush1.msra.mxu1 %v792_v23  ;;  %2224 = vmatpush1.msra.mxu0 %v794_v24  ;;  %v1305_v23 = vld [vmem:[#allocation5 + $0x1a08] sm:$0xff]  ;;  %v1302_v24 = vld [vmem:[#allocation5 + $0x19f0] sm:$0xff] }
 0x211   : > { %2154 = vmatprep.subr.mxu1 %v763_v25  ;;  %2225 = vmatprep.subr.mxu0 %v765_v26  ;;  %v1304_v25 = vld [vmem:[#allocation5 + $0x1a00] sm:$0xff]  ;;  %v1273_v26 = vld [vmem:[#allocation5 + $0x1908] sm:$0xff] }
 0x212   : > { %2155 = vmatpush1.msra.mxu1 %v762_v27  ;;  %2226 = vmatpush1.msra.mxu0 %v764_v28  ;;  %v1275_v27 = vld [vmem:[#allocation5 + $0x1918] sm:$0xff]  ;;  %v1272_v28 = vld [vmem:[#allocation5 + $0x1900] sm:$0xff] }
 0x213   : > { %2156 = vmatprep.subr.mxu1 %v733_v29  ;;  %2227 = vmatprep.subr.mxu0 %v735_v30  ;;  %v1274_v29 = vld [vmem:[#allocation5 + $0x1910] sm:$0xff]  ;;  %v1243_v30 = vld [vmem:[#allocation5 + $0x1818] sm:$0xff] }
 0x214   : > { %2157 = vmatpush1.msra.mxu1 %v732_v31  ;;  %2228 = vmatpush1.msra.mxu0 %v734_v32  ;;  %v1245_v31 = vld [vmem:[#allocation5 + $0x1828] sm:$0xff]  ;;  %v1242_v32 = vld [vmem:[#allocation5 + $0x1810] sm:$0xff] }
 0x215   : > { %2158 = vmatprep.subr.mxu1 %v703_v33  ;;  %2229 = vmatprep.subr.mxu0 %v705_v34  ;;  %v1244_v33 = vld [vmem:[#allocation5 + $0x1820] sm:$0xff]  ;;  %v1213_v34 = vld [vmem:[#allocation5 + $0x1728] sm:$0xff] }
 0x216   : > { %2159 = vmatpush1.msra.mxu1 %v702_v35  ;;  %2230 = vmatpush1.msra.mxu0 %v704_v36  ;;  %v1215_v35 = vld [vmem:[#allocation5 + $0x1738] sm:$0xff]  ;;  %v1212_v36 = vld [vmem:[#allocation5 + $0x1720] sm:$0xff] }
 0x217   : > { %2160 = vmatprep.subr.mxu1 %v673_v37  ;;  %2231 = vmatprep.subr.mxu0 %v675_v38  ;;  %v1214_v37 = vld [vmem:[#allocation5 + $0x1730] sm:$0xff]  ;;  %v1183_v38 = vld [vmem:[#allocation5 + $0x1638] sm:$0xff] }
 0x218   : > { %2161 = vmatpush1.msra.mxu1 %v672_v39  ;;  %2232 = vmatpush1.msra.mxu0 %v674_v40  ;;  %v1185_v39 = vld [vmem:[#allocation5 + $0x1648] sm:$0xff]  ;;  %v1182_v40 = vld [vmem:[#allocation5 + $0x1630] sm:$0xff] }
 0x219   : > { %2162 = vmatprep.subr.mxu1 %v643_v41  ;;  %2233 = vmatprep.subr.mxu0 %v645_v42  ;;  %v1184_v41 = vld [vmem:[#allocation5 + $0x1640] sm:$0xff]  ;;  %v1153_v42 = vld [vmem:[#allocation5 + $0x1548] sm:$0xff] }
 0x21a   : > { %2163 = vmatpush1.msra.mxu1 %v642_v43  ;;  %2234 = vmatpush1.msra.mxu0 %v644_v44  ;;  %v1155_v43 = vld [vmem:[#allocation5 + $0x1558] sm:$0xff]  ;;  %v1152_v44 = vld [vmem:[#allocation5 + $0x1540] sm:$0xff] }
 0x21b   : > { %2164 = vmatprep.subr.mxu1 %v613_v45  ;;  %2235 = vmatprep.subr.mxu0 %v615_v46  ;;  %v1154_v45 = vld [vmem:[#allocation5 + $0x1550] sm:$0xff]  ;;  %v1123_v46 = vld [vmem:[#allocation5 + $0x1458] sm:$0xff] }
 0x21c   : > { %2165 = vmatpush1.msra.mxu1 %v612_v47  ;;  %2236 = vmatpush1.msra.mxu0 %v614_v48  ;;  %v1125_v47 = vld [vmem:[#allocation5 + $0x1468] sm:$0xff]  ;;  %v1122_v48 = vld [vmem:[#allocation5 + $0x1450] sm:$0xff] }
 0x21d   : > { %2166 = vmatprep.subr.mxu1 %v583_v49  ;;  %2237 = vmatprep.subr.mxu0 %v585_v50  ;;  %v1124_v49 = vld [vmem:[#allocation5 + $0x1460] sm:$0xff]  ;;  %v1093_v50 = vld [vmem:[#allocation5 + $0x1368] sm:$0xff] }
 0x21e   : > { %2167 = vmatpush1.msra.mxu1 %v582_v51  ;;  %2238 = vmatpush1.msra.mxu0 %v584_v52  ;;  %v1095_v51 = vld [vmem:[#allocation5 + $0x1378] sm:$0xff]  ;;  %v1092_v52 = vld [vmem:[#allocation5 + $0x1360] sm:$0xff] }
 0x21f   : > { %2168 = vmatprep.subr.mxu1 %v553_v53  ;;  %2239 = vmatprep.subr.mxu0 %v555_v54  ;;  %v1094_v53 = vld [vmem:[#allocation5 + $0x1370] sm:$0xff]  ;;  %v1063_v54 = vld [vmem:[#allocation5 + $0x1278] sm:$0xff] }
 0x220   : > { %2169 = vmatpush1.msra.mxu1 %v552_v55  ;;  %2240 = vmatpush1.msra.mxu0 %v554_v56  ;;  %v1065_v55 = vld [vmem:[#allocation5 + $0x1288] sm:$0xff]  ;;  %v1062_v56 = vld [vmem:[#allocation5 + $0x1270] sm:$0xff] }
 0x221   : > { %2170 = vmatprep.subr.mxu1 %v523_v57  ;;  %2241 = vmatprep.subr.mxu0 %v525_v58  ;;  %v1064_v57 = vld [vmem:[#allocation5 + $0x1280] sm:$0xff]  ;;  %v1033_v58 = vld [vmem:[#allocation5 + $0x1188] sm:$0xff] }
 0x222   : > { %2171 = vmatpush1.msra.mxu1 %v522_v59  ;;  %2242 = vmatpush1.msra.mxu0 %v524_v60  ;;  %v1035_v59 = vld [vmem:[#allocation5 + $0x1198] sm:$0xff]  ;;  %v1032_v60 = vld [vmem:[#allocation5 + $0x1180] sm:$0xff] }
 0x223   : > { %2172 = vmatprep.subr.mxu1 %v493_v61  ;;  %2243 = vmatprep.subr.mxu0 %v495_v62  ;;  %v1034_v61 = vld [vmem:[#allocation5 + $0x1190] sm:$0xff]  ;;  %v1003_v62 = vld [vmem:[#allocation5 + $0x1098] sm:$0xff] }
 0x224   : > { %2173 = vmatpush1.msra.mxu1 %v492_v63  ;;  %2244 = vmatpush1.msra.mxu0 %v494_v1  ;;  %v1005_v63 = vld [vmem:[#allocation5 + $0x10a8] sm:$0xff]  ;;  %v1002_v1 = vld [vmem:[#allocation5 + $0x1090] sm:$0xff] }
 0x225   : > { %2174 = vmatprep.subr.mxu1 %v1423_v3  ;;  %2245 = vmatprep.subr.mxu0 %v1425_v4  ;;  %v1004_v3 = vld [vmem:[#allocation5 + $0x10a0] sm:$0xff]  ;;  %v973_v4 = vld [vmem:[#allocation5 + $0xfa8] sm:$0xff] }
 0x226   : > { %2175 = vmatpush2.msra.mxu1 %v1422_v5  ;;  %2246 = vmatpush2.msra.mxu0 %v1424_v6  ;;  %v975_v5 = vld [vmem:[#allocation5 + $0xfb8] sm:$0xff]  ;;  %v972_v6 = vld [vmem:[#allocation5 + $0xfa0] sm:$0xff] }
 0x227   : > { %2176 = vmatprep.subr.mxu1 %v1393_v7  ;;  %2247 = vmatprep.subr.mxu0 %v1395_v8  ;;  %v974_v7 = vld [vmem:[#allocation5 + $0xfb0] sm:$0xff]  ;;  %v947_v8 = vld [vmem:[#allocation5 + $0xed8] sm:$0xff] }
 0x228   : > { %2177 = vmatpush2.msra.mxu1 %v1392_v9  ;;  %2248 = vmatpush2.msra.mxu0 %v1394_v10  ;;  %v949_v9 = vld [vmem:[#allocation5 + $0xee8] sm:$0xff]  ;;  %v946_v10 = vld [vmem:[#allocation5 + $0xed0] sm:$0xff] }
 0x229   : > { %2178 = vmatprep.subr.mxu1 %v1363_v11  ;;  %2249 = vmatprep.subr.mxu0 %v1365_v12  ;;  %v948_v11 = vld [vmem:[#allocation5 + $0xee0] sm:$0xff]  ;;  %v917_v12 = vld [vmem:[#allocation5 + $0xde8] sm:$0xff] }
 0x22a   : > { %2179 = vmatpush2.msra.mxu1 %v1362_v14  ;;  %2250 = vmatpush2.msra.mxu0 %v1364_v15  ;;  %v919_v14 = vld [vmem:[#allocation5 + $0xdf8] sm:$0xff]  ;;  %v916_v15 = vld [vmem:[#allocation5 + $0xde0] sm:$0xff] }
 0x22b   : > { %2180 = vmatprep.subr.mxu1 %v1333_v16  ;;  %2251 = vmatprep.subr.mxu0 %v1335_v17  ;;  %v918_v16 = vld [vmem:[#allocation5 + $0xdf0] sm:$0xff]  ;;  %v887_v17 = vld [vmem:[#allocation5 + $0xcf8] sm:$0xff] }
 0x22c   : > { %2181 = vmatpush2.msra.mxu1 %v1332_v18  ;;  %2252 = vmatpush2.msra.mxu0 %v1334_v21  ;;  %v889_v18 = vld [vmem:[#allocation5 + $0xd08] sm:$0xff]  ;;  %v886_v21 = vld [vmem:[#allocation5 + $0xcf0] sm:$0xff] }
 0x22d   : > { %2182 = vmatprep.subr.mxu1 %v1303_v22  ;;  %2253 = vmatprep.subr.mxu0 %v1305_v23  ;;  %v888_v22 = vld [vmem:[#allocation5 + $0xd00] sm:$0xff]  ;;  %v857_v23 = vld [vmem:[#allocation5 + $0xc08] sm:$0xff] }
 0x22e   : > { %2183 = vmatpush2.msra.mxu1 %v1302_v24  ;;  %2254 = vmatpush2.msra.mxu0 %v1304_v25  ;;  %v859_v24 = vld [vmem:[#allocation5 + $0xc18] sm:$0xff]  ;;  %v856_v25 = vld [vmem:[#allocation5 + $0xc00] sm:$0xff] }
 0x22f   : > { %2184 = vmatprep.subr.mxu1 %v1273_v26  ;;  %2255 = vmatprep.subr.mxu0 %v1275_v27  ;;  %v858_v26 = vld [vmem:[#allocation5 + $0xc10] sm:$0xff]  ;;  %v827_v27 = vld [vmem:[#allocation5 + $0xb18] sm:$0xff] }
 0x230   : > { %2185 = vmatpush2.msra.mxu1 %v1272_v28  ;;  %2256 = vmatpush2.msra.mxu0 %v1274_v29  ;;  %v829_v28 = vld [vmem:[#allocation5 + $0xb28] sm:$0xff]  ;;  %v826_v29 = vld [vmem:[#allocation5 + $0xb10] sm:$0xff] }
 0x231   : > { %2186 = vmatprep.subr.mxu1 %v1243_v30  ;;  %2257 = vmatprep.subr.mxu0 %v1245_v31  ;;  %v828_v30 = vld [vmem:[#allocation5 + $0xb20] sm:$0xff]  ;;  %v797_v31 = vld [vmem:[#allocation5 + $0xa28] sm:$0xff] }
 0x232   : > { %2187 = vmatpush2.msra.mxu1 %v1242_v32  ;;  %2258 = vmatpush2.msra.mxu0 %v1244_v33  ;;  %v799_v32 = vld [vmem:[#allocation5 + $0xa38] sm:$0xff]  ;;  %v796_v33 = vld [vmem:[#allocation5 + $0xa20] sm:$0xff] }
 0x233   : > { %2188 = vmatprep.subr.mxu1 %v1213_v34  ;;  %2259 = vmatprep.subr.mxu0 %v1215_v35  ;;  %v798_v34 = vld [vmem:[#allocation5 + $0xa30] sm:$0xff]  ;;  %v767_v35 = vld [vmem:[#allocation5 + $0x938] sm:$0xff] }
 0x234   : > { %2189 = vmatpush2.msra.mxu1 %v1212_v36  ;;  %2260 = vmatpush2.msra.mxu0 %v1214_v37  ;;  %v769_v36 = vld [vmem:[#allocation5 + $0x948] sm:$0xff]  ;;  %v766_v37 = vld [vmem:[#allocation5 + $0x930] sm:$0xff] }
 0x235   : > { %2190 = vmatprep.subr.mxu1 %v1183_v38  ;;  %2261 = vmatprep.subr.mxu0 %v1185_v39  ;;  %v768_v38 = vld [vmem:[#allocation5 + $0x940] sm:$0xff]  ;;  %v737_v39 = vld [vmem:[#allocation5 + $0x848] sm:$0xff] }
 0x236   : > { %2191 = vmatpush2.msra.mxu1 %v1182_v40  ;;  %2262 = vmatpush2.msra.mxu0 %v1184_v41  ;;  %v739_v40 = vld [vmem:[#allocation5 + $0x858] sm:$0xff]  ;;  %v736_v41 = vld [vmem:[#allocation5 + $0x840] sm:$0xff] }
 0x237   : > { %2192 = vmatprep.subr.mxu1 %v1153_v42  ;;  %2263 = vmatprep.subr.mxu0 %v1155_v43  ;;  %v738_v42 = vld [vmem:[#allocation5 + $0x850] sm:$0xff]  ;;  %v707_v43 = vld [vmem:[#allocation5 + $0x758] sm:$0xff] }
 0x238   : > { %2193 = vmatpush2.msra.mxu1 %v1152_v44  ;;  %2264 = vmatpush2.msra.mxu0 %v1154_v45  ;;  %v709_v44 = vld [vmem:[#allocation5 + $0x768] sm:$0xff]  ;;  %v706_v45 = vld [vmem:[#allocation5 + $0x750] sm:$0xff] }
 0x239   : > { %2194 = vmatprep.subr.mxu1 %v1123_v46  ;;  %2265 = vmatprep.subr.mxu0 %v1125_v47  ;;  %v708_v46 = vld [vmem:[#allocation5 + $0x760] sm:$0xff]  ;;  %v677_v47 = vld [vmem:[#allocation5 + $0x668] sm:$0xff] }
 0x23a   : > { %2195 = vmatpush2.msra.mxu1 %v1122_v48  ;;  %2266 = vmatpush2.msra.mxu0 %v1124_v49  ;;  %v679_v48 = vld [vmem:[#allocation5 + $0x678] sm:$0xff]  ;;  %v676_v49 = vld [vmem:[#allocation5 + $0x660] sm:$0xff] }
 0x23b   : > { %2196 = vmatprep.subr.mxu1 %v1093_v50  ;;  %2267 = vmatprep.subr.mxu0 %v1095_v51  ;;  %v678_v50 = vld [vmem:[#allocation5 + $0x670] sm:$0xff]  ;;  %v647_v51 = vld [vmem:[#allocation5 + $0x578] sm:$0xff] }
 0x23c   : > { %2197 = vmatpush2.msra.mxu1 %v1092_v52  ;;  %2268 = vmatpush2.msra.mxu0 %v1094_v53  ;;  %v649_v52 = vld [vmem:[#allocation5 + $0x588] sm:$0xff]  ;;  %v646_v53 = vld [vmem:[#allocation5 + $0x570] sm:$0xff] }
 0x23d   : > { %2198 = vmatprep.subr.mxu1 %v1063_v54  ;;  %2269 = vmatprep.subr.mxu0 %v1065_v55  ;;  %v648_v54 = vld [vmem:[#allocation5 + $0x580] sm:$0xff]  ;;  %v617_v55 = vld [vmem:[#allocation5 + $0x488] sm:$0xff] }
 0x23e   : > { %2199 = vmatpush2.msra.mxu1 %v1062_v56  ;;  %2270 = vmatpush2.msra.mxu0 %v1064_v57  ;;  %v619_v56 = vld [vmem:[#allocation5 + $0x498] sm:$0xff]  ;;  %v616_v57 = vld [vmem:[#allocation5 + $0x480] sm:$0xff] }
 0x23f   : > { %2200 = vmatprep.subr.mxu1 %v1033_v58  ;;  %2271 = vmatprep.subr.mxu0 %v1035_v59  ;;  %v618_v58 = vld [vmem:[#allocation5 + $0x490] sm:$0xff]  ;;  %v587_v59 = vld [vmem:[#allocation5 + $0x398] sm:$0xff] }
 0x240   : > { %2201 = vmatpush2.msra.mxu1 %v1032_v60  ;;  %2272 = vmatpush2.msra.mxu0 %v1034_v61  ;;  %v589_v60 = vld [vmem:[#allocation5 + $0x3a8] sm:$0xff]  ;;  %v586_v61 = vld [vmem:[#allocation5 + $0x390] sm:$0xff] }
 0x241   : > { %2202 = vmatprep.subr.mxu1 %v1003_v62  ;;  %2273 = vmatprep.subr.mxu0 %v1005_v63  ;;  %v588_v62 = vld [vmem:[#allocation5 + $0x3a0] sm:$0xff]  ;;  %v557_v63 = vld [vmem:[#allocation5 + $0x2a8] sm:$0xff] }
 0x242   : > { %2203 = vmatpush2.msra.mxu1 %v1002_v1  ;;  %2274 = vmatpush2.msra.mxu0 %v1004_v3  ;;  %v559_v1 = vld [vmem:[#allocation5 + $0x2b8] sm:$0xff]  ;;  %v556_v3 = vld [vmem:[#allocation5 + $0x2a0] sm:$0xff] }
 0x243   : > { %2204 = vmatprep.subr.mxu1 %v973_v4  ;;  %2275 = vmatprep.subr.mxu0 %v975_v5  ;;  %v558_v4 = vld [vmem:[#allocation5 + $0x2b0] sm:$0xff]  ;;  %v527_v5 = vld [vmem:[#allocation5 + $0x1b8] sm:$0xff] }
 0x244   : > { %2205 = vmatpush2.msra.mxu1 %v972_v6  ;;  %2276 = vmatpush2.msra.mxu0 %v974_v7  ;;  %v529_v6 = vld [vmem:[#allocation5 + $0x1c8] sm:$0xff]  ;;  %v526_v7 = vld [vmem:[#allocation5 + $0x1b0] sm:$0xff] }
 0x245   : > { %2207 = vmatmul.mubr.f32.vlgmr.msra.gmra.mxu1 %v4944_v19  ;;  %2278 = vmatmul.mubr.f32.vlgmr.msra.gmra.mxu0 %v4944_v19 }
 0x246   : > { %2284 = vmatprep.subr.mxu1 %v947_v8  ;;  %2355 = vmatprep.subr.mxu0 %v949_v9  ;;  %v528_v8 = vld [vmem:[#allocation5 + $0x1c0] sm:$0xff]  ;;  %v497_v9 = vld [vmem:[#allocation5 + $0xc8] sm:$0xff] }
 0x247   : > { %2285 = vmatpush1.msra.mxu1 %v946_v10  ;;  %2348 = vmatprep.mubr.f32.mxu1 %v4946_v20  ;;  %v499_v10 = vld [vmem:[#allocation5 + $0xd8] sm:$0xff] }
 0x248   : > { %2356 = vmatpush1.msra.mxu0 %v948_v11  ;;  %2419 = vmatprep.mubr.f32.mxu0 %v4946_v20  ;;  %v496_v11 = vld [vmem:[#allocation5 + $0xc0] sm:$0xff] }
 0x249   : > { %2286 = vmatprep.subr.mxu1 %v917_v12  ;;  %2357 = vmatprep.subr.mxu0 %v919_v14  ;;  %v498_v12 = vld [vmem:[#allocation5 + $0xd0] sm:$0xff]  ;;  %v1427_v14 = vld [vmem:[#allocation5 + $0x1dd8] sm:$0xff] }
 0x24a   : > { %2287 = vmatpush1.msra.mxu1 %v916_v15  ;;  %2358 = vmatpush1.msra.mxu0 %v918_v16  ;;  %v1429_v15 = vld [vmem:[#allocation5 + $0x1de8] sm:$0xff]  ;;  %v1426_v16 = vld [vmem:[#allocation5 + $0x1dd0] sm:$0xff] }
 0x24b   : > { %2288 = vmatprep.subr.mxu1 %v887_v17  ;;  %2359 = vmatprep.subr.mxu0 %v889_v18  ;;  %v1428_v17 = vld [vmem:[#allocation5 + $0x1de0] sm:$0xff]  ;;  %v1397_v18 = vld [vmem:[#allocation5 + $0x1ce8] sm:$0xff] }
 0x24c   : > { %2289 = vmatpush1.msra.mxu1 %v886_v21  ;;  %2360 = vmatpush1.msra.mxu0 %v888_v22  ;;  %v1399_v21 = vld [vmem:[#allocation5 + $0x1cf8] sm:$0xff]  ;;  %v1396_v22 = vld [vmem:[#allocation5 + $0x1ce0] sm:$0xff] }
 0x24d   : > { %2290 = vmatprep.subr.mxu1 %v857_v23  ;;  %2361 = vmatprep.subr.mxu0 %v859_v24  ;;  %v1398_v23 = vld [vmem:[#allocation5 + $0x1cf0] sm:$0xff]  ;;  %v1367_v24 = vld [vmem:[#allocation5 + $0x1bf8] sm:$0xff] }
 0x24e   : > { %2291 = vmatpush1.msra.mxu1 %v856_v25  ;;  %2362 = vmatpush1.msra.mxu0 %v858_v26  ;;  %v1369_v25 = vld [vmem:[#allocation5 + $0x1c08] sm:$0xff]  ;;  %v1366_v26 = vld [vmem:[#allocation5 + $0x1bf0] sm:$0xff] }
 0x24f   : > { %2292 = vmatprep.subr.mxu1 %v827_v27  ;;  %2363 = vmatprep.subr.mxu0 %v829_v28  ;;  %v1368_v27 = vld [vmem:[#allocation5 + $0x1c00] sm:$0xff]  ;;  %v1337_v28 = vld [vmem:[#allocation5 + $0x1b08] sm:$0xff] }
 0x250   : > { %2293 = vmatpush1.msra.mxu1 %v826_v29  ;;  %2364 = vmatpush1.msra.mxu0 %v828_v30  ;;  %v1339_v29 = vld [vmem:[#allocation5 + $0x1b18] sm:$0xff]  ;;  %v1336_v30 = vld [vmem:[#allocation5 + $0x1b00] sm:$0xff] }
 0x251   : > { %2294 = vmatprep.subr.mxu1 %v797_v31  ;;  %2365 = vmatprep.subr.mxu0 %v799_v32  ;;  %v1338_v31 = vld [vmem:[#allocation5 + $0x1b10] sm:$0xff]  ;;  %v1307_v32 = vld [vmem:[#allocation5 + $0x1a18] sm:$0xff] }
 0x252   : > { %2295 = vmatpush1.msra.mxu1 %v796_v33  ;;  %2366 = vmatpush1.msra.mxu0 %v798_v34  ;;  %v1309_v33 = vld [vmem:[#allocation5 + $0x1a28] sm:$0xff]  ;;  %v1306_v34 = vld [vmem:[#allocation5 + $0x1a10] sm:$0xff] }
 0x253   : > { %2296 = vmatprep.subr.mxu1 %v767_v35  ;;  %2367 = vmatprep.subr.mxu0 %v769_v36  ;;  %v1308_v35 = vld [vmem:[#allocation5 + $0x1a20] sm:$0xff]  ;;  %v1277_v36 = vld [vmem:[#allocation5 + $0x1928] sm:$0xff] }
 0x254   : > { %2297 = vmatpush1.msra.mxu1 %v766_v37  ;;  %2368 = vmatpush1.msra.mxu0 %v768_v38  ;;  %v1279_v37 = vld [vmem:[#allocation5 + $0x1938] sm:$0xff]  ;;  %v1276_v38 = vld [vmem:[#allocation5 + $0x1920] sm:$0xff] }
 0x255   : > { %2298 = vmatprep.subr.mxu1 %v737_v39  ;;  %2369 = vmatprep.subr.mxu0 %v739_v40  ;;  %v1278_v39 = vld [vmem:[#allocation5 + $0x1930] sm:$0xff]  ;;  %v1247_v40 = vld [vmem:[#allocation5 + $0x1838] sm:$0xff] }
 0x256   : > { %2299 = vmatpush1.msra.mxu1 %v736_v41  ;;  %2370 = vmatpush1.msra.mxu0 %v738_v42  ;;  %v1249_v41 = vld [vmem:[#allocation5 + $0x1848] sm:$0xff]  ;;  %v1246_v42 = vld [vmem:[#allocation5 + $0x1830] sm:$0xff] }
 0x257   : > { %2300 = vmatprep.subr.mxu1 %v707_v43  ;;  %2371 = vmatprep.subr.mxu0 %v709_v44  ;;  %v1248_v43 = vld [vmem:[#allocation5 + $0x1840] sm:$0xff]  ;;  %v1217_v44 = vld [vmem:[#allocation5 + $0x1748] sm:$0xff] }
 0x258   : > { %2301 = vmatpush1.msra.mxu1 %v706_v45  ;;  %2372 = vmatpush1.msra.mxu0 %v708_v46  ;;  %v1219_v45 = vld [vmem:[#allocation5 + $0x1758] sm:$0xff]  ;;  %v1216_v46 = vld [vmem:[#allocation5 + $0x1740] sm:$0xff] }
 0x259   : > { %2302 = vmatprep.subr.mxu1 %v677_v47  ;;  %2373 = vmatprep.subr.mxu0 %v679_v48  ;;  %v1218_v47 = vld [vmem:[#allocation5 + $0x1750] sm:$0xff]  ;;  %v1187_v48 = vld [vmem:[#allocation5 + $0x1658] sm:$0xff] }
 0x25a   : > { %2303 = vmatpush1.msra.mxu1 %v676_v49  ;;  %2374 = vmatpush1.msra.mxu0 %v678_v50  ;;  %v1189_v49 = vld [vmem:[#allocation5 + $0x1668] sm:$0xff]  ;;  %v1186_v50 = vld [vmem:[#allocation5 + $0x1650] sm:$0xff] }
 0x25b   : > { %2304 = vmatprep.subr.mxu1 %v647_v51  ;;  %2375 = vmatprep.subr.mxu0 %v649_v52  ;;  %v1188_v51 = vld [vmem:[#allocation5 + $0x1660] sm:$0xff]  ;;  %v1157_v52 = vld [vmem:[#allocation5 + $0x1568] sm:$0xff] }
 0x25c   : > { %2305 = vmatpush1.msra.mxu1 %v646_v53  ;;  %2376 = vmatpush1.msra.mxu0 %v648_v54  ;;  %v1159_v53 = vld [vmem:[#allocation5 + $0x1578] sm:$0xff]  ;;  %v1156_v54 = vld [vmem:[#allocation5 + $0x1560] sm:$0xff] }
 0x25d   : > { %2306 = vmatprep.subr.mxu1 %v617_v55  ;;  %2377 = vmatprep.subr.mxu0 %v619_v56  ;;  %v1158_v55 = vld [vmem:[#allocation5 + $0x1570] sm:$0xff]  ;;  %v1127_v56 = vld [vmem:[#allocation5 + $0x1478] sm:$0xff] }
 0x25e   : > { %2307 = vmatpush1.msra.mxu1 %v616_v57  ;;  %2378 = vmatpush1.msra.mxu0 %v618_v58  ;;  %v1129_v57 = vld [vmem:[#allocation5 + $0x1488] sm:$0xff]  ;;  %v1126_v58 = vld [vmem:[#allocation5 + $0x1470] sm:$0xff] }
 0x25f   : > { %2308 = vmatprep.subr.mxu1 %v587_v59  ;;  %2379 = vmatprep.subr.mxu0 %v589_v60  ;;  %v1128_v59 = vld [vmem:[#allocation5 + $0x1480] sm:$0xff]  ;;  %v1097_v60 = vld [vmem:[#allocation5 + $0x1388] sm:$0xff] }
 0x260   : > { %2309 = vmatpush1.msra.mxu1 %v586_v61  ;;  %2380 = vmatpush1.msra.mxu0 %v588_v62  ;;  %v1099_v61 = vld [vmem:[#allocation5 + $0x1398] sm:$0xff]  ;;  %v1096_v62 = vld [vmem:[#allocation5 + $0x1380] sm:$0xff] }
 0x261   : > { %2310 = vmatprep.subr.mxu1 %v557_v63  ;;  %2381 = vmatprep.subr.mxu0 %v559_v1  ;;  %v1098_v63 = vld [vmem:[#allocation5 + $0x1390] sm:$0xff]  ;;  %v1067_v1 = vld [vmem:[#allocation5 + $0x1298] sm:$0xff] }
 0x262   : > { %2311 = vmatpush1.msra.mxu1 %v556_v3  ;;  %2382 = vmatpush1.msra.mxu0 %v558_v4  ;;  %v1069_v3 = vld [vmem:[#allocation5 + $0x12a8] sm:$0xff]  ;;  %v1066_v4 = vld [vmem:[#allocation5 + $0x1290] sm:$0xff] }
 0x263   : > { %2312 = vmatprep.subr.mxu1 %v527_v5  ;;  %2383 = vmatprep.subr.mxu0 %v529_v6  ;;  %v1068_v5 = vld [vmem:[#allocation5 + $0x12a0] sm:$0xff]  ;;  %v1037_v6 = vld [vmem:[#allocation5 + $0x11a8] sm:$0xff] }
 0x264   : > { %2313 = vmatpush1.msra.mxu1 %v526_v7  ;;  %2384 = vmatpush1.msra.mxu0 %v528_v8  ;;  %v1039_v7 = vld [vmem:[#allocation5 + $0x11b8] sm:$0xff]  ;;  %v1036_v8 = vld [vmem:[#allocation5 + $0x11a0] sm:$0xff] }
 0x265   : > { %2314 = vmatprep.subr.mxu1 %v497_v9  ;;  %2385 = vmatprep.subr.mxu0 %v499_v10  ;;  %v1038_v9 = vld [vmem:[#allocation5 + $0x11b0] sm:$0xff]  ;;  %v1007_v10 = vld [vmem:[#allocation5 + $0x10b8] sm:$0xff] }
 0x266   : > { %2315 = vmatpush1.msra.mxu1 %v496_v11  ;;  %2386 = vmatpush1.msra.mxu0 %v498_v12  ;;  %v1009_v11 = vld [vmem:[#allocation5 + $0x10c8] sm:$0xff]  ;;  %v1006_v12 = vld [vmem:[#allocation5 + $0x10b0] sm:$0xff] }
 0x267   : > { %2316 = vmatprep.subr.mxu1 %v1427_v14  ;;  %2387 = vmatprep.subr.mxu0 %v1429_v15  ;;  %v1008_v14 = vld [vmem:[#allocation5 + $0x10c0] sm:$0xff]  ;;  %v977_v15 = vld [vmem:[#allocation5 + $0xfc8] sm:$0xff] }
 0x268   : > { %2317 = vmatpush2.msra.mxu1 %v1426_v16  ;;  %2388 = vmatpush2.msra.mxu0 %v1428_v17  ;;  %v979_v16 = vld [vmem:[#allocation5 + $0xfd8] sm:$0xff]  ;;  %v976_v17 = vld [vmem:[#allocation5 + $0xfc0] sm:$0xff] }
 0x269   : > { %2318 = vmatprep.subr.mxu1 %v1397_v18  ;;  %2389 = vmatprep.subr.mxu0 %v1399_v21  ;;  %v978_v18 = vld [vmem:[#allocation5 + $0xfd0] sm:$0xff]  ;;  %v951_v21 = vld [vmem:[#allocation5 + $0xef8] sm:$0xff] }
 0x26a   : > { %2319 = vmatpush2.msra.mxu1 %v1396_v22  ;;  %2390 = vmatpush2.msra.mxu0 %v1398_v23  ;;  %v950_v22 = vld [vmem:[#allocation5 + $0xef0] sm:$0xff]  ;;  %v921_v23 = vld [vmem:[#allocation5 + $0xe08] sm:$0xff] }
 0x26b   : > { %2320 = vmatprep.subr.mxu1 %v1367_v24  ;;  %2391 = vmatprep.subr.mxu0 %v1369_v25  ;;  %v920_v24 = vld [vmem:[#allocation5 + $0xe00] sm:$0xff]  ;;  %v891_v25 = vld [vmem:[#allocation5 + $0xd18] sm:$0xff] }
 0x26c   : > { %2321 = vmatpush2.msra.mxu1 %v1366_v26  ;;  %2392 = vmatpush2.msra.mxu0 %v1368_v27  ;;  %v890_v26 = vld [vmem:[#allocation5 + $0xd10] sm:$0xff]  ;;  %v861_v27 = vld [vmem:[#allocation5 + $0xc28] sm:$0xff] }
 0x26d   : > { %2322 = vmatprep.subr.mxu1 %v1337_v28  ;;  %2393 = vmatprep.subr.mxu0 %v1339_v29  ;;  %v860_v28 = vld [vmem:[#allocation5 + $0xc20] sm:$0xff]  ;;  %v2699_v29 = vld [vmem:[%s5832_s7] sm:$0xf] }
 0x26e   : > { %2323 = vmatpush2.msra.mxu1 %v1336_v30  ;;  %2394 = vmatpush2.msra.mxu0 %v1338_v31  ;;  %v831_v30 = vld [vmem:[#allocation5 + $0xb38] sm:$0xff]  ;;  %v801_v31 = vld [vmem:[#allocation5 + $0xa48] sm:$0xff] }
 0x26f   : > { %2324 = vmatprep.subr.mxu1 %v1307_v32  ;;  %2395 = vmatprep.subr.mxu0 %v1309_v33  ;;  %v800_v32 = vld [vmem:[#allocation5 + $0xa40] sm:$0xff]  ;;  %v771_v33 = vld [vmem:[#allocation5 + $0x958] sm:$0xff] }
 0x270   : > { %2325 = vmatpush2.msra.mxu1 %v1306_v34  ;;  %2396 = vmatpush2.msra.mxu0 %v1308_v35  ;;  %v770_v34 = vld [vmem:[#allocation5 + $0x950] sm:$0xff]  ;;  %v741_v35 = vld [vmem:[#allocation5 + $0x868] sm:$0xff] }
 0x271   : > { %2326 = vmatprep.subr.mxu1 %v1277_v36  ;;  %2397 = vmatprep.subr.mxu0 %v1279_v37  ;;  %v740_v36 = vld [vmem:[#allocation5 + $0x860] sm:$0xff]  ;;  %v711_v37 = vld [vmem:[#allocation5 + $0x778] sm:$0xff] }
 0x272   : > { %2327 = vmatpush2.msra.mxu1 %v1276_v38  ;;  %2398 = vmatpush2.msra.mxu0 %v1278_v39  ;;  %v710_v38 = vld [vmem:[#allocation5 + $0x770] sm:$0xff]  ;;  %v681_v39 = vld [vmem:[#allocation5 + $0x688] sm:$0xff] }
 0x273   : > { %2328 = vmatprep.subr.mxu1 %v1247_v40  ;;  %2399 = vmatprep.subr.mxu0 %v1249_v41  ;;  %v680_v40 = vld [vmem:[#allocation5 + $0x680] sm:$0xff]  ;;  %v651_v41 = vld [vmem:[#allocation5 + $0x598] sm:$0xff] }
 0x274   : > { %2329 = vmatpush2.msra.mxu1 %v1246_v42  ;;  %2400 = vmatpush2.msra.mxu0 %v1248_v43  ;;  %v650_v42 = vld [vmem:[#allocation5 + $0x590] sm:$0xff]  ;;  %v621_v43 = vld [vmem:[#allocation5 + $0x4a8] sm:$0xff] }
 0x275   : > { %2330 = vmatprep.subr.mxu1 %v1217_v44  ;;  %2401 = vmatprep.subr.mxu0 %v1219_v45  ;;  %v620_v44 = vld [vmem:[#allocation5 + $0x4a0] sm:$0xff]  ;;  %v591_v45 = vld [vmem:[#allocation5 + $0x3b8] sm:$0xff] }
 0x276   : > { %2331 = vmatpush2.msra.mxu1 %v1216_v46  ;;  %2402 = vmatpush2.msra.mxu0 %v1218_v47  ;;  %v590_v46 = vld [vmem:[#allocation5 + $0x3b0] sm:$0xff]  ;;  %v561_v47 = vld [vmem:[#allocation5 + $0x2c8] sm:$0xff] }
 0x277   : > { %2332 = vmatprep.subr.mxu1 %v1187_v48  ;;  %2403 = vmatprep.subr.mxu0 %v1189_v49  ;;  %v560_v48 = vld [vmem:[#allocation5 + $0x2c0] sm:$0xff]  ;;  %v531_v49 = vld [vmem:[#allocation5 + $0x1d8] sm:$0xff] }
 0x278   : > { %2333 = vmatpush2.msra.mxu1 %v1186_v50  ;;  %2404 = vmatpush2.msra.mxu0 %v1188_v51  ;;  %v530_v50 = vld [vmem:[#allocation5 + $0x1d0] sm:$0xff]  ;;  %v501_v51 = vld [vmem:[#allocation5 + $0xe8] sm:$0xff] }
 0x279   : > { %2334 = vmatprep.subr.mxu1 %v1157_v52  ;;  %2405 = vmatprep.subr.mxu0 %v1159_v53  ;;  %v500_v52 = vld [vmem:[#allocation5 + $0xe0] sm:$0xff]  ;;  %v1431_v53 = vld [vmem:[#allocation5 + $0x1df8] sm:$0xff] }
 0x27a   : > { %2335 = vmatpush2.msra.mxu1 %v1156_v54  ;;  %2406 = vmatpush2.msra.mxu0 %v1158_v55  ;;  %v1430_v54 = vld [vmem:[#allocation5 + $0x1df0] sm:$0xff]  ;;  %v1401_v55 = vld [vmem:[#allocation5 + $0x1d08] sm:$0xff] }
 0x27b   : > { %2336 = vmatprep.subr.mxu1 %v1127_v56  ;;  %2407 = vmatprep.subr.mxu0 %v1129_v57  ;;  %v1400_v56 = vld [vmem:[#allocation5 + $0x1d00] sm:$0xff]  ;;  %v1371_v57 = vld [vmem:[#allocation5 + $0x1c18] sm:$0xff] }
 0x27c   : > { %2337 = vmatpush2.msra.mxu1 %v1126_v58  ;;  %2408 = vmatpush2.msra.mxu0 %v1128_v59  ;;  %v1370_v58 = vld [vmem:[#allocation5 + $0x1c10] sm:$0xff]  ;;  %v1341_v59 = vld [vmem:[#allocation5 + $0x1b28] sm:$0xff] }
 0x27d   : > { %2338 = vmatprep.subr.mxu1 %v1097_v60  ;;  %2409 = vmatprep.subr.mxu0 %v1099_v61  ;;  %v1340_v60 = vld [vmem:[#allocation5 + $0x1b20] sm:$0xff]  ;;  %v1311_v61 = vld [vmem:[#allocation5 + $0x1a38] sm:$0xff] }
 0x27e   : > { %2339 = vmatpush2.msra.mxu1 %v1096_v62  ;;  %2410 = vmatpush2.msra.mxu0 %v1098_v63  ;;  %v1310_v62 = vld [vmem:[#allocation5 + $0x1a30] sm:$0xff]  ;;  %v1281_v63 = vld [vmem:[#allocation5 + $0x1948] sm:$0xff] }
 0x27f   : > { %2340 = vmatprep.subr.mxu1 %v1067_v1  ;;  %2411 = vmatprep.subr.mxu0 %v1069_v3  ;;  %v1280_v1 = vld [vmem:[#allocation5 + $0x1940] sm:$0xff]  ;;  %v1251_v3 = vld [vmem:[#allocation5 + $0x1858] sm:$0xff] }
 0x280   : > { %2341 = vmatpush2.msra.mxu1 %v1066_v4  ;;  %2412 = vmatpush2.msra.mxu0 %v1068_v5  ;;  %v1250_v4 = vld [vmem:[#allocation5 + $0x1850] sm:$0xff]  ;;  %v1221_v5 = vld [vmem:[#allocation5 + $0x1768] sm:$0xff] }
 0x281   : > { %2342 = vmatprep.subr.mxu1 %v1037_v6  ;;  %2413 = vmatprep.subr.mxu0 %v1039_v7  ;;  %v1220_v6 = vld [vmem:[#allocation5 + $0x1760] sm:$0xff]  ;;  %v1191_v7 = vld [vmem:[#allocation5 + $0x1678] sm:$0xff] }
 0x282   : > { %2343 = vmatpush2.msra.mxu1 %v1036_v8  ;;  %2414 = vmatpush2.msra.mxu0 %v1038_v9  ;;  %v1190_v8 = vld [vmem:[#allocation5 + $0x1670] sm:$0xff]  ;;  %v1161_v9 = vld [vmem:[#allocation5 + $0x1588] sm:$0xff] }
 0x283   : > { %2344 = vmatprep.subr.mxu1 %v1007_v10  ;;  %2415 = vmatprep.subr.mxu0 %v1009_v11  ;;  %v1160_v10 = vld [vmem:[#allocation5 + $0x1580] sm:$0xff]  ;;  %v1131_v11 = vld [vmem:[#allocation5 + $0x1498] sm:$0xff] }
 0x284   : > { %2345 = vmatpush2.msra.mxu1 %v1006_v12  ;;  %2416 = vmatpush2.msra.mxu0 %v1008_v14  ;;  %v1130_v12 = vld [vmem:[#allocation5 + $0x1490] sm:$0xff]  ;;  %v1101_v14 = vld [vmem:[#allocation5 + $0x13a8] sm:$0xff] }
 0x285   : > { %2346 = vmatprep.subr.mxu1 %v977_v15  ;;  %2417 = vmatprep.subr.mxu0 %v979_v16  ;;  %v1100_v15 = vld [vmem:[#allocation5 + $0x13a0] sm:$0xff]  ;;  %v1071_v16 = vld [vmem:[#allocation5 + $0x12b8] sm:$0xff] }
 0x286   : > { %2347 = vmatpush2.msra.mxu1 %v976_v17  ;;  %2418 = vmatpush2.msra.mxu0 %v978_v18  ;;  %v1070_v17 = vld [vmem:[#allocation5 + $0x12b0] sm:$0xff]  ;;  %v1041_v18 = vld [vmem:[#allocation5 + $0x11c8] sm:$0xff] }
 0x287   : > { %2349 = vmatmul.mubr.f32.vlgmr.msra.gmra.mxu1 %v4944_v19  ;;  %2420 = vmatmul.mubr.f32.vlgmr.msra.gmra.mxu0 %v4944_v19 }
 0x288   : > { %2426 = vmatprep.subr.mxu1 %v951_v21  ;;  %2490 = vmatprep.mubr.f32.mxu1 %v4946_v20  ;;  %v830_v20 = vld [vmem:[#allocation5 + $0xb30] sm:$0xff]  ;;  %v1040_v21 = vld [vmem:[#allocation5 + $0x11c0] sm:$0xff] }
 0x289   : > { %2427 = vmatpush1.msra.mxu1 %v950_v22  ;;  %2792 = vmatprep.mubr.f32.mxu0 %v4809_v0  ;;  %v1011_v22 = vld [vmem:[#allocation5 + $0x10d8] sm:$0xff] }
 0x28a   : > { %2428 = vmatprep.subr.mxu1 %v921_v23  ;;  %2702 = vperm.xlu1 %4624, %v2699_v29   ;;  %v1010_v23 = vld [vmem:[#allocation5 + $0x10d0] sm:$0xff]  ;;  %v1569_v29 = vpop.f32.mrf.mxu0 }
 0x28b   : > { %2429 = vmatpush1.msra.mxu1 %v920_v24  ;;  %v981_v24 = vld [vmem:[#allocation5 + $0xfe8] sm:$0xff] }
 0x28c   : > { %2430 = vmatprep.subr.mxu1 %v891_v25  ;;  %v980_v25 = vld [vmem:[#allocation5 + $0xfe0] sm:$0xff] }
 0x28d   : > { %2431 = vmatpush1.msra.mxu1 %v890_v26  ;;  %v1498_v26 = vpop.f32.mrf.mxu1 }
 0x28e   : > { %2432 = vmatprep.subr.mxu1 %v861_v27 }
 0x28f   : > { %2433 = vmatpush1.msra.mxu1 %v860_v28  ;;  %v1500_v27 = vpop.f32.mrf.mxu1 }
 0x290   : > { %2434 = vmatprep.subr.mxu1 %v831_v30 }
 0x291   : > { %2435 = vmatpush1.msra.mxu1 %v830_v20  ;;  %v1640_v28 = vpop.f32.mrf.mxu1  ;;  %v1571_v20 = vpop.f32.mrf.mxu0 }
 0x292   : > { %2436 = vmatprep.subr.mxu1 %v801_v31 }
 0x293   : > { %2437 = vmatpush1.msra.mxu1 %v800_v32  ;;  %v1642_v30 = vpop.f32.mrf.mxu1  ;;  %v1711_v32 = vpop.f32.mrf.mxu0 }
 0x294   : > { %2438 = vmatprep.subr.mxu1 %v771_v33 }
 0x295   : > { %2439 = vmatpush1.msra.mxu1 %v770_v34  ;;  %v1782_v31 = vpop.f32.mrf.mxu1  ;;  %v1713_v34 = vpop.f32.mrf.mxu0 }
 0x296   : > { %2440 = vmatprep.subr.mxu1 %v741_v35 }
 0x297   : > { %2441 = vmatpush1.msra.mxu1 %v740_v36  ;;  %v1784_v33 = vpop.f32.mrf.mxu1  ;;  %v1853_v36 = vpop.f32.mrf.mxu0 }
 0x298   : > { %2442 = vmatprep.subr.mxu1 %v711_v37 }
 0x299   : > { %2443 = vmatpush1.msra.mxu1 %v710_v38  ;;  %v1924_v35 = vpop.f32.mrf.mxu1  ;;  %v2500_v38 = vld [vmem:[%s5829_s4 + $0x8] sm:$0xf] }
 0x29a   : > { %2444 = vmatprep.subr.mxu1 %v681_v39  ;;  %v2503_v39 = vcombine.low %v1498_v26, %v1500_v27 }
 0x29b   : > { %2445 = vmatpush1.msra.mxu1 %v680_v40  ;;  %v1926_v37 = vpop.f32.mrf.mxu1  ;;  %v1855_v40 = vpop.f32.mrf.mxu0 }
 0x29c   : > { %2446 = vmatprep.subr.mxu1 %v651_v41 }
 0x29d   : > { %2447 = vmatpush1.msra.mxu1 %v650_v42  ;;  %v2514_v42 = vcombine.low %v1571_v20, %v1640_v28  ;;  %v4279_v20 = vld [vmem:[%s5829_s4 + $0x48] sm:$0xff] }
 0x29e   : > { %2448 = vmatprep.subr.mxu1 %v621_v43  ;;  %v4270_v43 = vld [vmem:[%s5829_s4 + $0x14] sm:$0xf] }
 0x29f   : > { %2449 = vmatpush1.msra.mxu1 %v620_v44  ;;  %v2506_v44 = vmul.f32 %v2500_v38, %v1569_v29  ;;  %v4282_v38 = vld [vmem:[%s5829_s4 + $0x5c] sm:$0xf] }
 0x2a0   : > { %2450 = vmatprep.subr.mxu1 %v591_v45  ;;  %v4269_v45 = vld [vmem:[%s5829_s4 + $0xc] sm:$0xff] }
 0x2a1   : > { %2451 = vmatpush1.msra.mxu1 %v590_v46  ;;  %v1995_v46 = vpop.f32.mrf.mxu0 }
 0x2a2   : > { %2452 = vmatprep.subr.mxu1 %v561_v47  ;;  %v2498_v47 = vld [vmem:[%s5830_s5 + $0x8] sm:$0xf] }
 0x2a3   : > { %2453 = vmatpush1.msra.mxu1 %v560_v48 }
 0x2a4   : > { %2454 = vmatprep.subr.mxu1 %v531_v49  ;;  %v4272_v49 = vld [vmem:[%s5829_s4 + $0x20] sm:$0xf] }
 0x2a5   : > { %2455 = vmatpush1.msra.mxu1 %v530_v50  ;;  %v2497_v50 = vld [vmem:[%s5830_s5] sm:$0xff] }
 0x2a6   : > { %2456 = vmatprep.subr.mxu1 %v501_v51  ;;  %v2517_v51 = vmul.f32 %v4270_v43, %v1642_v30  ;;  %v4284_v43 = vld [vmem:[%s5829_s4 + $0x68] sm:$0xf] }
 0x2a7   : > { %2457 = vmatpush1.msra.mxu1 %v500_v52 }
 0x2a8   : > { %2458 = vmatprep.subr.mxu1 %v1431_v53  ;;  %v2516_v53 = vmul.f32 %v4269_v45, %v2514_v42 }
 0x2a9   : > { %2459 = vmatpush2.msra.mxu1 %v1430_v54  ;;  %v2525_v54 = vcombine.low %v1711_v32, %v1713_v34 }
 0x2aa   : > { %2460 = vmatprep.subr.mxu1 %v1401_v55  ;;  %v2508_v55 = vadd.f32 %v2506_v44, %v2498_v47  ;;  %v4283_v44 = vld [vmem:[%s5829_s4 + $0x60] sm:$0xff] }
 0x2ab   : > { %2461 = vmatpush2.msra.mxu1 %v1400_v56  ;;  %v4271_v56 = vld [vmem:[%s5829_s4 + $0x18] sm:$0xff] }
 0x2ac   : > { %2462 = vmatprep.subr.mxu1 %v1371_v57  ;;  %v2528_v57 = vmul.f32 %v4272_v49, %v1782_v31 }
 0x2ad   : > { %2463 = vmatpush2.msra.mxu1 %v1370_v58  ;;  %v1997_v58 = vpop.f32.mrf.mxu0 }
 0x2ae   : > { %2464 = vmatprep.subr.mxu1 %v1341_v59 }
 0x2af   : > { %2465 = vmatpush2.msra.mxu1 %v1340_v60 }
 0x2b0   : > { %2466 = vmatprep.subr.mxu1 %v1311_v61  ;;  %v2536_v61 = vcombine.low %v1784_v33, %v1853_v36  ;;  %v4281_v36 = vld [vmem:[%s5829_s4 + $0x54] sm:$0xff] }
 0x2b1   : > { %2467 = vmatpush2.msra.mxu1 %v1310_v62  ;;  %v4274_v62 = vld [vmem:[%s5829_s4 + $0x2c] sm:$0xf] }
 0x2b2   : > { %2468 = vmatprep.subr.mxu1 %v1281_v63  ;;  %v2519_v63 = vadd.f32 %v2517_v51, %v2508_v55 }
 0x2b3   : > { %2469 = vmatpush2.msra.mxu1 %v1280_v1  ;;  %v4273_v1 = vld [vmem:[%s5829_s4 + $0x24] sm:$0xff] }
 0x2b4   : > { %2470 = vmatprep.subr.mxu1 %v1251_v3 }
 0x2b5   : > { %2471 = vmatpush2.msra.mxu1 %v1250_v4 }
 0x2b6   : > { %2472 = vmatprep.subr.mxu1 %v1221_v5  ;;  %v2527_v5 = vmul.f32 %v4271_v56, %v2525_v54  ;;  %v4286_v54 = vld [vmem:[%s5829_s4 + $0x74] sm:$0xf] }
 0x2b7   : > { %2473 = vmatpush2.msra.mxu1 %v1220_v6  ;;  %v2547_v6 = vcombine.low %v1924_v35, %v1926_v37 }
 0x2b8   : > { %2474 = vmatprep.subr.mxu1 %v1191_v7  ;;  %v2530_v7 = vadd.f32 %v2528_v57, %v2519_v63 }
 0x2b9   : > { %2475 = vmatpush2.msra.mxu1 %v1190_v8  ;;  %v2539_v8 = vmul.f32 %v4274_v62, %v1855_v40 }
 0x2ba   : > { %2476 = vmatprep.subr.mxu1 %v1161_v9  ;;  %v4276_v9 = vld [vmem:[%s5829_s4 + $0x38] sm:$0xf] }
 0x2bb   : > { %2477 = vmatpush2.msra.mxu1 %v1160_v10  ;;  %v4275_v10 = vld [vmem:[%s5829_s4 + $0x30] sm:$0xff] }
 0x2bc   : > { %2478 = vmatprep.subr.mxu1 %v1131_v11 }
 0x2bd   : > { %2479 = vmatpush2.msra.mxu1 %v1130_v12  ;;  %v2538_v12 = vmul.f32 %v4273_v1, %v2536_v61 }
 0x2be   : > { %2480 = vmatprep.subr.mxu1 %v1101_v14 }
 0x2bf   : > { %2481 = vmatpush2.msra.mxu1 %v1100_v15  ;;  %v4277_v15 = vld [vmem:[%s5829_s4 + $0x3c] sm:$0xff] }
 0x2c0   : > { %2482 = vmatprep.subr.mxu1 %v1071_v16  ;;  %v4278_v16 = vld [vmem:[%s5829_s4 + $0x44] sm:$0xf] }
 0x2c1   : > { %2483 = vmatpush2.msra.mxu1 %v1070_v17 }
 0x2c2   : > { %2484 = vmatprep.subr.mxu1 %v1041_v18 }
 0x2c3   : > { %2485 = vmatpush2.msra.mxu1 %v1040_v21  ;;  %v2066_v41 = vpop.f32.mrf.mxu1  ;;  %v2137_v3 = vpop.f32.mrf.mxu0 }
 0x2c4   : > { %2486 = vmatprep.subr.mxu1 %v1011_v22  ;;  %v2558_v14 = vcombine.low %v1997_v58, %v2066_v41  ;;  %v2550_v22 = vmul.f32 %v4276_v9, %v1995_v46 }
 0x2c5   : > { %2487 = vmatpush2.msra.mxu1 %v1010_v23  ;;  %v2068_v52 = vpop.f32.mrf.mxu1  ;;  %v2139_v17 = vpop.f32.mrf.mxu0  ;;  %v2549_v23 = vmul.f32 %v4275_v10, %v2547_v6 }
 0x2c6   : > { %2488 = vmatprep.subr.mxu1 %v981_v24  ;;  %v2541_v24 = vadd.f32 %v2539_v8, %v2530_v7  ;;  %v2560_v28 = vmul.f32 %v4277_v15, %v2558_v14  ;;  %v2561_v29 = vmul.f32 %v4278_v16, %v2068_v52  ;;  %v2569_v30 = vcombine.low %v2137_v3, %v2139_v17 }
 0x2c7   : > { %2489 = vmatpush2.msra.mxu1 %v980_v25  ;;  %v4280_v25 = vld [vmem:[%s5829_s4 + $0x50] sm:$0xf] }
 0x2c8   : > { %2491 = vmatmul.mubr.f32.vlgmr.msra.gmra.mxu1 %v4944_v19  ;;  %v2499_v19 = vld [vmem:[%s5829_s4] sm:$0xff]  ;;  %v2552_v32 = vadd.f32 %v2550_v22, %v2541_v24  ;;  %v2571_v40 = vmul.f32 %v4279_v20, %v2569_v30 }
 0x2c9   : > { %v2505_v48 = vmul.f32 %v2503_v39, %v2499_v19 }
 0x2ca   : > { %v2563_v19 = vadd.f32 %v2561_v29, %v2552_v32 }
 0x2cb   : > { %v2507_v60 = vadd.f32 %v2505_v48, %v2497_v50 }
 0x2cd   : > { %v2518_v4 = vadd.f32 %v2516_v53, %v2507_v60  ;;  %v4285_v53 = vld [vmem:[%s5829_s4 + $0x6c] sm:$0xff] }
 0x2cf   : > { %v2529_v21 = vadd.f32 %v2527_v5, %v2518_v4 }
 0x2d1   : > { %v2540_v27 = vadd.f32 %v2538_v12, %v2529_v21 }
 0x2d3   : > { %v2551_v33 = vadd.f32 %v2549_v23, %v2540_v27 }
 0x2d5   : > { %v2562_v39 = vadd.f32 %v2560_v28, %v2551_v33 }
 0x2d7   : > { %v2573_v48 = vadd.f32 %v2571_v40, %v2562_v39 }
 0x305   : > { %v2208_v59 = vpop.f32.mrf.mxu1  ;;  %v2279_v26 = vpop.f32.mrf.mxu0 }
 0x306   : > { %v2572_v34 = vmul.f32 %v4280_v25, %v2208_v59 }
 0x307   : > { %v2210_v11 = vpop.f32.mrf.mxu1  ;;  %v2281_v37 = vpop.f32.mrf.mxu0 }
 0x308   : > { %v2580_v35 = vcombine.low %v2210_v11, %v2279_v26  ;;  %v2574_v45 = vadd.f32 %v2572_v34, %v2563_v19  ;;  %v2583_v47 = vmul.f32 %v4282_v38, %v2281_v37 }
 0x30a   : > { %v2582_v46 = vmul.f32 %v4281_v36, %v2580_v35  ;;  %v2585_v56 = vadd.f32 %v2583_v47, %v2574_v45 }
 0x30c   : > { %v2584_v55 = vadd.f32 %v2582_v46, %v2573_v48 }
 0x347   : > { %v2350_v18 = vpop.f32.mrf.mxu1  ;;  %v2421_v42 = vpop.f32.mrf.mxu0 }
 0x348   : > { %v2594_v49 = vmul.f32 %v4284_v43, %v2421_v42 }
 0x349   : > { %v2352_v31 = vpop.f32.mrf.mxu1  ;;  %v2423_v51 = vpop.f32.mrf.mxu0 }
 0x34a   : > { %v2591_v41 = vcombine.low %v2350_v18, %v2352_v31  ;;  %v2596_v59 = vadd.f32 %v2594_v49, %v2585_v56 }
 0x34c   : > { %v2593_v50 = vmul.f32 %v4283_v44, %v2591_v41 }
 0x34e   : > { %v2595_v60 = vadd.f32 %v2593_v50, %v2584_v55 }
 0x388   : > { %v2492_v52 = vpop.f32.mrf.mxu1 }
 0x389   : > { %v2602_v57 = vcombine.low %v2423_v51, %v2492_v52 }
 0x38a   : > { %v2494_v58 = vpop.f32.mrf.mxu1 }
 0x38b   : > { %v2604_v61 = vmul.f32 %v4285_v53, %v2602_v57  ;;  %v2605_v62 = vmul.f32 %v4286_v54, %v2494_v58 }
 0x38d   : > { %v2606_v63 = vadd.f32 %v2604_v61, %v2595_v60  ;;  %v2607_v1 = vadd.f32 %v2605_v62, %v2596_v59  ;;  %v4812_v62 = vmov 839922192  }
 0x38f   : > { %v2609_v3 = vcombine.high %v2606_v63, %v2606_v63  ;;  %v2612_v4 = vsel %vm2611_vm2, %v2606_v63, 0.0  ;;  %v2626_v5 = vsel %vm2611_vm2, %v2607_v1, 0.0 }
 0x390   : > { %v2613_v6 = vrot.slane %v2612_v4, 4  ;;  %v2627_v7 = vrot.slane %v2626_v5, 4 }
 0x391   : > { %v2619_v8 = vsel %vm2611_vm2, %v2609_v3, 0.0 }
 0x392   : > { %v2614_v9 = vadd.f32 %v2613_v6, %v2612_v4  ;;  %v2620_v10 = vrot.slane %v2619_v8, 4  ;;  %v2628_v11 = vadd.f32 %v2627_v7, %v2626_v5  ;;  %v2688_v6 = vpop.permute.xlu0 %2687 }
 0x394   : > { %v2615_v12 = vrot.slane %v2614_v9, 2  ;;  %v2621_v14 = vadd.f32 %v2620_v10, %v2619_v8  ;;  %v2629_v15 = vrot.slane %v2628_v11, 2 }
 0x396   : > { %v2616_v16 = vadd.f32 %v2615_v12, %v2614_v9  ;;  %v2622_v17 = vrot.slane %v2621_v14, 2  ;;  %v2630_v18 = vadd.f32 %v2629_v15, %v2628_v11  ;;  %v2703_v9 = vpop.permute.xlu1 %2702 }
 0x398   : > { %v2617_v21 = vrot.slane %v2616_v16, 1  ;;  %v2623_v22 = vadd.f32 %v2622_v17, %v2621_v14  ;;  %v2631_v23 = vrot.slane %v2630_v18, 1 }
 0x39a   : > { %v2632_v24 = vadd.f32 %v2631_v23, %v2630_v18  ;;  %v2618_v25 = vadd.f32 %v2617_v21, %v2616_v16  ;;  %v2624_v26 = vrot.slane %v2623_v22, 1  ;;  %v2714_v21 = vld [vmem:[%s5833_s8] sm:$0xf] }
 0x39c   : > { %v2636_v27 = vmul.f32 0.25, %v2632_v24  ;;  %v2625_v28 = vadd.f32 %v2624_v26, %v2623_v22  ;;  %v2634_v30 = vmul.f32 0.25, %v2618_v25  ;;  %v2869_v22 = vld [vmem:[%s5834_s9] sm:$0xf] }
 0x39e   : > { %v2642_v29 = vsub.f32 %v2607_v1, %v2636_v27  ;;  %v2635_v20 = vmul.f32 0.25, %v2625_v28 }
 0x3a0   : > { %v2644_v31 = vmul.f32 %v2642_v29, %v2642_v29  ;;  %v2639_v32 = vcombine.low %v2634_v30, %v2635_v20 }
 0x3a2   : > { %v2662_v33 = vsel %vm2611_vm2, %v2644_v31, 0.0  ;;  %v2641_v34 = vsub.f32 %v2606_v63, %v2639_v32  ;;  %v2690_v63 = vunpack.c.l.s4 %v4812_v62 }
 0x3a3   : > { %v2663_v35 = vrot.slane %v2662_v33, 4 }
 0x3a4   : > { %v2643_v36 = vmul.f32 %v2641_v34, %v2641_v34  ;;  %v2691_v1 = vunpack.c.0.s8 %v2690_v63 }
 0x3a5   : > { %v2664_v37 = vadd.f32 %v2663_v35, %v2662_v33 }
 0x3a6   : > { %v2646_v38 = vcombine.high %v2643_v36, %v2643_v36  ;;  %v2648_v39 = vsel %vm2611_vm2, %v2643_v36, 0.0  ;;  %v2694_v4 = vsub.s32 %v2691_v1, %v4939_v2 }
 0x3a7   : > { %v2665_v19 = vrot.slane %v2664_v37, 2  ;;  %v2649_v40 = vrot.slane %v2648_v39, 4 }
 0x3a8   : > { %v2655_v41 = vsel %vm2611_vm2, %v2646_v38, 0.0  ;;  %v2695_v10 = vrot.slane %v2688_v6, %v2694_v4  ;;  %v2710_v15 = vrot.slane %v2703_v9, %v2694_v4 }
 0x3a9   : > { %v2666_v42 = vadd.f32 %v2665_v19, %v2664_v37  ;;  %v2650_v43 = vadd.f32 %v2649_v40, %v2648_v39  ;;  %v2656_v44 = vrot.slane %v2655_v41, 4 }
 0x3ab   : > { %v2667_v45 = vrot.slane %v2666_v42, 1  ;;  %v2651_v46 = vrot.slane %v2650_v43, 2  ;;  %v2657_v47 = vadd.f32 %v2656_v44, %v2655_v41 }
 0x3ad   : > { %v2652_v48 = vadd.f32 %v2651_v46, %v2650_v43  ;;  %v2658_v49 = vrot.slane %v2657_v47, 2  ;;  %v2668_v50 = vadd.f32 %v2667_v45, %v2666_v42 }
 0x3af   : > { %v2653_v51 = vrot.slane %v2652_v48, 1  ;;  %v2659_v52 = vadd.f32 %v2658_v49, %v2657_v47  ;;  %v2671_v55 = vmul.f32 0.25, %v2668_v50 }
 0x3b1   : > { %v2654_v53 = vadd.f32 %v2653_v51, %v2652_v48  ;;  %v2660_v54 = vrot.slane %v2659_v52, 1  ;;  %v2674_v60 = vadd.f32 1e-05, %v2671_v55 }
 0x3b3   : > { %v2661_v56 = vadd.f32 %v2660_v54, %v2659_v52  ;;  %v2669_v57 = vmul.f32 0.25, %v2654_v53 }
 0x3b5   : > { %v2670_v58 = vmul.f32 0.25, %v2661_v56  ;;  %v2672_v59 = vadd.f32 1e-05, %v2669_v57 }
 0x3b7   : > { %v2673_v61 = vadd.f32 1e-05, %v2670_v58  ;;  %4625 = vrsqrt.f32 %v2672_v59 }
 0x3b9   : > { %4627 = vrsqrt.f32 %v2673_v61 }
 0x3ba   : > { %4629 = vrsqrt.f32 %v2674_v60 }
 0x3c4   : > { %v4626_v3 = vpop.eup %4625 }
 0x3c6   : > { %v4628_v5 = vpop.eup %4627 }
 0x3c7   : > { %v4630_v7 = vpop.eup %4629  ;;  %v2680_v8 = vcombine.low %v4626_v3, %v4628_v5 }
 0x3c8   : > { %v2683_v12 = vmul.f32 %v4630_v7, %v2642_v29 }
 0x3c9   : > { %v2682_v11 = vmul.f32 %v2680_v8, %v2641_v34 }
 0x3ca   : > { %v2698_v17 = vmul.f32 %v2695_v10, %v2683_v12 }
 0x3cb   : > { %v2697_v14 = vmul.f32 %v2695_v10, %v2682_v11 }
 0x3cc   : > { %v2713_v2 = vadd.f32 %v2710_v15, %v2698_v17 }
 0x3cd   : > { %v2712_v16 = vadd.f32 %v2710_v15, %v2697_v14 }
 0x3cf   : > { %v2717_v18 = vcombine.high %v2712_v16, %v2712_v16 }
 0x3d1   : > { %4287 = vmatprep.subr.msk.mxu0 %vm2611_vm2, %v2717_v18 }
 0x3d2   : > { %4288 = vmatpush1.msk.msra.mxu0 %vm2611_vm2, %v2712_v16 }
 0x3d3   : > { %4289 = vmatmul.mubr.msk.f32.vlgmr.msra.gmra.mxu0 %vm2718_vm3, %v2714_v21  ;;  %4458 = vmatprep.subr.mxu0 %v4809_v0 }
 0x3d4   : > { %4459 = vmatpush3.msk.msra.mxu0 %vm2611_vm2, %v2713_v2  ;;  %4460 = vmatprep.mubr.msk.f32.mxu0 %vm4813_vm4, %v4809_v0 }
 0x3d5   : > { %4292 = vmatprep.subr.msk.mxu0 %vm2611_vm2, %v2717_v18 }
 0x3d7   : > { %4461 = vmatmul.mubr.msk.f32.vlgmr.msra.gmra.mxu0 %vm2718_vm3, %v2714_v21 }
 0x3d8   : > { %4293 = vmatpush1.msk.msra.mxu0 %vm2611_vm2, %v2712_v16  ;;  %2937 = vmatprep.mubr.f32.mxu0 %v4809_v0 }
 0x3d9   : > { %4463 = vmatprep.subr.mxu0 %v4809_v0 }
 0x3db   : > { %4294 = vmatmul.mubr.msk.f32.vlgmr.msra.gmra.mxu0 %vm2718_vm3, %v2869_v22 }
 0x3dc   : > { %4464 = vmatpush3.msk.msra.mxu0 %vm2611_vm2, %v2713_v2  ;;  %4465 = vmatprep.mubr.msk.f32.mxu0 %vm4813_vm4, %v4809_v0 }
 0x3df   : > { %4466 = vmatmul.mubr.msk.f32.vlgmr.msra.gmra.mxu0 %vm2718_vm3, %v2869_v22 }
 0x493   : > { %v2794_v23 = vpop.f32.mrf.mxu0 }
 0x494   : > { %3014 = vxpose.xlu1.b32.start.end [1/1] (short) %v2794_v23, 128 }
 0x495   : > { %v2796_v24 = vpop.f32.mrf.mxu0 }
 0x496   : > { %3046 = vxpose.xlu0.b32.start.end [1/1] (short) %v2796_v24, 128 }
 0x497   : > { %v2865_v25 = vpop.f32.mrf.mxu0 }
 0x499   : > { %v4462_v26 = vpop.f32.mrf.mxu0 }
 0x49b   : > { %v5078_v27 = vpop.f32.mrf.mxu0 }
 0x49c   : > { %5849 = vst [vmem:[#allocation10_spill] sm:$0xff] %v5078_v27 }
 0x49d   : > { %v5080_v28 = vpop.f32.mrf.mxu0 }
 0x49e   : > { %5850 = vst [vmem:[#allocation11_spill] sm:$0xff] %v5080_v28 }
 0x49f   : > { %v5082_v29 = vpop.f32.mrf.mxu0 }
 0x4a0   : > { %5851 = vst [vmem:[#allocation12_spill] sm:$0xff] %v5082_v29 }
 0x4a1   : > { %v4467_v30 = vpop.f32.mrf.mxu0 }
 0x4d3   : > { %3078 = vxpose.xlu0.b32.start.end [1/1] (short) %v2865_v25, 128 }
 0x510   : > { %v5084_v20 = vpop.trf.xlu1 }
 0x511   : > { %5852 = vst [vmem:[#allocation13_spill] sm:$0xff] %v5084_v20 }
 0x512   : > { %v5086_v31 = vpop.trf.xlu0 }
 0x513   : > { %5853 = vst [vmem:[#allocation14_spill] sm:$0xff] %v5086_v31 }
 0x514   : > { %v5088_v0 = vpop.trf.xlu1 }
 0x515   : > { %5854 = vst [vmem:[#allocation15_spill] sm:$0xff] %v5088_v0 }
 0x516   : > { %v5090_v32 = vpop.trf.xlu0 }
 0x517   : > { %5855 = vst [vmem:[#allocation16_spill] sm:$0xff] %v5090_v32 }
 0x518   : > { %v5092_v33 = vpop.trf.xlu1 }
 0x519   : > { %5856 = vst [vmem:[#allocation17_spill] sm:$0xff] %v5092_v33 }
 0x51a   : > { %v5094_v34 = vpop.trf.xlu0 }
 0x51b   : > { %5857 = vst [vmem:[#allocation18_spill] sm:$0xff] %v5094_v34 }
 0x51c   : > { %v5096_v35 = vpop.trf.xlu1 }
 0x51d   : > { %5858 = vst [vmem:[#allocation19_spill] sm:$0xff] %v5096_v35 }
 0x51e   : > { %v5098_v36 = vpop.trf.xlu0 }
 0x51f   : > { %5859 = vst [vmem:[#allocation20_spill] sm:$0xff] %v5098_v36 }
 0x520   : > { %v5100_v37 = vpop.trf.xlu1 }
 0x521   : > { %5860 = vst [vmem:[#allocation21_spill] sm:$0xff] %v5100_v37 }
 0x522   : > { %v5102_v38 = vpop.trf.xlu0 }
 0x523   : > { %5861 = vst [vmem:[#allocation22_spill] sm:$0xff] %v5102_v38 }
 0x524   : > { %v5104_v39 = vpop.trf.xlu1 }
 0x525   : > { %5862 = vst [vmem:[#allocation23_spill] sm:$0xff] %v5104_v39 }
 0x526   : > { %v5106_v19 = vpop.trf.xlu0 }
 0x527   : > { %5863 = vst [vmem:[#allocation24_spill] sm:$0xff] %v5106_v19 }
 0x528   : > { %v5108_v40 = vpop.trf.xlu1 }
 0x529   : > { %5864 = vst [vmem:[#allocation25_spill] sm:$0xff] %v5108_v40 }
 0x52a   : > { %v5110_v41 = vpop.trf.xlu0 }
 0x52b   : > { %5865 = vst [vmem:[#allocation26_spill] sm:$0xff] %v5110_v41 }
 0x52c   : > { %v5112_v42 = vpop.trf.xlu1 }
 0x52d   : > { %5866 = vst [vmem:[#allocation27_spill] sm:$0xff] %v5112_v42 }
 0x52e   : > { %v5114_v43 = vpop.trf.xlu0 }
 0x52f   : > { %5867 = vst [vmem:[#allocation28_spill] sm:$0xff] %v5114_v43 }
 0x530   : > { %v5116_v44 = vpop.trf.xlu1 }
 0x531   : > { %5868 = vst [vmem:[#allocation29_spill] sm:$0xff] %v5116_v44 }
 0x532   : > { %v5118_v45 = vpop.trf.xlu0 }
 0x533   : > { %5869 = vst [vmem:[#allocation30_spill] sm:$0xff] %v5118_v45 }
 0x534   : > { %v5120_v46 = vpop.trf.xlu1 }
 0x535   : > { %5870 = vst [vmem:[#allocation31_spill] sm:$0xff] %v5120_v46 }
 0x536   : > { %v5122_v47 = vpop.trf.xlu0 }
 0x537   : > { %5871 = vst [vmem:[#allocation32_spill] sm:$0xff] %v5122_v47 }
 0x538   : > { %v5124_v48 = vpop.trf.xlu1 }
 0x539   : > { %5872 = vst [vmem:[#allocation33_spill] sm:$0xff] %v5124_v48 }
 0x53a   : > { %v5126_v49 = vpop.trf.xlu0 }
 0x53b   : > { %5873 = vst [vmem:[#allocation34_spill] sm:$0xff] %v5126_v49 }
 0x53c   : > { %v5128_v50 = vpop.trf.xlu1 }
 0x53d   : > { %5874 = vst [vmem:[#allocation35_spill] sm:$0xff] %v5128_v50 }
 0x53e   : > { %v5130_v51 = vpop.trf.xlu0 }
 0x53f   : > { %5875 = vst [vmem:[#allocation36_spill] sm:$0xff] %v5130_v51 }
 0x540   : > { %v5132_v52 = vpop.trf.xlu1 }
 0x541   : > { %5876 = vst [vmem:[#allocation37_spill] sm:$0xff] %v5132_v52 }
 0x542   : > { %v5134_v53 = vpop.trf.xlu0 }
 0x543   : > { %5877 = vst [vmem:[#allocation38_spill] sm:$0xff] %v5134_v53 }
 0x544   : > { %v5136_v54 = vpop.trf.xlu1 }
 0x545   : > { %5878 = vst [vmem:[#allocation39_spill] sm:$0xff] %v5136_v54 }
 0x546   : > { %v5138_v55 = vpop.trf.xlu0 }
 0x547   : > { %5879 = vst [vmem:[#allocation40_spill] sm:$0xff] %v5138_v55 }
 0x548   : > { %v5140_v56 = vpop.trf.xlu1 }
 0x549   : > { %5880 = vst [vmem:[#allocation41_spill] sm:$0xff] %v5140_v56 }
 0x54a   : > { %v5142_v57 = vpop.trf.xlu0 }
 0x54b   : > { %5881 = vst [vmem:[#allocation42_spill] sm:$0xff] %v5142_v57 }
 0x54c   : > { %v5144_v58 = vpop.trf.xlu1 }
 0x54d   : > { %5882 = vst [vmem:[#allocation43_spill] sm:$0xff] %v5144_v58 }
 0x54e   : > { %v5146_v59 = vpop.trf.xlu0 }
 0x54f   : > { %5883 = vst [vmem:[#allocation44_spill] sm:$0xff] %v5146_v59 }
 0x552   : > { %v5148_v60 = vpop.trf.xlu0 }
 0x553   : > { %5884 = vst [vmem:[#allocation45_spill] sm:$0xff] %v5148_v60 }
 0x556   : > { %v5150_v61 = vpop.trf.xlu0 }
 0x557   : > { %5885 = vst [vmem:[#allocation46_spill] sm:$0xff] %v5150_v61 }
 0x55a   : > { %v5152_v62 = vpop.trf.xlu0 }
 0x55b   : > { %5886 = vst [vmem:[#allocation47_spill] sm:$0xff] %v5152_v62 }
 0x55e   : > { %v5154_v63 = vpop.trf.xlu0 }
 0x55f   : > { %5887 = vst [vmem:[#allocation48_spill] sm:$0xff] %v5154_v63 }
 0x562   : > { %v5156_v1 = vpop.trf.xlu0 }
 0x563   : > { %5888 = vst [vmem:[#allocation49_spill] sm:$0xff] %v5156_v1 }
 0x566   : > { %v5158_v3 = vpop.trf.xlu0 }
 0x567   : > { %5889 = vst [vmem:[#allocation50_spill] sm:$0xff] %v5158_v3 }
 0x56a   : > { %v5160_v4 = vpop.trf.xlu0 }
 0x56b   : > { %5890 = vst [vmem:[#allocation51_spill] sm:$0xff] %v5160_v4 }
 0x56e   : > { %v5162_v5 = vpop.trf.xlu0 }
 0x56f   : > { %5891 = vst [vmem:[#allocation52_spill] sm:$0xff] %v5162_v5 }
 0x572   : > { %v5164_v6 = vpop.trf.xlu0 }
 0x573   : > { %5892 = vst [vmem:[#allocation53_spill] sm:$0xff] %v5164_v6 }
 0x576   : > { %v5166_v7 = vpop.trf.xlu0 }
 0x577   : > { %5893 = vst [vmem:[#allocation54_spill] sm:$0xff] %v5166_v7 }
 0x57a   : > { %v5168_v8 = vpop.trf.xlu0 }
 0x57b   : > { %5894 = vst [vmem:[#allocation55_spill] sm:$0xff] %v5168_v8 }
 0x57e   : > { %v5170_v9 = vpop.trf.xlu0 }
 0x57f   : > { %5895 = vst [vmem:[#allocation56_spill] sm:$0xff] %v5170_v9 }
 0x582   : > { %v5172_v10 = vpop.trf.xlu0 }
 0x583   : > { %5896 = vst [vmem:[#allocation57_spill] sm:$0xff] %v5172_v10 }
 0x586   : > { %v5174_v11 = vpop.trf.xlu0 }
 0x587   : > { %5897 = vst [vmem:[#allocation58_spill] sm:$0xff] %v5174_v11 }
 0x58a   : > { %v5176_v12 = vpop.trf.xlu0 }
 0x58b   : > { %5898 = vst [vmem:[#allocation59_spill] sm:$0xff] %v5176_v12 }
 0x58e   : > { %v5178_v14 = vpop.trf.xlu0 }
 0x58f   : > { %5899 = vst [vmem:[#allocation60_spill] sm:$0xff] %v5178_v14 }
 0x590 LB: >> { %v5900_v20 = vld [vmem:[#allocation13_spill] sm:$0xff]  ;;  %v5901_v28 = vld [vmem:[#allocation11_spill] sm:$0xff]  ;;  %s4297_s20 = sshll.u32 %s4803_s19, 7  ;;  %v5917_v31 = vld [vmem:[#allocation14_spill] sm:$0xff]  ;;  %vm4815_vm5 = vmmov 0   ;;  %s3265_s19 = sadd.s32 1, %s4803_s19   ;;  %s4803_s19 = sphi %s5180_s19, %s3265_s19  }
 0x591   : >> { %4470 = vmatprep.mubr.msk.f32.mxu0 %vm2718_vm3, %v5900_v20  ;;  %4090 = vmatprep.mubr.f32.mxu1 %v5901_v28  ;;  %s5189_s14 = sshra.s32 %s4297_s20, 7  ;;  %v5902_v0 = vld [vmem:[#allocation15_spill] sm:$0xff]  ;;  %v5903_v33 = vld [vmem:[#allocation17_spill] sm:$0xff]  ;;  %v5918_v32 = vld [vmem:[#allocation16_spill] sm:$0xff]  ;;  %p3262_p5 = scmp.ge.s32.totalorder %s3265_s19, 2  }
 0x592   : >> { %s4298_s21 = sshll.u32 %s5189_s14, 2  ;;  %v5904_v35 = vld [vmem:[#allocation19_spill] sm:$0xff]  ;;  %v5905_v37 = vld [vmem:[#allocation21_spill] sm:$0xff]  ;;  %v5919_v34 = vld [vmem:[#allocation18_spill] sm:$0xff] }
 0x593   : >> { %s3270_s22 = scalar_lea.vmem [#allocation2], %s4298_s21  ;;  %v5906_v39 = vld [vmem:[#allocation23_spill] sm:$0xff]  ;;  %v5907_v40 = vld [vmem:[#allocation25_spill] sm:$0xff]  ;;  %v5920_v36 = vld [vmem:[#allocation20_spill] sm:$0xff]  ;;  %s4167_s23 = scalar_lea.vmem %s4931_s18, %s4298_s21 }
 0x594   : >> { %v3271_v15 = vld [vmem:[%s3270_s22] sm:$0xf]  ;;  %v5909_v44 = vld [vmem:[#allocation29_spill] sm:$0xff]  ;;  %v5921_v38 = vld [vmem:[#allocation22_spill] sm:$0xff] }
 0x595   : >> { %4468 = vmatprep.subr.msk.mxu0 %vm2611_vm2, %v3271_v15  ;;  %v5908_v42 = vld [vmem:[#allocation27_spill] sm:$0xff]  ;;  %v5911_v48 = vld [vmem:[#allocation33_spill] sm:$0xff]  ;;  %v5922_v19 = vld [vmem:[#allocation24_spill] sm:$0xff] }
 0x596   : >> { %4469 = vmatpush3.msk.msra.mxu0 %vm2611_vm2, %v3271_v15  ;;  %v5910_v46 = vld [vmem:[#allocation31_spill] sm:$0xff]  ;;  %v5913_v52 = vld [vmem:[#allocation37_spill] sm:$0xff]  ;;  %v5923_v41 = vld [vmem:[#allocation26_spill] sm:$0xff] }
 0x597   : >> { %4471 = vmatmul.mubr.msk.f32.vlgmr.msra.gmra.mxu0 %vm2718_vm3, %v5902_v0  ;;  %v5912_v50 = vld [vmem:[#allocation35_spill] sm:$0xff]  ;;  %v5915_v56 = vld [vmem:[#allocation41_spill] sm:$0xff]  ;;  %v5924_v43 = vld [vmem:[#allocation28_spill] sm:$0xff] }
 0x598   : >> { %4473 = vmatprep.mubr.msk.f32.mxu0 %vm2718_vm3, %v5903_v33  ;;  %v5914_v54 = vld [vmem:[#allocation39_spill] sm:$0xff]  ;;  %v5925_v45 = vld [vmem:[#allocation30_spill] sm:$0xff]  ;;  %v5926_v47 = vld [vmem:[#allocation32_spill] sm:$0xff] }
 0x599   : >> { %v5916_v58 = vld [vmem:[#allocation43_spill] sm:$0xff]  ;;  %v5927_v49 = vld [vmem:[#allocation34_spill] sm:$0xff]  ;;  %v5928_v51 = vld [vmem:[#allocation36_spill] sm:$0xff] }
 0x59a   : >> { %v5929_v53 = vld [vmem:[#allocation38_spill] sm:$0xff]  ;;  %v5930_v55 = vld [vmem:[#allocation40_spill] sm:$0xff]  ;;  %v5933_v60 = vld [vmem:[#allocation45_spill] sm:$0xff] }
 0x59b   : >> { %4474 = vmatmul.mubr.msk.f32.gmra.mxu0 %vm2718_vm3, %v5904_v35  ;;  %v5931_v57 = vld [vmem:[#allocation42_spill] sm:$0xff]  ;;  %v5932_v59 = vld [vmem:[#allocation44_spill] sm:$0xff]  ;;  %v5935_v62 = vld [vmem:[#allocation47_spill] sm:$0xff] }
 0x59c   : >> { %4476 = vmatprep.mubr.msk.f32.mxu0 %vm2718_vm3, %v5905_v37  ;;  %v5934_v61 = vld [vmem:[#allocation46_spill] sm:$0xff]  ;;  %v5936_v63 = vld [vmem:[#allocation48_spill] sm:$0xff]  ;;  %v5937_v1 = vld [vmem:[#allocation49_spill] sm:$0xff] }
 0x59d   : >> { %v5938_v3 = vld [vmem:[#allocation50_spill] sm:$0xff]  ;;  %v5939_v4 = vld [vmem:[#allocation51_spill] sm:$0xff]  ;;  %v5940_v5 = vld [vmem:[#allocation52_spill] sm:$0xff] }
 0x59e   : >> { %v5941_v6 = vld [vmem:[#allocation53_spill] sm:$0xff]  ;;  %v5942_v7 = vld [vmem:[#allocation54_spill] sm:$0xff]  ;;  %v5943_v8 = vld [vmem:[#allocation55_spill] sm:$0xff] }
 0x59f   : >> { %4477 = vmatmul.mubr.msk.f32.gmra.mxu0 %vm2718_vm3, %v5906_v39  ;;  %v5944_v9 = vld [vmem:[#allocation56_spill] sm:$0xff]  ;;  %v5945_v10 = vld [vmem:[#allocation57_spill] sm:$0xff]  ;;  %v5946_v11 = vld [vmem:[#allocation58_spill] sm:$0xff] }
 0x5a0   : >> { %4479 = vmatprep.mubr.msk.f32.mxu0 %vm2718_vm3, %v5907_v40  ;;  %v5947_v12 = vld [vmem:[#allocation59_spill] sm:$0xff]  ;;  %v5948_v14 = vld [vmem:[#allocation60_spill] sm:$0xff]  ;;  %v5952_v13 = vld [vmem:[#allocation9_spill] sm:$0xff] }
 0x5a3   : >> { %4480 = vmatmul.mubr.msk.f32.gmra.mxu0 %vm2718_vm3, %v5908_v42 }
 0x5a4   : >> { %4482 = vmatprep.mubr.msk.f32.mxu0 %vm2718_vm3, %v5909_v44 }
 0x5a7   : >> { %4483 = vmatmul.mubr.msk.f32.gmra.mxu0 %vm2718_vm3, %v5910_v46 }
 0x5a8   : >> { %4485 = vmatprep.mubr.msk.f32.mxu0 %vm2718_vm3, %v5911_v48 }
 0x5ab   : >> { %4486 = vmatmul.mubr.msk.f32.gmra.mxu0 %vm2718_vm3, %v5912_v50 }
 0x5ac   : >> { %4488 = vmatprep.mubr.msk.f32.mxu0 %vm2718_vm3, %v5913_v52 }
 0x5af   : >> { %4489 = vmatmul.mubr.msk.f32.gmra.mxu0 %vm2718_vm3, %v5914_v54 }
 0x5b0   : >> { %4491 = vmatprep.mubr.msk.f32.mxu0 %vm2718_vm3, %v5915_v56 }
 0x5b3   : >> { %4492 = vmatmul.mubr.msk.f32.gmra.mxu0 %vm2718_vm3, %v5916_v58 }
 0x5b4   : >> { %4494 = vmatprep.mubr.msk.f32.mxu0 %vm2718_vm3, %v5917_v31 }
 0x5b7   : >> { %4495 = vmatmul.mubr.msk.f32.gmra.mxu0 %vm2718_vm3, %v5918_v32 }
 0x5b8   : >> { %4497 = vmatprep.mubr.msk.f32.mxu0 %vm2718_vm3, %v5919_v34 }
 0x5bb   : >> { %4498 = vmatmul.mubr.msk.f32.gmra.mxu0 %vm2718_vm3, %v5920_v36 }
 0x5bc   : >> { %4500 = vmatprep.mubr.msk.f32.mxu0 %vm2718_vm3, %v5921_v38 }
 0x5bf   : >> { %4501 = vmatmul.mubr.msk.f32.gmra.mxu0 %vm2718_vm3, %v5922_v19 }
 0x5c0   : >> { %4503 = vmatprep.mubr.msk.f32.mxu0 %vm2718_vm3, %v5923_v41 }
 0x5c3   : >> { %4504 = vmatmul.mubr.msk.f32.gmra.mxu0 %vm2718_vm3, %v5924_v43 }
 0x5c4   : >> { %4506 = vmatprep.mubr.msk.f32.mxu0 %vm2718_vm3, %v5925_v45 }
 0x5c7   : >> { %4507 = vmatmul.mubr.msk.f32.gmra.mxu0 %vm2718_vm3, %v5926_v47 }
 0x5c8   : >> { %4509 = vmatprep.mubr.msk.f32.mxu0 %vm2718_vm3, %v5927_v49 }
 0x5cb   : >> { %4510 = vmatmul.mubr.msk.f32.gmra.mxu0 %vm2718_vm3, %v5928_v51 }
 0x5cc   : >> { %4512 = vmatprep.mubr.msk.f32.mxu0 %vm2718_vm3, %v5929_v53 }
 0x5cf   : >> { %4513 = vmatmul.mubr.msk.f32.gmra.mxu0 %vm2718_vm3, %v5930_v55 }
 0x5d0   : >> { %4515 = vmatprep.mubr.msk.f32.mxu0 %vm2718_vm3, %v5931_v57 }
 0x5d3   : >> { %4516 = vmatmul.mubr.msk.f32.gmra.mxu0 %vm2718_vm3, %v5932_v59 }
 0x5d4   : >> { %4518 = vmatprep.mubr.msk.f32.mxu0 %vm2718_vm3, %v5933_v60 }
 0x5d7   : >> { %4519 = vmatmul.mubr.msk.f32.gmra.mxu0 %vm2718_vm3, %v5934_v61 }
 0x5d8   : >> { %4521 = vmatprep.mubr.msk.f32.mxu0 %vm2718_vm3, %v5935_v62 }
 0x5db   : >> { %4522 = vmatmul.mubr.msk.f32.gmra.mxu0 %vm2718_vm3, %v5936_v63 }
 0x5dc   : >> { %4524 = vmatprep.mubr.msk.f32.mxu0 %vm2718_vm3, %v5937_v1 }
 0x5df   : >> { %4525 = vmatmul.mubr.msk.f32.gmra.mxu0 %vm2718_vm3, %v5938_v3 }
 0x5e0   : >> { %4527 = vmatprep.mubr.msk.f32.mxu0 %vm2718_vm3, %v5939_v4 }
 0x5e3   : >> { %4528 = vmatmul.mubr.msk.f32.gmra.mxu0 %vm2718_vm3, %v5940_v5 }
 0x5e4   : >> { %4530 = vmatprep.mubr.msk.f32.mxu0 %vm2718_vm3, %v5941_v6 }
 0x5e7   : >> { %4531 = vmatmul.mubr.msk.f32.gmra.mxu0 %vm2718_vm3, %v5942_v7 }
 0x5e8   : >> { %4533 = vmatprep.mubr.msk.f32.mxu0 %vm2718_vm3, %v5943_v8 }
 0x5eb   : >> { %4534 = vmatmul.mubr.msk.f32.gmra.mxu0 %vm2718_vm3, %v5944_v9 }
 0x5ec   : >> { %4536 = vmatprep.mubr.msk.f32.mxu0 %vm2718_vm3, %v5945_v10 }
 0x5ef   : >> { %4537 = vmatmul.mubr.msk.f32.gmra.mxu0 %vm2718_vm3, %v5946_v11 }
 0x5f0   : >> { %4539 = vmatprep.mubr.msk.f32.mxu0 %vm2718_vm3, %v5947_v12 }
 0x5f3   : >> { %4540 = vmatmul.mubr.msk.f32.gmra.mxu0 %vm2718_vm3, %v5948_v14 }
 0x657   : >> { %v5290_v16 = vpop.f32.mrf.mxu0 }
 0x659   : >> { %v5292_v17 = vpop.f32.mrf.mxu0 }
 0x65b   : >> { %v5294_v18 = vpop.f32.mrf.mxu0 }
 0x65d   : >> { %v5296_v21 = vpop.f32.mrf.mxu0 }
 0x65f   : >> { %v5298_v2 = vpop.f32.mrf.mxu0 }
 0x660   : >> { %v3725_v42 = vmax.f32 %v5290_v16, %v5298_v2 }
 0x661   : >> { %v5300_v22 = vpop.f32.mrf.mxu0 }
 0x662   : >> { %v3724_v41 = vmax.f32 %v5292_v17, %v5300_v22 }
 0x663   : >> { %v5302_v23 = vpop.f32.mrf.mxu0 }
 0x664   : >> { %v3727_v43 = vmax.f32 %v5294_v18, %v5302_v23 }
 0x665   : >> { %v5304_v24 = vpop.f32.mrf.mxu0 }
 0x666   : >> { %v3726_v44 = vmax.f32 %v5296_v21, %v5304_v24 }
 0x667   : >> { %v5306_v25 = vpop.f32.mrf.mxu0 }
 0x668   : >> { %v3729_v47 = vmax.f32 %v3725_v42, %v5306_v25 }
 0x669   : >> { %v5308_v26 = vpop.f32.mrf.mxu0 }
 0x66a   : >> { %v3728_v46 = vmax.f32 %v3724_v41, %v5308_v26 }
 0x66b   : >> { %v5310_v30 = vpop.f32.mrf.mxu0 }
 0x66c   : >> { %v3731_v48 = vmax.f32 %v3727_v43, %v5310_v30 }
 0x66d   : >> { %v5312_v15 = vpop.f32.mrf.mxu0 }
 0x66e   : >> { %v3730_v49 = vmax.f32 %v3726_v44, %v5312_v15 }
 0x66f   : >> { %v5314_v0 = vpop.f32.mrf.mxu0 }
 0x670   : >> { %v3733_v52 = vmax.f32 %v3729_v47, %v5314_v0 }
 0x671   : >> { %v5316_v1 = vpop.f32.mrf.mxu0 }
 0x672   : >> { %v3732_v51 = vmax.f32 %v3728_v46, %v5316_v1 }
 0x673   : >> { %v5318_v3 = vpop.f32.mrf.mxu0 }
 0x674   : >> { %v3735_v53 = vmax.f32 %v3731_v48, %v5318_v3 }
 0x675   : >> { %v5320_v4 = vpop.f32.mrf.mxu0 }
 0x676   : >> { %v3734_v54 = vmax.f32 %v3730_v49, %v5320_v4 }
 0x677   : >> { %v5322_v5 = vpop.f32.mrf.mxu0 }
 0x678   : >> { %v3737_v42 = vmax.f32 %v3733_v52, %v5322_v5 }
 0x679   : >> { %v5324_v6 = vpop.f32.mrf.mxu0 }
 0x67a   : >> { %v3736_v41 = vmax.f32 %v3732_v51, %v5324_v6 }
 0x67b   : >> { %v5326_v7 = vpop.f32.mrf.mxu0 }
 0x67c   : >> { %v3739_v43 = vmax.f32 %v3735_v53, %v5326_v7 }
 0x67d   : >> { %v5328_v8 = vpop.f32.mrf.mxu0 }
 0x67e   : >> { %v3738_v44 = vmax.f32 %v3734_v54, %v5328_v8 }
 0x67f   : >> { %v5330_v9 = vpop.f32.mrf.mxu0 }
 0x680   : >> { %v3741_v47 = vmax.f32 %v3737_v42, %v5330_v9 }
 0x681   : >> { %v5332_v10 = vpop.f32.mrf.mxu0 }
 0x682   : >> { %v3740_v46 = vmax.f32 %v3736_v41, %v5332_v10 }
 0x683   : >> { %v5334_v11 = vpop.f32.mrf.mxu0 }
 0x684   : >> { %v3743_v48 = vmax.f32 %v3739_v43, %v5334_v11 }
 0x685   : >> { %v5336_v12 = vpop.f32.mrf.mxu0 }
 0x686   : >> { %v3742_v49 = vmax.f32 %v3738_v44, %v5336_v12 }
 0x687   : >> { %v5338_v14 = vpop.f32.mrf.mxu0 }
 0x688   : >> { %v3745_v51 = vmax.f32 %v3741_v47, %v5338_v14 }
 0x689   : >> { %v5340_v19 = vpop.f32.mrf.mxu0 }
 0x68a   : >> { %v3744_v58 = vmax.f32 %v3740_v46, %v5340_v19 }
 0x68b   : >> { %v5342_v20 = vpop.f32.mrf.mxu0 }
 0x68c   : >> { %v3747_v52 = vmax.f32 %v3743_v48, %v5342_v20 }
 0x68d   : >> { %v5344_v28 = vpop.f32.mrf.mxu0 }
 0x68e   : >> { %v3746_v53 = vmax.f32 %v3742_v49, %v5344_v28 }
 0x68f   : >> { %v5346_v31 = vpop.f32.mrf.mxu0 }
 0x690   : >> { %v3749_v41 = vmax.f32 %v3745_v51, %v5346_v31 }
 0x691   : >> { %v5348_v32 = vpop.f32.mrf.mxu0 }
 0x692   : >> { %v3748_v59 = vmax.f32 %v3744_v58, %v5348_v32 }
 0x693   : >> { %v5350_v33 = vpop.f32.mrf.mxu0 }
 0x694   : >> { %5949 = vst [vmem:[#allocation61_spill] sm:$0xff] %v5350_v33  ;;  %v3751_v42 = vmax.f32 %v3747_v52, %v5350_v33 }
 0x695   : >> { %v5352_v34 = vpop.f32.mrf.mxu0 }
 0x696   : >> { %5950 = vst [vmem:[#allocation62_spill] sm:$0xff] %v5352_v34  ;;  %v3750_v43 = vmax.f32 %v3746_v53, %v5352_v34 }
 0x697   : >> { %v5354_v35 = vpop.f32.mrf.mxu0 }
 0x698   : >> { %v3753_v46 = vmax.f32 %v3749_v41, %v5354_v35 }
 0x699   : >> { %v5356_v36 = vpop.f32.mrf.mxu0 }
 0x69a   : >> { %5951 = vst [vmem:[#allocation63_spill] sm:$0xff] %v5356_v36  ;;  %v3752_v44 = vmax.f32 %v3748_v59, %v5356_v36 }
 0x69b   : >> { %v5358_v37 = vpop.f32.mrf.mxu0 }
 0x69c   : >> { %v3755_v47 = vmax.f32 %v3751_v42, %v5358_v37 }
 0x69d   : >> { %v5360_v38 = vpop.f32.mrf.mxu0 }
 0x69e   : >> { %v3754_v48 = vmax.f32 %v3750_v43, %v5360_v38 }
 0x69f   : >> { %v5362_v39 = vpop.f32.mrf.mxu0 }
 0x6a0   : >> { %v3757_v52 = vmax.f32 %v3753_v46, %v5362_v39 }
 0x6a1   : >> { %v5364_v40 = vpop.f32.mrf.mxu0 }
 0x6a2   : >> { %v3756_v49 = vmax.f32 %v3752_v44, %v5364_v40 }
 0x6a3   : >> { %v5374_v45 = vpop.f32.mrf.mxu0 }
 0x6a4   : >> { %v3759_v59 = vmax.f32 %v3755_v47, %v5374_v45 }
 0x6a5   : >> { %v5380_v50 = vpop.f32.mrf.mxu0 }
 0x6a6   : >> { %v3758_v41 = vmax.f32 %v3754_v48, %v5380_v50 }
 0x6a7   : >> { %v5386_v55 = vpop.f32.mrf.mxu0 }
 0x6a9   : >> { %v5392_v56 = vpop.f32.mrf.mxu0 }
 0x6aa   : >> { %v3760_v42 = vmax.f32 %v3756_v49, %v5392_v56 }
 0x6ab   : >> { %v4535_v57 = vpop.f32.mrf.mxu0 }
 0x6ac   : >> { %v5411_v62 = vadd.f32 -1e+30, %v4535_v57  ;;  %v3761_v57 = vmax.f32 %v3757_v52, %v5386_v55 }
 0x6ad   : >> { %v3695_v54 = vpop.f32.mrf.mxu0 }
 0x6ae   : >> { %v5414_v58 = vadd.f32 %v3695_v54, %v5952_v13  ;;  %v3763_v54 = vmax.f32 %v3759_v59, %v5411_v62 }
 0x6af   : >> { %v4538_v60 = vpop.f32.mrf.mxu0 }
 0x6b0   : >> { %v5422_v43 = vadd.f32 -1e+30, %v4538_v60 }
 0x6b1   : >> { %v3705_v61 = vpop.f32.mrf.mxu0 }
 0x6b2   : >> { %v5416_v51 = vadd.f32 -1e+30, %v3705_v61  ;;  %v3762_v61 = vmax.f32 %v3758_v41, %v5414_v58  ;;  %v3765_v47 = vmax.f32 %v3761_v57, %v5422_v43 }
 0x6b3   : >> { %v4541_v53 = vpop.f32.mrf.mxu0 }
 0x6b4   : >> { %v5424_v63 = vadd.f32 -1e+30, %v4541_v53  ;;  %v3764_v46 = vmax.f32 %v3760_v42, %v5416_v51 }
 0x6b5   : >> { %v3715_v44 = vpop.f32.mrf.mxu0 }
 0x6b6   : >> { %v5430_v13 = vadd.f32 -1e+30, %v3715_v44  ;;  %v3767_v48 = vmax.f32 %v3763_v54, %v5424_v63  ;;  %v3768_v49 = vmax.f32 %v3764_v46, %v3765_v47 }
 0x6b8   : >> { %v3766_v60 = vmax.f32 %v3762_v61, %v5430_v13 }
 0x6ba   : >> { %v3769_v53 = vmax.f32 %v3766_v60, %v3767_v48 }
 0x6bc   : >> { %v3770_v29 = vmax.f32 %v3768_v49, %v3769_v53 }
 0x6be   : >> { %v3771_v27 = vrot.slane %v3770_v29, 4 }
 0x6c0   : >> { %v3772_v52 = vmax.f32 %v3770_v29, %v3771_v27 }
 0x6c2   : >> { %v3773_v36 = vrot.slane %v3772_v52, 2 }
 0x6c4   : >> { %v3774_v33 = vmax.f32 %v3772_v52, %v3773_v36 }
 0x6c6   : >> { %v3775_v59 = vrot.slane %v3774_v33, 1 }
 0x6c8   : >> { %v5435_v34 = vmax.f32 %v3774_v33, %v3775_v59 }
 0x6ca   : >> { %v3777_v41 = vsub.f32 %v5292_v17, %v5435_v34  ;;  %v3778_v42 = vsub.f32 %v5290_v16, %v5435_v34  ;;  %v3779_v57 = vsub.f32 %v5296_v21, %v5435_v34  ;;  %v3780_v44 = vsub.f32 %v5294_v18, %v5435_v34 }
 0x6cb   : >> { %v3810_v27 = vsub.f32 %v5354_v35, %v5435_v34  ;;  %v3811_v29 = vsub.f32 %v5360_v38, %v5435_v34  ;;  %v3812_v33 = vsub.f32 %v5358_v37, %v5435_v34  ;;  %v3813_v36 = vsub.f32 %v5364_v40, %v5435_v34 }
 0x6cc   : >> { %v3814_v16 = vsub.f32 %v5362_v39, %v5435_v34  ;;  %v3815_v17 = vsub.f32 %v5380_v50, %v5435_v34  ;;  %v3816_v18 = vsub.f32 %v5374_v45, %v5435_v34  ;;  %v3817_v21 = vsub.f32 %v5392_v56, %v5435_v34 }
 0x6cd   : >> { %v3818_v54 = vsub.f32 %v5386_v55, %v5435_v34  ;;  %v3825_v53 = vmul.f32 1.442695, %v3777_v41  ;;  %v3827_v52 = vmul.f32 1.442695, %v3778_v42  ;;  %v3781_v59 = vsub.f32 %v5300_v22, %v5435_v34 }
 0x6ce   : >> { %v3829_v61 = vmul.f32 1.442695, %v3779_v57  ;;  %v3782_v46 = vsub.f32 %v5298_v2, %v5435_v34  ;;  %v3831_v47 = vmul.f32 1.442695, %v3780_v44  ;;  %v3783_v48 = vsub.f32 %v5304_v24, %v5435_v34 }
 0x6cf   : >> { %4631 = vpow2.f32 %v3825_v53  ;;  %v3833_v60 = vmul.f32 1.442695, %v3781_v59  ;;  %v3784_v49 = vsub.f32 %v5302_v23, %v5435_v34  ;;  %v3785_v22 = vsub.f32 %v5308_v26, %v5435_v34 }
 0x6d0   : >> { %4633 = vpow2.f32 %v3827_v52  ;;  %v3835_v41 = vmul.f32 1.442695, %v3782_v46  ;;  %v3837_v42 = vmul.f32 1.442695, %v3783_v48  ;;  %v3786_v2 = vsub.f32 %v5306_v25, %v5435_v34 }
 0x6d1   : >> { %4635 = vpow2.f32 %v3829_v61  ;;  %v3839_v57 = vmul.f32 1.442695, %v3784_v49  ;;  %v3787_v24 = vsub.f32 %v5312_v15, %v5435_v34  ;;  %v3841_v44 = vmul.f32 1.442695, %v3785_v22 }
 0x6d2   : >> { %4637 = vpow2.f32 %v3831_v47  ;;  %v3788_v23 = vsub.f32 %v5310_v30, %v5435_v34  ;;  %v3843_v46 = vmul.f32 1.442695, %v3786_v2  ;;  %v3789_v47 = vsub.f32 %v5316_v1, %v5435_v34 }
 0x6d3   : >> { %4639 = vpow2.f32 %v3833_v60  ;;  %v3845_v25 = vmul.f32 1.442695, %v3787_v24  ;;  %v3790_v60 = vsub.f32 %v5314_v0, %v5435_v34  ;;  %v3791_v52 = vsub.f32 %v5320_v4, %v5435_v34 }
 0x6d4   : >> { %4641 = vpow2.f32 %v3835_v41  ;;  %v3847_v49 = vmul.f32 1.442695, %v3788_v23  ;;  %v3849_v1 = vmul.f32 1.442695, %v3789_v47  ;;  %v3792_v22 = vsub.f32 %v5318_v3, %v5435_v34 }
 0x6d5   : >> { %4643 = vpow2.f32 %v3837_v42  ;;  %v3851_v0 = vmul.f32 1.442695, %v3790_v60  ;;  %v3853_v4 = vmul.f32 1.442695, %v3791_v52  ;;  %v3794_v23 = vsub.f32 %v5322_v5, %v5435_v34 }
 0x6d6   : >> { %4645 = vpow2.f32 %v3839_v57  ;;  %v3793_v57 = vsub.f32 %v5324_v6, %v5435_v34  ;;  %v3855_v3 = vmul.f32 1.442695, %v3792_v22 }
 0x6d7   : >> { %4647 = vpow2.f32 %v3841_v44  ;;  %v3859_v5 = vmul.f32 1.442695, %v3794_v23 }
 0x6d8   : >> { %4649 = vpow2.f32 %v3843_v46  ;;  %v3857_v6 = vmul.f32 1.442695, %v3793_v57 }
 0x6d9   : >> { %4651 = vpow2.f32 %v3845_v25  ;;  %v3795_v25 = vsub.f32 %v5328_v8, %v5435_v34 }
 0x6da   : >> { %4653 = vpow2.f32 %v3847_v49  ;;  %v3796_v49 = vsub.f32 %v5326_v7, %v5435_v34 }
 0x6db   : >> { %4655 = vpow2.f32 %v3849_v1  ;;  %v3797_v1 = vsub.f32 %v5332_v10, %v5435_v34  ;;  %v3861_v8 = vmul.f32 1.442695, %v3795_v25 }
 0x6dc   : >> { %v5489_v61 = vpop.eup %4631  ;;  %4657 = vpow2.f32 %v3851_v0  ;;  %v3798_v0 = vsub.f32 %v5330_v9, %v5435_v34  ;;  %v3863_v7 = vmul.f32 1.442695, %v3796_v49 }
 0x6dd   : >> { %v5493_v26 = vpop.eup %4633  ;;  %4659 = vpow2.f32 %v3853_v4  ;;  %v3799_v4 = vsub.f32 %v5336_v12, %v5435_v34  ;;  %v3865_v10 = vmul.f32 1.442695, %v3797_v1 }
 0x6de   : >> { %v3921_v48 = vadd.f32 %v5493_v26, %v5489_v61  ;;  %v5499_v15 = vpop.eup %4635  ;;  %4661 = vpow2.f32 %v3855_v3  ;;  %v3800_v3 = vsub.f32 %v5334_v11, %v5435_v34  ;;  %v3867_v9 = vmul.f32 1.442695, %v3798_v0 }
 0x6df   : >> { %v5504_v53 = vpop.eup %4637  ;;  %4663 = vpow2.f32 %v3857_v6  ;;  %v3801_v6 = vsub.f32 %v5340_v19, %v5435_v34  ;;  %v3869_v12 = vmul.f32 1.442695, %v3799_v4 }
 0x6e0   : >> { %v3922_v30 = vadd.f32 %v5499_v15, %v3921_v48  ;;  %v5509_v41 = vpop.eup %4639  ;;  %4665 = vpow2.f32 %v3859_v5  ;;  %v3802_v5 = vsub.f32 %v5338_v14, %v5435_v34  ;;  %v3871_v11 = vmul.f32 1.442695, %v3800_v3 }
 0x6e1   : >> { %v5514_v2 = vpop.eup %4641  ;;  %4667 = vpow2.f32 %v3861_v8  ;;  %v3803_v8 = vsub.f32 %v5344_v28, %v5435_v34  ;;  %v3873_v19 = vmul.f32 1.442695, %v3801_v6 }
 0x6e2   : >> { %v3923_v59 = vadd.f32 %v5504_v53, %v3922_v30  ;;  %v5519_v44 = vpop.eup %4643  ;;  %4669 = vpow2.f32 %v3863_v7  ;;  %v3804_v7 = vsub.f32 %v5342_v20, %v5435_v34  ;;  %v3875_v14 = vmul.f32 1.442695, %v3802_v5 }
 0x6e3   : >> { %v5524_v47 = vpop.eup %4645  ;;  %4671 = vpow2.f32 %v3865_v10  ;;  %v3805_v10 = vsub.f32 %v5348_v32, %v5435_v34  ;;  %v3877_v28 = vmul.f32 1.442695, %v3803_v8 }
 0x6e4   : >> { %v3924_v42 = vadd.f32 %v5509_v41, %v3923_v59  ;;  %v5529_v60 = vpop.eup %4647  ;;  %4673 = vpow2.f32 %v3867_v9  ;;  %v3806_v9 = vsub.f32 %v5346_v31, %v5435_v34  ;;  %v3879_v20 = vmul.f32 1.442695, %v3804_v7  ;;  %v5955_v7 = vld [vmem:[#allocation63_spill] sm:$0xff] }
 0x6e5   : >> { %v5534_v52 = vpop.eup %4649  ;;  %4675 = vpow2.f32 %v3869_v12  ;;  %v5953_v12 = vld [vmem:[#allocation62_spill] sm:$0xff]  ;;  %v3881_v32 = vmul.f32 1.442695, %v3805_v10 }
 0x6e6   : >> { %v3925_v24 = vadd.f32 %v5514_v2, %v3924_v42  ;;  %v5539_v22 = vpop.eup %4651  ;;  %4677 = vpow2.f32 %v3871_v11  ;;  %v3883_v31 = vmul.f32 1.442695, %v3806_v9 }
 0x6e7   : >> { %v5544_v57 = vpop.eup %4653  ;;  %4679 = vpow2.f32 %v3873_v19 }
 0x6e8   : >> { %v3926_v46 = vadd.f32 %v5519_v44, %v3925_v24  ;;  %v5549_v23 = vpop.eup %4655  ;;  %4681 = vpow2.f32 %v3875_v14  ;;  %v3809_v14 = vsub.f32 %v5955_v7, %v5435_v34  ;;  %v3895_v7 = vmul.f32 1.442695, %v3812_v33 }
 0x6e9   : >> { %v5554_v25 = vpop.eup %4657  ;;  %4683 = vpow2.f32 %v3877_v28 }
 0x6ea   : >> { %v3927_v48 = vadd.f32 %v5524_v47, %v3926_v46  ;;  %v5559_v49 = vpop.eup %4659  ;;  %4685 = vpow2.f32 %v3879_v20  ;;  %v3889_v9 = vmul.f32 1.442695, %v3809_v14  ;;  %v3897_v14 = vmul.f32 1.442695, %v3813_v36 }
 0x6eb   : >> { %v5564_v1 = vpop.eup %4661  ;;  %4687 = vpow2.f32 %v3881_v32 }
 0x6ec   : >> { %v3928_v30 = vadd.f32 %v5529_v60, %v3927_v48  ;;  %v5569_v0 = vpop.eup %4663  ;;  %4689 = vpow2.f32 %v3883_v31 }
 0x6ed   : >> { %v5574_v4 = vpop.eup %4665 }
 0x6ee   : >> { %v3929_v59 = vadd.f32 %v5534_v52, %v3928_v30  ;;  %v5579_v3 = vpop.eup %4667 }
 0x6ef   : >> { %v5584_v6 = vpop.eup %4669 }
 0x6f0   : >> { %v3930_v42 = vadd.f32 %v5539_v22, %v3929_v59  ;;  %v5589_v11 = vpop.eup %4671 }
 0x6f2   : >> { %v3931_v24 = vadd.f32 %v5544_v57, %v3930_v42 }
 0x6f4   : >> { %v3932_v46 = vadd.f32 %v5549_v23, %v3931_v24 }
 0x6f6   : >> { %v3933_v48 = vadd.f32 %v5554_v25, %v3932_v46 }
 0x6f8   : >> { %v3934_v30 = vadd.f32 %v5559_v49, %v3933_v48  ;;  %v3807_v48 = vsub.f32 %v5953_v12, %v5435_v34 }
 0x6fa   : >> { %v3935_v59 = vadd.f32 %v5564_v1, %v3934_v30  ;;  %v5954_v30 = vld [vmem:[#allocation61_spill] sm:$0xff] }
 0x6fb   : >> { %v3808_v8 = vsub.f32 %v5954_v30, %v5435_v34 }
 0x6fc   : >> { %v3936_v42 = vadd.f32 %v5569_v0, %v3935_v59  ;;  %v5594_v59 = vpop.eup %4673 }
 0x6fd   : >> { %v5599_v28 = vpop.eup %4675 }
 0x6fe   : >> { %v3937_v24 = vadd.f32 %v5574_v4, %v3936_v42  ;;  %v3885_v42 = vmul.f32 1.442695, %v3807_v48  ;;  %v5602_v12 = vpop.eup %4677  ;;  %v3891_v48 = vmul.f32 1.442695, %v3810_v27 }
 0x700   : >> { %v3938_v46 = vadd.f32 %v5579_v3, %v3937_v24  ;;  %v3887_v24 = vmul.f32 1.442695, %v3808_v8  ;;  %4691 = vpow2.f32 %v3885_v42  ;;  %v3893_v8 = vmul.f32 1.442695, %v3811_v29 }
 0x701   : >> { %v3899_v42 = vmul.f32 1.442695, %v3814_v16 }
 0x702   : >> { %v3939_v5 = vadd.f32 %v5584_v6, %v3938_v46  ;;  %4693 = vpow2.f32 %v3887_v24  ;;  %v3903_v24 = vmul.f32 1.442695, %v3816_v18 }
 0x703   : >> { %4695 = vpow2.f32 %v3889_v9  ;;  %v3907_v9 = vmul.f32 1.442695, %v3818_v54 }
 0x704   : >> { %v3940_v19 = vadd.f32 %v5589_v11, %v3939_v5  ;;  %v5605_v5 = vpop.eup %4679  ;;  %4697 = vpow2.f32 %v3891_v48 }
 0x705   : >> { %v5611_v30 = vpop.eup %4681  ;;  %4699 = vpow2.f32 %v3893_v8 }
 0x706   : >> { %v3941_v10 = vadd.f32 %v5594_v59, %v3940_v19  ;;  %v5617_v19 = vpop.eup %4683  ;;  %4701 = vpow2.f32 %v3895_v7 }
 0x707   : >> { %v5623_v27 = vpop.eup %4685  ;;  %4703 = vpow2.f32 %v3897_v14  ;;  %v5959_v14 = vsub.f32 %v5422_v43, %v5435_v34 }
 0x708   : >> { %v3942_v46 = vadd.f32 %v5599_v28, %v3941_v10  ;;  %v5629_v29 = vpop.eup %4687  ;;  %v3901_v10 = vmul.f32 1.442695, %v3815_v17  ;;  %4705 = vpow2.f32 %v3899_v42 }
 0x709   : >> { %v5635_v33 = vpop.eup %4689 }
 0x70a   : >> { %v3943_v20 = vadd.f32 %v5602_v12, %v3942_v46  ;;  %4707 = vpow2.f32 %v3901_v10  ;;  %v3905_v46 = vmul.f32 1.442695, %v3817_v21 }
 0x70b   : >> { %4709 = vpow2.f32 %v3903_v24  ;;  %v5961_v24 = vsub.f32 %v5424_v63, %v5435_v34 }
 0x70c   : >> { %v3944_v32 = vadd.f32 %v5605_v5, %v3943_v20  ;;  %4711 = vpow2.f32 %v3905_v46  ;;  %v5956_v20 = vsub.f32 %v5414_v58, %v5435_v34 }
 0x70d   : >> { %v5641_v36 = vpop.eup %4691  ;;  %4713 = vpow2.f32 %v3907_v9 }
 0x70e   : >> { %v3945_v31 = vadd.f32 %v5611_v30, %v3944_v32  ;;  %v3909_v48 = vmul.f32 1.442695, %v5956_v20  ;;  %v5957_v32 = vsub.f32 %v5411_v62, %v5435_v34 }
 0x70f   : >> { %v5647_v16 = vpop.eup %4693 }
 0x710   : >> { %v3946_v35 = vadd.f32 %v5617_v19, %v3945_v31  ;;  %v5653_v17 = vpop.eup %4695  ;;  %v3911_v8 = vmul.f32 1.442695, %v5957_v32  ;;  %4715 = vpow2.f32 %v3909_v48  ;;  %v5958_v31 = vsub.f32 %v5416_v51, %v5435_v34 }
 0x711   : >> { %v5659_v18 = vpop.eup %4697 }
 0x712   : >> { %v3947_v38 = vadd.f32 %v5623_v27, %v3946_v35  ;;  %v5665_v21 = vpop.eup %4699  ;;  %v3913_v7 = vmul.f32 1.442695, %v5958_v31  ;;  %4717 = vpow2.f32 %v3911_v8 }
 0x713   : >> { %v5671_v54 = vpop.eup %4701 }
 0x714   : >> { %v3948_v37 = vadd.f32 %v5629_v29, %v3947_v38  ;;  %v5677_v35 = vpop.eup %4703  ;;  %v3915_v38 = vmul.f32 1.442695, %v5959_v14  ;;  %4719 = vpow2.f32 %v3913_v7 }
 0x715   : >> { %v5683_v42 = vpop.eup %4705 }
 0x716   : >> { %v3949_v40 = vadd.f32 %v5635_v33, %v3948_v37  ;;  %v5960_v37 = vsub.f32 %v5430_v13, %v5435_v34  ;;  %4721 = vpow2.f32 %v3915_v38 }
 0x718   : >> { %v3950_v39 = vadd.f32 %v5641_v36, %v3949_v40  ;;  %v3917_v10 = vmul.f32 1.442695, %v5960_v37  ;;  %v5689_v40 = vpop.eup %4707 }
 0x719   : >> { %v4710_v46 = vpop.eup %4709 }
 0x71a   : >> { %v3951_v50 = vadd.f32 %v5647_v16, %v3950_v39  ;;  %v3919_v39 = vmul.f32 1.442695, %v5961_v24  ;;  %4723 = vpow2.f32 %v3917_v10  ;;  %v4712_v9 = vpop.eup %4711 }
 0x71b   : >> { %v4714_v20 = vpop.eup %4713 }
 0x71c   : >> { %v3952_v45 = vadd.f32 %v5653_v17, %v3951_v50  ;;  %4725 = vpow2.f32 %v3919_v39 }
 0x71d   : >> { %v4716_v48 = vpop.eup %4715 }
 0x71e   : >> { %v3953_v56 = vadd.f32 %v5659_v18, %v3952_v45 }
 0x71f   : >> { %v4718_v32 = vpop.eup %4717 }
 0x720   : >> { %v3954_v55 = vadd.f32 %v5665_v21, %v3953_v56 }
 0x722   : >> { %v3955_v58 = vadd.f32 %v5671_v54, %v3954_v55  ;;  %v4720_v55 = vpop.eup %4719 }
 0x723   : >> { %v4722_v7 = vpop.eup %4721 }
 0x724   : >> { %v3956_v62 = vadd.f32 %v5677_v35, %v3955_v58 }
 0x726   : >> { %v3957_v51 = vadd.f32 %v5683_v42, %v3956_v62 }
 0x727   : >> { %v4724_v34 = vpop.eup %4723 }
 0x728   : >> { %v3958_v43 = vadd.f32 %v5689_v40, %v3957_v51 }
 0x729   : >> { %v4726_v14 = vpop.eup %4725 }
 0x72a   : >> { %v3959_v50 = vadd.f32 %v4710_v46, %v3958_v43 }
 0x72c   : >> { %v3960_v45 = vadd.f32 %v4712_v9, %v3959_v50 }
 0x72e   : >> { %v3961_v13 = vadd.f32 %v4714_v20, %v3960_v45 }
 0x730   : >> { %v3962_v56 = vadd.f32 %v4716_v48, %v3961_v13 }
 0x732   : >> { %v3963_v8 = vadd.f32 %v4718_v32, %v3962_v56 }
 0x734   : >> { %v3964_v31 = vadd.f32 %v4720_v55, %v3963_v8 }
 0x736   : >> { %v3965_v58 = vadd.f32 %v4722_v7, %v3964_v31 }
 0x738   : >> { %v3966_v63 = vadd.f32 %v4724_v34, %v3965_v58 }
 0x73a   : >> { %v3967_v38 = vadd.f32 %v4726_v14, %v3966_v63 }
 0x73c   : >> { %v3968_v62 = vrot.slane %v3967_v38, 4 }
 0x73e   : >> { %v3969_v37 = vadd.f32 %v3968_v62, %v3967_v38 }
 0x740   : >> { %v3970_v10 = vrot.slane %v3969_v37, 2 }
 0x742   : >> { %v3971_v51 = vadd.f32 %v3970_v10, %v3969_v37 }
 0x744   : >> { %v3972_v24 = vrot.slane %v3971_v51, 1 }
 0x746   : >> { %v3973_v39 = vadd.f32 %v3972_v24, %v3971_v51 }
 0x748   : >> { %4727 = vrcp.f32 %v3973_v39 }
 0x755   : >> { %v4728_v43 = vpop.eup %4727 }
 0x756   : >> { %v3975_v50 = vmul.f32 %v4728_v43, %v3973_v39 }
 0x758   : >> { %v3976_v45 = vsub.f32 2.0, %v3975_v50 }
 0x75a   : >> { %v5695_v13 = vmul.f32 %v4728_v43, %v3976_v45 }
 0x75c   : >> { %v4009_v56 = vmul.f32 %v5647_v16, %v5695_v13  ;;  %v3993_v8 = vmul.f32 %v5564_v1, %v5695_v13  ;;  %v4008_v31 = vmul.f32 %v5641_v36, %v5695_v13  ;;  %v3992_v58 = vmul.f32 %v5559_v49, %v5695_v13 }
 0x75d   : >> { %v4007_v63 = vmul.f32 %v5635_v33, %v5695_v13  ;;  %v3991_v38 = vmul.f32 %v5554_v25, %v5695_v13  ;;  %v4006_v1 = vmul.f32 %v5629_v29, %v5695_v13  ;;  %v3990_v36 = vmul.f32 %v5549_v23, %v5695_v13 }
 0x75e   : >> { %4406 = vmatprep.subr.mxu1 %v4009_v56  ;;  %v4005_v16 = vmul.f32 %v5623_v27, %v5695_v13  ;;  %v3989_v49 = vmul.f32 %v5544_v57, %v5695_v13  ;;  %v4025_v33 = vmul.f32 %v4726_v14, %v5695_v13  ;;  %v5719_v62 = vmul.f32 %v4724_v34, %v5695_v13 }
 0x75f   : >> { %4407 = vmatpush3.msra.mxu1 %v3993_v8  ;;  %v5722_v25 = vmul.f32 %v4722_v7, %v5695_v13  ;;  %v5725_v29 = vmul.f32 %v4720_v55, %v5695_v13  ;;  %v5728_v23 = vmul.f32 %v4718_v32, %v5695_v13  ;;  %v5731_v27 = vmul.f32 %v4716_v48, %v5695_v13 }
 0x760   : >> { %4408 = vmatprep.subr.mxu1 %v4008_v31  ;;  %v5734_v57 = vmul.f32 %v4714_v20, %v5695_v13  ;;  %v5737_v14 = vmul.f32 %v4712_v9, %v5695_v13  ;;  %v4004_v7 = vmul.f32 %v5617_v19, %v5695_v13  ;;  %v5742_v55 = vmul.f32 %v4710_v46, %v5695_v13  ;;  %v5962_v46 = vld [vmem:[#allocation10_spill] sm:$0xff] }
 0x761   : >> { %4409 = vmatpush3.msra.mxu1 %v3992_v58  ;;  %v5746_v32 = vmul.f32 %v5689_v40, %v5695_v13  ;;  %v5750_v48 = vmul.f32 %v5683_v42, %v5695_v13  ;;  %v3988_v9 = vmul.f32 %v5539_v22, %v5695_v13  ;;  %v4003_v20 = vmul.f32 %v5611_v30, %v5695_v13 }
 0x762   : >> { %4410 = vmatprep.subr.mxu1 %v4007_v63  ;;  %v3987_v19 = vmul.f32 %v5534_v52, %v5695_v13  ;;  %v4002_v40 = vmul.f32 %v5605_v5, %v5695_v13  ;;  %v3986_v42 = vmul.f32 %v5529_v60, %v5695_v13  ;;  %v4001_v22 = vmul.f32 %v5602_v12, %v5695_v13 }
 0x763   : >> { %4411 = vmatpush3.msra.mxu1 %v3991_v38  ;;  %v3985_v30 = vmul.f32 %v5524_v47, %v5695_v13  ;;  %v4000_v52 = vmul.f32 %v5599_v28, %v5695_v13  ;;  %v3984_v5 = vmul.f32 %v5519_v44, %v5695_v13  ;;  %v3999_v60 = vmul.f32 %v5594_v59, %v5695_v13 }
 0x764   : >> { %4412 = vmatprep.subr.mxu1 %v4006_v1  ;;  %v3983_v12 = vmul.f32 %v5514_v2, %v5695_v13  ;;  %v3998_v47 = vmul.f32 %v5589_v11, %v5695_v13  ;;  %v3982_v28 = vmul.f32 %v5509_v41, %v5695_v13  ;;  %v3997_v44 = vmul.f32 %v5584_v6, %v5695_v13 }
 0x765   : >> { %4413 = vmatpush3.msra.mxu1 %v3990_v36  ;;  %v3981_v59 = vmul.f32 %v5504_v53, %v5695_v13  ;;  %v3996_v2 = vmul.f32 %v5579_v3, %v5695_v13  ;;  %v3980_v11 = vmul.f32 %v5499_v15, %v5695_v13  ;;  %v3995_v41 = vmul.f32 %v5574_v4, %v5695_v13 }
 0x766   : >> { %4414 = vmatprep.subr.mxu1 %v4005_v16  ;;  %v3979_v6 = vmul.f32 %v5493_v26, %v5695_v13  ;;  %v3994_v53 = vmul.f32 %v5569_v0, %v5695_v13  ;;  %v3978_v3 = vmul.f32 %v5489_v61, %v5695_v13  ;;  %v4814_v15 = vmov 0.0  }
 0x767   : >> { %4415 = vmatpush3.msra.mxu1 %v3989_v49  ;;  %v4014_v61 = vmul.f32 %v5677_v35, %v5695_v13  ;;  %v4013_v26 = vmul.f32 %v5671_v54, %v5695_v13  ;;  %v4012_v0 = vmul.f32 %v5665_v21, %v5695_v13  ;;  %v4011_v4 = vmul.f32 %v5659_v18, %v5695_v13  ;;  %v5963_v54 = vld [vmem:[#allocation12_spill] sm:$0xff] }
 0x768   : >> { %4416 = vmatprep.subr.mxu1 %v4004_v7  ;;  %v4010_v35 = vmul.f32 %v5653_v17, %v5695_v13 }
 0x769   : >> { %4417 = vmatpush3.msra.mxu1 %v3988_v9 }
 0x76a   : >> { %4418 = vmatprep.subr.mxu1 %v4003_v20 }
 0x76b   : >> { %4419 = vmatpush3.msra.mxu1 %v3987_v19 }
 0x76c   : >> { %4420 = vmatprep.subr.mxu1 %v4002_v40 }
 0x76d   : >> { %4421 = vmatpush3.msra.mxu1 %v3986_v42 }
 0x76e   : >> { %4422 = vmatprep.subr.mxu1 %v4001_v22 }
 0x76f   : >> { %4423 = vmatpush3.msra.mxu1 %v3985_v30 }
 0x770   : >> { %4424 = vmatprep.subr.mxu1 %v4000_v52 }
 0x771   : >> { %4425 = vmatpush3.msra.mxu1 %v3984_v5 }
 0x772   : >> { %4426 = vmatprep.subr.mxu1 %v3999_v60 }
 0x773   : >> { %4427 = vmatpush3.msra.mxu1 %v3983_v12 }
 0x774   : >> { %4428 = vmatprep.subr.mxu1 %v3998_v47 }
 0x775   : >> { %4429 = vmatpush3.msra.mxu1 %v3982_v28 }
 0x776   : >> { %4430 = vmatprep.subr.mxu1 %v3997_v44 }
 0x777   : >> { %4431 = vmatpush3.msra.mxu1 %v3981_v59 }
 0x778   : >> { %4432 = vmatprep.subr.mxu1 %v3996_v2 }
 0x779   : >> { %4433 = vmatpush3.msra.mxu1 %v3980_v11 }
 0x77a   : >> { %4434 = vmatprep.subr.mxu1 %v3995_v41 }
 0x77b   : >> { %4435 = vmatpush3.msra.mxu1 %v3979_v6 }
 0x77c   : >> { %4436 = vmatprep.subr.mxu1 %v3994_v53 }
 0x77d   : >> { %4437 = vmatpush3.msra.mxu1 %v3978_v3 }
 0x77e   : >> { %4091 = vmatmul.mubr.f32.vlgmr.msra.gmra.mxu1 %v5962_v46  ;;  %4542 = vmatprep.subr.mxu1 %v4814_v15 }
 0x77f   : >> { %4543 = vmatpush3.msra.mxu1 %v4025_v33  ;;  %4574 = vmatprep.mubr.msk.f32.mxu1 %vm4815_vm5, %v4814_v15 }
 0x780   : >> { %4544 = vmatprep.subr.mxu1 %v4814_v15 }
 0x781   : >> { %4545 = vmatpush3.msra.mxu1 %v5719_v62 }
 0x782   : >> { %4546 = vmatprep.subr.mxu1 %v4814_v15 }
 0x783   : >> { %4547 = vmatpush3.msra.mxu1 %v5722_v25 }
 0x784   : >> { %4548 = vmatprep.subr.mxu1 %v4814_v15 }
 0x785   : >> { %4549 = vmatpush3.msra.mxu1 %v5725_v29 }
 0x786   : >> { %4550 = vmatprep.subr.mxu1 %v4814_v15 }
 0x787   : >> { %4551 = vmatpush3.msra.mxu1 %v5728_v23 }
 0x788   : >> { %4552 = vmatprep.subr.mxu1 %v4814_v15 }
 0x789   : >> { %4553 = vmatpush3.msra.mxu1 %v5731_v27 }
 0x78a   : >> { %4554 = vmatprep.subr.mxu1 %v4814_v15 }
 0x78b   : >> { %4555 = vmatpush3.msra.mxu1 %v5734_v57 }
 0x78c   : >> { %4556 = vmatprep.subr.mxu1 %v4814_v15 }
 0x78d   : >> { %4557 = vmatpush3.msra.mxu1 %v5737_v14 }
 0x78e   : >> { %4558 = vmatprep.subr.mxu1 %v4814_v15 }
 0x78f   : >> { %4559 = vmatpush3.msra.mxu1 %v5742_v55 }
 0x790   : >> { %4560 = vmatprep.subr.mxu1 %v4814_v15 }
 0x791   : >> { %4561 = vmatpush3.msra.mxu1 %v5746_v32 }
 0x792   : >> { %4562 = vmatprep.subr.mxu1 %v4814_v15 }
 0x793   : >> { %4563 = vmatpush3.msra.mxu1 %v5750_v48 }
 0x794   : >> { %4564 = vmatprep.subr.mxu1 %v4814_v15 }
 0x795   : >> { %4565 = vmatpush3.msra.mxu1 %v4014_v61 }
 0x796   : >> { %4566 = vmatprep.subr.mxu1 %v4814_v15 }
 0x797   : >> { %4567 = vmatpush3.msra.mxu1 %v4013_v26 }
 0x798   : >> { %4568 = vmatprep.subr.mxu1 %v4814_v15 }
 0x799   : >> { %4569 = vmatpush3.msra.mxu1 %v4012_v0 }
 0x79a   : >> { %4570 = vmatprep.subr.mxu1 %v4814_v15 }
 0x79b   : >> { %4571 = vmatpush3.msra.mxu1 %v4011_v4 }
 0x79c   : >> { %4572 = vmatprep.subr.mxu1 %v4814_v15 }
 0x79d   : >> { %4573 = vmatpush3.msra.mxu1 %v4010_v35 }
 0x79e   : >> { %4575 = vmatmul.mubr.f32.vlgmr.msra.gmra.mxu1 %v5963_v54 }
 0x83e   : >> { %v4438_v34 = vpop.f32.mrf.mxu1 }
 0x840   : >> { %v4439_v37 = vpop.f32.mrf.mxu1 }
 0x841   : >> { %v4440_v10 = vadd.f32 %v4439_v37, %v4438_v34 }
 0x85d   : > { %3264 = sbr.rel (!%p3262_p5) target bundleno = 1424 (0x590), region = 117 }
 0x85e   : >> { %v4162_v21 = vpop.f32.mrf.mxu1 }
 0x85f   : >> { %v4163_v51 = vadd.f32 %v4440_v10, %v4162_v21 }
 0x860   : >> { %v4576_v24 = vpop.f32.mrf.mxu1 }
 0x861   : >> { %4168 = vst [vmem:[%s4167_s23] sm:$0xf] %v4163_v51 }
 0x862 PF: > { %s22_s13 = sadd.s32 1, %s4799_s13  }
 0x863   : > { %p19_p12 = scmp.ge.s32.totalorder %s22_s13, 4  }
 0x865   :  { %21 = sbr.rel (!%p19_p12) target bundleno = 2 (0x2), region = 128 }
 0x86a   :  { %4190 = vsyncpa [#allocation4], 1 }
 0x86b   :  { %4192 = vsyncpa [#allocation4 + $0x1], 1 }
 0x86c   :  { %4193 = vsyncpa [#allocation6], 1 }

</bundles_post_ra>
